<compile_context>
chip_gen: v7x
topology: tpu7x:2x2x1
jax: 0.10.0
libtpu: 0.0.40
codegen_flags: <defaults>
</compile_context>

<pallas_src>
import functools

import jax
import jax.numpy as jnp
from jax import lax
from jax.experimental import pallas as pl
from jax.experimental.pallas import tpu as pltpu

_VMEM_LIMIT = 16 * 1024 * 1024   # explicit budget; far below physical VMEM on v5e/v6e/v7x
_LN_EPS = 1e-5


def _round_up(x, m):
    return ((x + m - 1) // m) * m


# ------------------------------ in-kernel helpers ----------------------------

def _layernorm(x, g, b, eps):
    mu = jnp.mean(x, axis=-1, keepdims=True)
    d = x - mu
    var = jnp.mean(d * d, axis=-1, keepdims=True)
    return d * lax.rsqrt(var + eps) * g + b


def _gelu_exact(y):
    # erf-exact GELU (matches torch.nn.functional.gelu default).
    return 0.5 * y * (1.0 + lax.erf(y * 0.7071067811865476))


# --------------------------- tokenizer conv kernel ---------------------------

def _conv_relu_kernel(x_ref, w_ref, o_ref):
    y = jnp.dot(x_ref[...], w_ref[...], preferred_element_type=jnp.float32)
    o_ref[...] = jnp.maximum(y, 0.0)


def pallas_conv_relu(cols_bf16, w_bf16):
    """Conv-as-matmul + fused ReLU. cols: (M, Kpad) bf16, w: (Kpad, Cout) bf16."""
    M, K = cols_bf16.shape
    _, Cout = w_bf16.shape
    tm = M
    for cand in (256, 128, 64, 32, 16, 8):
        if M % cand == 0 and M // cand >= 2:   # >=2 parallel steps helps v7x's 2 TCs
            tm = cand
            break
    return pl.pallas_call(
        _conv_relu_kernel,
        out_shape=jax.ShapeDtypeStruct((M, Cout), jnp.float32),
        grid=(M // tm,),
        in_specs=[pl.BlockSpec((tm, K), lambda i: (i, 0)),
                  pl.BlockSpec((K, Cout), lambda i: (0, 0))],
        out_specs=pl.BlockSpec((tm, Cout), lambda i: (i, 0)),
        compiler_params=pltpu.CompilerParams(
            dimension_semantics=("parallel",),
            vmem_limit_bytes=_VMEM_LIMIT),
    )(cols_bf16, w_bf16)


# ------------------------ fused transformer block kernel ---------------------

def _block_kernel(x_ref, ln1_g_ref, ln1_b_ref, w_qkv_ref, w_proj_ref, b_proj_ref,
                  ln2_g_ref, ln2_b_ref, w_fc1_ref, b_fc1_ref, w_fc2_ref, b_fc2_ref,
                  o_ref, *, num_heads, scale, eps):
    x = x_ref[0]                                     # (N, C) f32 residual stream
    N, C = x.shape
    Dh = C // num_heads

    # ---- pre-norm attention ----
    h = _layernorm(x, ln1_g_ref[...], ln1_b_ref[...], eps)
    qkv = jnp.dot(h.astype(jnp.bfloat16), w_qkv_ref[...],
                  preferred_element_type=jnp.float32)            # (N, 3C) f32
    heads = []
    for hd in range(num_heads):                      # unrolled; all heads in one kernel
        q = qkv[:, hd * Dh:(hd + 1) * Dh]
        k = qkv[:, C + hd * Dh:C + (hd + 1) * Dh]
        v = qkv[:, 2 * C + hd * Dh:2 * C + (hd + 1) * Dh]
        s = lax.dot_general(q.astype(jnp.bfloat16), k.astype(jnp.bfloat16),
                            (((1,), (1,)), ((), ())),
                            preferred_element_type=jnp.float32) * scale   # (N, N)
        s = s - jnp.max(s, axis=-1, keepdims=True)
        p = jnp.exp(s)
        p = p / jnp.sum(p, axis=-1, keepdims=True)                # softmax in f32
        heads.append(jnp.dot(p.astype(jnp.bfloat16), v.astype(jnp.bfloat16),
                             preferred_element_type=jnp.float32))  # (N, Dh)
    attn = jnp.concatenate(heads, axis=-1)                         # lane-dense (N, C)
    attn = jnp.dot(attn.astype(jnp.bfloat16), w_proj_ref[...],
                   preferred_element_type=jnp.float32) + b_proj_ref[...]
    x = x + attn                                     # DropPath -> identity (eval)

    # ---- pre-norm MLP ----
    h2 = _layernorm(x, ln2_g_ref[...], ln2_b_ref[...], eps)
    m = jnp.dot(h2.astype(jnp.bfloat16), w_fc1_ref[...],
                preferred_element_type=jnp.float32) + b_fc1_ref[...]
    m = _gelu_exact(m)
    m = jnp.dot(m.astype(jnp.bfloat16), w_fc2_ref[...],
                preferred_element_type=jnp.float32) + b_fc2_ref[...]
    o_ref[0] = x + m


def pallas_transformer_block(x, lp, num_heads, eps=_LN_EPS):
    B, N, C = x.shape
    scale = (C // num_heads) ** -0.5
    tok_spec = pl.BlockSpec((1, N, C), lambda b: (b, 0, 0))

    def w_spec(a):
        return pl.BlockSpec(a.shape, lambda b: (0,) * a.ndim)

    return pl.pallas_call(
        functools.partial(_block_kernel, num_heads=num_heads, scale=scale, eps=eps),
        out_shape=jax.ShapeDtypeStruct((B, N, C), jnp.float32),
        grid=(B,),
        in_specs=[tok_spec,
                  w_spec(lp["ln1_g"]), w_spec(lp["ln1_b"]), w_spec(lp["w_qkv"]),
                  w_spec(lp["w_proj"]), w_spec(lp["b_proj"]),
                  w_spec(lp["ln2_g"]), w_spec(lp["ln2_b"]),
                  w_spec(lp["w_fc1"]), w_spec(lp["b_fc1"]),
                  w_spec(lp["w_fc2"]), w_spec(lp["b_fc2"])],
        out_specs=tok_spec,
        compiler_params=pltpu.CompilerParams(
            dimension_semantics=("parallel",),
            vmem_limit_bytes=_VMEM_LIMIT),
    )(x, lp["ln1_g"], lp["ln1_b"], lp["w_qkv"], lp["w_proj"], lp["b_proj"],
      lp["ln2_g"], lp["ln2_b"], lp["w_fc1"], lp["b_fc1"], lp["w_fc2"], lp["b_fc2"])


# ---------------- fused tail: final LN + SE-like pool + classifier -----------

def _tail_kernel(x_ref, lnf_g_ref, lnf_b_ref, w1_ref, b1_ref, w2_ref, b2_ref,
                 fc_w_ref, fc_b_ref, o_ref, *, eps):
    B, N, C = x_ref.shape
    ones_c = jnp.ones((1, C), jnp.float32)
    rows = []
    for b in range(B):                               # unrolled over tiny batch
        h = _layernorm(x_ref[b], lnf_g_ref[...], lnf_b_ref[...], eps)      # (N, C)
        # AdaptiveAvgPool1d(1) over C  -> (1, N)
        s = lax.dot_general(ones_c, h, (((1,), (1,)), ((), ())),
                            preferred_element_type=jnp.float32) * (1.0 / C)
        h1 = jnp.maximum(jnp.dot(s, w1_ref[...],
                                 preferred_element_type=jnp.float32) + b1_ref[...], 0.0)
        g = jax.nn.sigmoid(jnp.dot(h1, w2_ref[...],
                                   preferred_element_type=jnp.float32) + b2_ref[...])  # (1, N)
        # gate tokens, then mean over N  -> (1, C)
        feat = jnp.dot(g, h, preferred_element_type=jnp.float32) * (1.0 / N)
        rows.append(jnp.dot(feat, fc_w_ref[...],
                            preferred_element_type=jnp.float32) + fc_b_ref[...])
    o_ref[...] = jnp.concatenate(rows, axis=0)


def pallas_tail(x, p, eps=_LN_EPS):
    B, N, C = x.shape
    NC = p["fc_w"].shape[1]

    def w_spec(a):
        return pl.BlockSpec(a.shape, lambda i: (0,) * a.ndim)

    return pl.pallas_call(
        functools.partial(_tail_kernel, eps=eps),
        out_shape=jax.ShapeDtypeStruct((B, NC), jnp.float32),
        grid=(1,),
        in_specs=[pl.BlockSpec((B, N, C), lambda i: (0, 0, 0)),
                  w_spec(p["lnf_g"]), w_spec(p["lnf_b"]),
                  w_spec(p["se_w1"]), w_spec(p["se_b1"]),
                  w_spec(p["se_w2"]), w_spec(p["se_b2"]),
                  w_spec(p["fc_w"]), w_spec(p["fc_b"])],
        out_specs=pl.BlockSpec((B, NC), lambda i: (0, 0)),
        compiler_params=pltpu.CompilerParams(
            dimension_semantics=("arbitrary",),
            vmem_limit_bytes=_VMEM_LIMIT),
    )(x, p["lnf_g"], p["lnf_b"], p["se_w1"], p["se_b1"],
      p["se_w2"], p["se_b2"], p["fc_w"], p["fc_b"])


# ------------------------------ plain-JAX glue -------------------------------

def im2col(x_nhwc, ksize, stride, pad, k_total):
    B, H, W, Cin = x_nhwc.shape
    xp = jnp.pad(x_nhwc, ((0, 0), (pad, pad), (pad, pad), (0, 0)))
    OH = (H + 2 * pad - ksize) // stride + 1
    OW = (W + 2 * pad - ksize) // stride + 1
    cols = []
    for di in range(ksize):
        for dj in range(ksize):
            cols.append(xp[:, di:di + stride * (OH - 1) + 1:stride,
                           dj:dj + stride * (OW - 1) + 1:stride, :])
    cols = jnp.concatenate(cols, axis=-1).reshape(B * OH * OW, ksize * ksize * Cin)
    kraw = ksize * ksize * Cin
    if k_total > kraw:
        cols = jnp.pad(cols, ((0, 0), (0, k_total - kraw)))   # zero-pad contraction dim
    return cols, OH, OW


def max_pool_nhwc(x, k, s, p):
    # TODO(synk): nn.MaxPool2d done with lax.reduce_window (plain-JAX glue, not Pallas).
    return lax.reduce_window(
        x, -jnp.inf, lax.max,
        window_dimensions=(1, k, k, 1),
        window_strides=(1, s, s, 1),
        padding=((0, 0), (p, p), (p, p), (0, 0)))


# ------------------------------- SECCT forward -------------------------------

def secct_forward(x_nchw, params, cfg):
    B = x_nchw.shape[0]
    C = cfg["embedding_dim"]
    H = cfg["num_heads"]

    # Tokenizer: Conv2d (no bias) -> ReLU -> MaxPool2d -> flatten(2,3).transpose(-2,-1)
    x = jnp.transpose(x_nchw, (0, 2, 3, 1))                    # NCHW -> NHWC
    kraw = cfg["kernel_size"] ** 2 * cfg["n_input_channels"]
    kpad = _round_up(kraw, 128)
    cols, OH, OW = im2col(x, cfg["kernel_size"], cfg["stride"], cfg["padding"], kpad)
    conv_out = pallas_conv_relu(cols.astype(jnp.bfloat16), params["conv_w"])
    conv_out = conv_out.reshape(B, OH, OW, C)
    pooled = max_pool_nhwc(conv_out, cfg["pool_k"], cfg["pool_s"], cfg["pool_p"])
    N = pooled.shape[1] * pooled.shape[2]
    xtok = pooled.reshape(B, N, C)

    # TransformerClassifier
    xtok = xtok + params["pos_emb"]                            # Dropout(p=0.0)/eval -> id
    for lp in params["layers"]:
        xtok = pallas_transformer_block(xtok, lp, num_heads=H)

    return pallas_tail(xtok, params)                           # (B, num_classes)


# ------------------------------- parameter init ------------------------------

def init_params(key, cfg):
    C = cfg["embedding_dim"]
    Cin = cfg["n_input_channels"]
    k = cfg["kernel_size"]
    FF = int(C * cfg["mlp_ratio"])
    L = cfg["num_layers"]
    N = cfg["seq_len"]
    red = 16                                                   # SElikePool reduction
    hid = C // red
    NC = cfg["num_classes"]
    kraw = k * k * Cin
    kpad = _round_up(kraw, 128)

    keys = jax.random.split(key, 8 + L)

    def tn(k_, shape, std):
        return std * jax.random.truncated_normal(k_, -2.0, 2.0, shape, jnp.float32)

    # Conv2d kaiming_normal_: std = sqrt(2 / fan_in); pack (Cout,Cin,KH,KW) ->
    # (KH*KW*Cin, Cout) to match im2col column order, pad rows, cast bf16 once.
    conv = jax.random.normal(keys[0], (C, Cin, k, k), jnp.float32) * (2.0 / (Cin * k * k)) ** 0.5
    conv_w = jnp.transpose(conv, (2, 3, 1, 0)).reshape(kraw, C)
    conv_w = jnp.pad(conv_w, ((0, kpad - kraw), (0, 0))).astype(jnp.bfloat16)

    params = {
        "conv_w": conv_w,
        "pos_emb": tn(keys[1], (1, N, C), 0.2),
        "lnf_g": jnp.ones((1, C), jnp.float32), "lnf_b": jnp.zeros((1, C), jnp.float32),
        # SE linears operate on the length-N token-mean vector (requires N == C)
        "se_w1": tn(keys[2], (N, hid), 0.02), "se_b1": jnp.zeros((1, hid), jnp.float32),
        "se_w2": tn(keys[3], (hid, N), 0.02), "se_b2": jnp.zeros((1, N), jnp.float32),
        "fc_w": tn(keys[4], (C, NC), 0.02), "fc_b": jnp.zeros((1, NC), jnp.float32),
        "layers": [],
    }
    for i in range(L):
        lk = jax.random.split(keys[8 + i], 4)
        params["layers"].append({
            "ln1_g": jnp.ones((1, C), jnp.float32), "ln1_b": jnp.zeros((1, C), jnp.float32),
            "ln2_g": jnp.ones((1, C), jnp.float32), "ln2_b": jnp.zeros((1, C), jnp.float32),
            "w_qkv": tn(lk[0], (C, 3 * C), 0.02).astype(jnp.bfloat16),        # bias=False
            "w_proj": tn(lk[1], (C, C), 0.02).astype(jnp.bfloat16),
            "b_proj": jnp.zeros((1, C), jnp.float32),
            "w_fc1": tn(lk[2], (C, FF), 0.02).astype(jnp.bfloat16),
            "b_fc1": jnp.zeros((1, FF), jnp.float32),
            "w_fc2": tn(lk[3], (FF, C), 0.02).astype(jnp.bfloat16),
            "b_fc2": jnp.zeros((1, C), jnp.float32),
        })
    return params


# ------------------------------------ main -----------------------------------

if __name__ == "__main__":
    # Small SECCT config: img 32x32 -> conv(s=2) 16x16 -> maxpool(s=2) 8x8 -> N=64 tokens.
    # SElikePool requires sequence_length == embedding_dim, so embedding_dim = 64.
    cfg = dict(
        img_size=32, embedding_dim=64, n_input_channels=3,
        kernel_size=7, stride=2, padding=3,
        pool_k=3, pool_s=2, pool_p=1,
        num_layers=2, num_heads=4, mlp_ratio=2.0, num_classes=10,
        seq_len=64,
    )
    assert cfg["seq_len"] == cfg["embedding_dim"], "SElikePool needs N == emb_dim"

    key = jax.random.PRNGKey(0)
    pkey, xkey = jax.random.split(key)
    params = init_params(pkey, cfg)
    x = jax.random.normal(xkey, (2, cfg["n_input_channels"], cfg["img_size"], cfg["img_size"]),
                          jnp.float32)                          # NCHW, like the torch module

    fwd = jax.jit(functools.partial(secct_forward, cfg=cfg))
    out = fwd(x, params)
    jax.block_until_ready(out)
    assert out.shape == (2, cfg["num_classes"])
    assert bool(jnp.all(jnp.isfinite(out)))
    print("KERNEL_OK")
</pallas_src>

<mosaic_0001>
module attributes {stable_mosaic.version = 11 : i64} {
  func.func @_conv_relu_kernel(%arg0: i32, %arg1: memref<256x256xbf16, #tpu.memory_space<vmem>>, %arg2: memref<256x64xbf16, #tpu.memory_space<vmem>>, %arg3: memref<256x64xf32, #tpu.memory_space<vmem>>) attributes {dimension_semantics = [#tpu.dimension_semantics<parallel>], iteration_bounds = array<i64: 2>, scalar_prefetch = 0 : i64, scratch_operands = 0 : i64, tpu.core_type = #tpu.core_type<tc>, window_params = [{transform_indices = @transform_0, window_bounds = array<i64: 256, 256>}, {pipeline_mode = #tpu.pipeline_mode<synchronous>, transform_indices = @transform_1, window_bounds = array<i64: 256, 64>}, {transform_indices = @transform_2, window_bounds = array<i64: 256, 64>}]} {
    %c0 = arith.constant 0 : index
    %c0_0 = arith.constant 0 : index
    %0 = vector.load %arg1[%c0, %c0_0] : memref<256x256xbf16, #tpu.memory_space<vmem>>, vector<256x256xbf16>
    %c0_1 = arith.constant 0 : index
    %c0_2 = arith.constant 0 : index
    %1 = vector.load %arg2[%c0_1, %c0_2] : memref<256x64xbf16, #tpu.memory_space<vmem>>, vector<256x64xbf16>
    %cst = arith.constant dense<0.000000e+00> : vector<256x64xf32>
    %2 = tpu.matmul %0, %1, %cst {dimension_numbers = #tpu.dot_dimension_numbers<[1], [0], [0], [1], [0, 0, 1, 1], [], []>} : vector<256x256xbf16>, vector<256x64xbf16>, vector<256x64xf32> -> vector<256x64xf32>
    %cst_3 = arith.constant 0.000000e+00 : f32
    %3 = vector.broadcast %cst_3 : f32 to vector<256x64xf32>
    %4 = arith.maximumf %2, %3 : vector<256x64xf32>
    %c0_4 = arith.constant 0 : index
    %c0_5 = arith.constant 0 : index
    %5 = vector.load %arg3[%c0_4, %c0_5] : memref<256x64xf32, #tpu.memory_space<vmem>>, vector<256x64xf32>
    tpu.vector_store %arg3[%c0_4, %c0_5], %4 {strides = array<i32>} : memref<256x64xf32, #tpu.memory_space<vmem>>, vector<256x64xf32>,
    return
  }
  func.func @transform_0(%arg0: i32) -> (i32, i32) {
    %c0_i32 = arith.constant 0 : i32
    %c0_i32_0 = arith.constant 0 : i32
    return %arg0, %c0_i32 : i32, i32
  }
  func.func @transform_1(%arg0: i32) -> (i32, i32) {
    %c0_i32 = arith.constant 0 : i32
    %c0_i32_0 = arith.constant 0 : i32
    %c0_i32_1 = arith.constant 0 : i32
    return %c0_i32, %c0_i32_0 : i32, i32
  }
  func.func @transform_2(%arg0: i32) -> (i32, i32) {
    %c0_i32 = arith.constant 0 : i32
    %c0_i32_0 = arith.constant 0 : i32
    return %arg0, %c0_i32 : i32, i32
  }
}

module attributes {stable_mosaic.version = 11 : i64} {
  func.func @_block_kernel(%arg0: i32, %arg1: memref<1x64x64xf32, #tpu.memory_space<vmem>>, %arg2: memref<1x64xf32, #tpu.memory_space<vmem>>, %arg3: memref<1x64xf32, #tpu.memory_space<vmem>>, %arg4: memref<64x192xbf16, #tpu.memory_space<vmem>>, %arg5: memref<64x64xbf16, #tpu.memory_space<vmem>>, %arg6: memref<1x64xf32, #tpu.memory_space<vmem>>, %arg7: memref<1x64xf32, #tpu.memory_space<vmem>>, %arg8: memref<1x64xf32, #tpu.memory_space<vmem>>, %arg9: memref<64x128xbf16, #tpu.memory_space<vmem>>, %arg10: memref<1x128xf32, #tpu.memory_space<vmem>>, %arg11: memref<128x64xbf16, #tpu.memory_space<vmem>>, %arg12: memref<1x64xf32, #tpu.memory_space<vmem>>, %arg13: memref<1x64x64xf32, #tpu.memory_space<vmem>>) attributes {dimension_semantics = [#tpu.dimension_semantics<parallel>], iteration_bounds = array<i64: 2>, scalar_prefetch = 0 : i64, scratch_operands = 0 : i64, tpu.core_type = #tpu.core_type<tc>, window_params = [{transform_indices = @transform_0, window_bounds = array<i64: 1, 64, 64>}, {pipeline_mode = #tpu.pipeline_mode<synchronous>, transform_indices = @transform_1, window_bounds = array<i64: 1, 64>}, {pipeline_mode = #tpu.pipeline_mode<synchronous>, transform_indices = @transform_2, window_bounds = array<i64: 1, 64>}, {pipeline_mode = #tpu.pipeline_mode<synchronous>, transform_indices = @transform_3, window_bounds = array<i64: 64, 192>}, {pipeline_mode = #tpu.pipeline_mode<synchronous>, transform_indices = @transform_4, window_bounds = array<i64: 64, 64>}, {pipeline_mode = #tpu.pipeline_mode<synchronous>, transform_indices = @transform_5, window_bounds = array<i64: 1, 64>}, {pipeline_mode = #tpu.pipeline_mode<synchronous>, transform_indices = @transform_6, window_bounds = array<i64: 1, 64>}, {pipeline_mode = #tpu.pipeline_mode<synchronous>, transform_indices = @transform_7, window_bounds = array<i64: 1, 64>}, {pipeline_mode = #tpu.pipeline_mode<synchronous>, transform_indices = @transform_8, window_bounds = array<i64: 64, 128>}, {pipeline_mode = #tpu.pipeline_mode<synchronous>, transform_indices = @transform_9, window_bounds = array<i64: 1, 128>}, {pipeline_mode = #tpu.pipeline_mode<synchronous>, transform_indices = @transform_10, window_bounds = array<i64: 128, 64>}, {pipeline_mode = #tpu.pipeline_mode<synchronous>, transform_indices = @transform_11, window_bounds = array<i64: 1, 64>}, {transform_indices = @transform_12, window_bounds = array<i64: 1, 64, 64>}]} {
    %c0 = arith.constant 0 : index
    %c0_0 = arith.constant 0 : index
    %c0_1 = arith.constant 0 : index
    %0 = vector.load %arg1[%c0, %c0_0, %c0_1] : memref<1x64x64xf32, #tpu.memory_space<vmem>>, vector<1x64x64xf32>
    %1 = vector.shape_cast %0 : vector<1x64x64xf32> to vector<64x64xf32>
    %c0_2 = arith.constant 0 : index
    %c0_3 = arith.constant 0 : index
    %2 = vector.load %arg2[%c0_2, %c0_3] : memref<1x64xf32, #tpu.memory_space<vmem>>, vector<1x64xf32>
    %c0_4 = arith.constant 0 : index
    %c0_5 = arith.constant 0 : index
    %3 = vector.load %arg3[%c0_4, %c0_5] : memref<1x64xf32, #tpu.memory_space<vmem>>, vector<1x64xf32>
    %cst = arith.constant dense<0.000000e+00> : vector<64xf32>
    %4 = vector.multi_reduction <add>, %1, %cst [1] : vector<64x64xf32> to vector<64xf32>
    %5 = vector.shape_cast %4 : vector<64xf32> to vector<64x1xf32>
    %cst_6 = arith.constant 6.400000e+01 : f32
    %6 = vector.broadcast %cst_6 : f32 to vector<64x1xf32>
    %7 = arith.divf %5, %6 : vector<64x1xf32>
    %8 = vector.broadcast %7 : vector<64x1xf32> to vector<64x64xf32>
    %9 = arith.subf %1, %8 : vector<64x64xf32>
    %10 = arith.mulf %9, %9 : vector<64x64xf32>
    %cst_7 = arith.constant dense<0.000000e+00> : vector<64xf32>
    %11 = vector.multi_reduction <add>, %10, %cst_7 [1] : vector<64x64xf32> to vector<64xf32>
    %12 = vector.shape_cast %11 : vector<64xf32> to vector<64x1xf32>
    %cst_8 = arith.constant 6.400000e+01 : f32
    %13 = vector.broadcast %cst_8 : f32 to vector<64x1xf32>
    %14 = arith.divf %12, %13 : vector<64x1xf32>
    %cst_9 = arith.constant 9.99999974E-6 : f32
    %15 = vector.broadcast %cst_9 : f32 to vector<64x1xf32>
    %16 = arith.addf %14, %15 : vector<64x1xf32>
    %17 = math.rsqrt %16 : vector<64x1xf32>
    %18 = vector.broadcast %17 : vector<64x1xf32> to vector<64x64xf32>
    %19 = arith.mulf %9, %18 : vector<64x64xf32>
    %20 = vector.broadcast %2 : vector<1x64xf32> to vector<64x64xf32>
    %21 = arith.mulf %19, %20 : vector<64x64xf32>
    %22 = vector.broadcast %3 : vector<1x64xf32> to vector<64x64xf32>
    %23 = arith.addf %21, %22 : vector<64x64xf32>
    %24 = arith.truncf %23 : vector<64x64xf32> to vector<64x64xbf16>
    %c0_10 = arith.constant 0 : index
    %c0_11 = arith.constant 0 : index
    %25 = vector.load %arg4[%c0_10, %c0_11] : memref<64x192xbf16, #tpu.memory_space<vmem>>, vector<64x192xbf16>
    %cst_12 = arith.constant dense<0.000000e+00> : vector<64x192xf32>
    %26 = tpu.matmul %24, %25, %cst_12 {dimension_numbers = #tpu.dot_dimension_numbers<[1], [0], [0], [1], [0, 0, 1, 1], [], []>} : vector<64x64xbf16>, vector<64x192xbf16>, vector<64x192xf32> -> vector<64x192xf32>
    %27 = vector.extract_strided_slice %26 {offsets = [0, 0], sizes = [64, 16], strides = [1, 1]} : vector<64x192xf32> to vector<64x16xf32>
    %28 = vector.extract_strided_slice %26 {offsets = [0, 64], sizes = [64, 16], strides = [1, 1]} : vector<64x192xf32> to vector<64x16xf32>
    %29 = vector.extract_strided_slice %26 {offsets = [0, 128], sizes = [64, 16], strides = [1, 1]} : vector<64x192xf32> to vector<64x16xf32>
    %30 = arith.truncf %27 : vector<64x16xf32> to vector<64x16xbf16>
    %31 = arith.truncf %28 : vector<64x16xf32> to vector<64x16xbf16>
    %cst_13 = arith.constant dense<0.000000e+00> : vector<64x64xf32>
    %32 = tpu.matmul %30, %31, %cst_13 {dimension_numbers = #tpu.dot_dimension_numbers<[1], [1], [0], [0], [0, 0, 1, 0], [], []>} : vector<64x16xbf16>, vector<64x16xbf16>, vector<64x64xf32> -> vector<64x64xf32>
    %cst_14 = arith.constant 2.500000e-01 : f32
    %33 = vector.broadcast %cst_14 : f32 to vector<64x64xf32>
    %34 = arith.mulf %32, %33 : vector<64x64xf32>
    %cst_15 = arith.constant dense<0xFF800000> : vector<64xf32>
    %35 = vector.multi_reduction <maximumf>, %34, %cst_15 [1] : vector<64x64xf32> to vector<64xf32>
    %36 = vector.shape_cast %35 : vector<64xf32> to vector<64x1xf32>
    %37 = vector.broadcast %36 : vector<64x1xf32> to vector<64x64xf32>
    %38 = arith.subf %34, %37 : vector<64x64xf32>
    %39 = math.exp %38 : vector<64x64xf32>
    %cst_16 = arith.constant dense<0.000000e+00> : vector<64xf32>
    %40 = vector.multi_reduction <add>, %39, %cst_16 [1] : vector<64x64xf32> to vector<64xf32>
    %41 = vector.shape_cast %40 : vector<64xf32> to vector<64x1xf32>
    %42 = vector.broadcast %41 : vector<64x1xf32> to vector<64x64xf32>
    %43 = arith.divf %39, %42 : vector<64x64xf32>
    %44 = arith.truncf %43 : vector<64x64xf32> to vector<64x64xbf16>
    %45 = arith.truncf %29 : vector<64x16xf32> to vector<64x16xbf16>
    %cst_17 = arith.constant dense<0.000000e+00> : vector<64x16xf32>
    %46 = tpu.matmul %44, %45, %cst_17 {dimension_numbers = #tpu.dot_dimension_numbers<[1], [0], [0], [1], [0, 0, 1, 1], [], []>} : vector<64x64xbf16>, vector<64x16xbf16>, vector<64x16xf32> -> vector<64x16xf32>
    %47 = vector.extract_strided_slice %26 {offsets = [0, 16], sizes = [64, 16], strides = [1, 1]} : vector<64x192xf32> to vector<64x16xf32>
    %48 = vector.extract_strided_slice %26 {offsets = [0, 80], sizes = [64, 16], strides = [1, 1]} : vector<64x192xf32> to vector<64x16xf32>
    %49 = vector.extract_strided_slice %26 {offsets = [0, 144], sizes = [64, 16], strides = [1, 1]} : vector<64x192xf32> to vector<64x16xf32>
    %50 = arith.truncf %47 : vector<64x16xf32> to vector<64x16xbf16>
    %51 = arith.truncf %48 : vector<64x16xf32> to vector<64x16xbf16>
    %cst_18 = arith.constant dense<0.000000e+00> : vector<64x64xf32>
    %52 = tpu.matmul %50, %51, %cst_18 {dimension_numbers = #tpu.dot_dimension_numbers<[1], [1], [0], [0], [0, 0, 1, 0], [], []>} : vector<64x16xbf16>, vector<64x16xbf16>, vector<64x64xf32> -> vector<64x64xf32>
    %cst_19 = arith.constant 2.500000e-01 : f32
    %53 = vector.broadcast %cst_19 : f32 to vector<64x64xf32>
    %54 = arith.mulf %52, %53 : vector<64x64xf32>
    %cst_20 = arith.constant dense<0xFF800000> : vector<64xf32>
    %55 = vector.multi_reduction <maximumf>, %54, %cst_20 [1] : vector<64x64xf32> to vector<64xf32>
    %56 = vector.shape_cast %55 : vector<64xf32> to vector<64x1xf32>
    %57 = vector.broadcast %56 : vector<64x1xf32> to vector<64x64xf32>
    %58 = arith.subf %54, %57 : vector<64x64xf32>
    %59 = math.exp %58 : vector<64x64xf32>
    %cst_21 = arith.constant dense<0.000000e+00> : vector<64xf32>
    %60 = vector.multi_reduction <add>, %59, %cst_21 [1] : vector<64x64xf32> to vector<64xf32>
    %61 = vector.shape_cast %60 : vector<64xf32> to vector<64x1xf32>
    %62 = vector.broadcast %61 : vector<64x1xf32> to vector<64x64xf32>
    %63 = arith.divf %59, %62 : vector<64x64xf32>
    %64 = arith.truncf %63 : vector<64x64xf32> to vector<64x64xbf16>
    %65 = arith.truncf %49 : vector<64x16xf32> to vector<64x16xbf16>
    %cst_22 = arith.constant dense<0.000000e+00> : vector<64x16xf32>
    %66 = tpu.matmul %64, %65, %cst_22 {dimension_numbers = #tpu.dot_dimension_numbers<[1], [0], [0], [1], [0, 0, 1, 1], [], []>} : vector<64x64xbf16>, vector<64x16xbf16>, vector<64x16xf32> -> vector<64x16xf32>
    %67 = vector.extract_strided_slice %26 {offsets = [0, 32], sizes = [64, 16], strides = [1, 1]} : vector<64x192xf32> to vector<64x16xf32>
    %68 = vector.extract_strided_slice %26 {offsets = [0, 96], sizes = [64, 16], strides = [1, 1]} : vector<64x192xf32> to vector<64x16xf32>
    %69 = vector.extract_strided_slice %26 {offsets = [0, 160], sizes = [64, 16], strides = [1, 1]} : vector<64x192xf32> to vector<64x16xf32>
    %70 = arith.truncf %67 : vector<64x16xf32> to vector<64x16xbf16>
    %71 = arith.truncf %68 : vector<64x16xf32> to vector<64x16xbf16>
    %cst_23 = arith.constant dense<0.000000e+00> : vector<64x64xf32>
    %72 = tpu.matmul %70, %71, %cst_23 {dimension_numbers = #tpu.dot_dimension_numbers<[1], [1], [0], [0], [0, 0, 1, 0], [], []>} : vector<64x16xbf16>, vector<64x16xbf16>, vector<64x64xf32> -> vector<64x64xf32>
    %cst_24 = arith.constant 2.500000e-01 : f32
    %73 = vector.broadcast %cst_24 : f32 to vector<64x64xf32>
    %74 = arith.mulf %72, %73 : vector<64x64xf32>
    %cst_25 = arith.constant dense<0xFF800000> : vector<64xf32>
    %75 = vector.multi_reduction <maximumf>, %74, %cst_25 [1] : vector<64x64xf32> to vector<64xf32>
    %76 = vector.shape_cast %75 : vector<64xf32> to vector<64x1xf32>
    %77 = vector.broadcast %76 : vector<64x1xf32> to vector<64x64xf32>
    %78 = arith.subf %74, %77 : vector<64x64xf32>
    %79 = math.exp %78 : vector<64x64xf32>
    %cst_26 = arith.constant dense<0.000000e+00> : vector<64xf32>
    %80 = vector.multi_reduction <add>, %79, %cst_26 [1] : vector<64x64xf32> to vector<64xf32>
    %81 = vector.shape_cast %80 : vector<64xf32> to vector<64x1xf32>
    %82 = vector.broadcast %81 : vector<64x1xf32> to vector<64x64xf32>
    %83 = arith.divf %79, %82 : vector<64x64xf32>
    %84 = arith.truncf %83 : vector<64x64xf32> to vector<64x64xbf16>
    %85 = arith.truncf %69 : vector<64x16xf32> to vector<64x16xbf16>
    %cst_27 = arith.constant dense<0.000000e+00> : vector<64x16xf32>
    %86 = tpu.matmul %84, %85, %cst_27 {dimension_numbers = #tpu.dot_dimension_numbers<[1], [0], [0], [1], [0, 0, 1, 1], [], []>} : vector<64x64xbf16>, vector<64x16xbf16>, vector<64x16xf32> -> vector<64x16xf32>
    %87 = vector.extract_strided_slice %26 {offsets = [0, 48], sizes = [64, 16], strides = [1, 1]} : vector<64x192xf32> to vector<64x16xf32>
    %88 = vector.extract_strided_slice %26 {offsets = [0, 112], sizes = [64, 16], strides = [1, 1]} : vector<64x192xf32> to vector<64x16xf32>
    %89 = vector.extract_strided_slice %26 {offsets = [0, 176], sizes = [64, 16], strides = [1, 1]} : vector<64x192xf32> to vector<64x16xf32>
    %90 = arith.truncf %87 : vector<64x16xf32> to vector<64x16xbf16>
    %91 = arith.truncf %88 : vector<64x16xf32> to vector<64x16xbf16>
    %cst_28 = arith.constant dense<0.000000e+00> : vector<64x64xf32>
    %92 = tpu.matmul %90, %91, %cst_28 {dimension_numbers = #tpu.dot_dimension_numbers<[1], [1], [0], [0], [0, 0, 1, 0], [], []>} : vector<64x16xbf16>, vector<64x16xbf16>, vector<64x64xf32> -> vector<64x64xf32>
    %cst_29 = arith.constant 2.500000e-01 : f32
    %93 = vector.broadcast %cst_29 : f32 to vector<64x64xf32>
    %94 = arith.mulf %92, %93 : vector<64x64xf32>
    %cst_30 = arith.constant dense<0xFF800000> : vector<64xf32>
    %95 = vector.multi_reduction <maximumf>, %94, %cst_30 [1] : vector<64x64xf32> to vector<64xf32>
    %96 = vector.shape_cast %95 : vector<64xf32> to vector<64x1xf32>
    %97 = vector.broadcast %96 : vector<64x1xf32> to vector<64x64xf32>
    %98 = arith.subf %94, %97 : vector<64x64xf32>
    %99 = math.exp %98 : vector<64x64xf32>
    %cst_31 = arith.constant dense<0.000000e+00> : vector<64xf32>
    %100 = vector.multi_reduction <add>, %99, %cst_31 [1] : vector<64x64xf32> to vector<64xf32>
    %101 = vector.shape_cast %100 : vector<64xf32> to vector<64x1xf32>
    %102 = vector.broadcast %101 : vector<64x1xf32> to vector<64x64xf32>
    %103 = arith.divf %99, %102 : vector<64x64xf32>
    %104 = arith.truncf %103 : vector<64x64xf32> to vector<64x64xbf16>
    %105 = arith.truncf %89 : vector<64x16xf32> to vector<64x16xbf16>
    %cst_32 = arith.constant dense<0.000000e+00> : vector<64x16xf32>
    %106 = tpu.matmul %104, %105, %cst_32 {dimension_numbers = #tpu.dot_dimension_numbers<[1], [0], [0], [1], [0, 0, 1, 1], [], []>} : vector<64x64xbf16>, vector<64x16xbf16>, vector<64x16xf32> -> vector<64x16xf32>
    %107 = tpu.concatenate %46, %66, %86, %106 in 1 : vector<64x16xf32>, vector<64x16xf32>, vector<64x16xf32>, vector<64x16xf32> -> vector<64x64xf32>
    %108 = arith.truncf %107 : vector<64x64xf32> to vector<64x64xbf16>
    %c0_33 = arith.constant 0 : index
    %c0_34 = arith.constant 0 : index
    %109 = vector.load %arg5[%c0_33, %c0_34] : memref<64x64xbf16, #tpu.memory_space<vmem>>, vector<64x64xbf16>
    %cst_35 = arith.constant dense<0.000000e+00> : vector<64x64xf32>
    %110 = tpu.matmul %108, %109, %cst_35 {dimension_numbers = #tpu.dot_dimension_numbers<[1], [0], [0], [1], [0, 0, 1, 1], [], []>} : vector<64x64xbf16>, vector<64x64xbf16>, vector<64x64xf32> -> vector<64x64xf32>
    %c0_36 = arith.constant 0 : index
    %c0_37 = arith.constant 0 : index
    %111 = vector.load %arg6[%c0_36, %c0_37] : memref<1x64xf32, #tpu.memory_space<vmem>>, vector<1x64xf32>
    %112 = vector.broadcast %111 : vector<1x64xf32> to vector<64x64xf32>
    %113 = arith.addf %110, %112 : vector<64x64xf32>
    %114 = arith.addf %1, %113 : vector<64x64xf32>
    %c0_38 = arith.constant 0 : index
    %c0_39 = arith.constant 0 : index
    %115 = vector.load %arg7[%c0_38, %c0_39] : memref<1x64xf32, #tpu.memory_space<vmem>>, vector<1x64xf32>
    %c0_40 = arith.constant 0 : index
    %c0_41 = arith.constant 0 : index
    %116 = vector.load %arg8[%c0_40, %c0_41] : memref<1x64xf32, #tpu.memory_space<vmem>>, vector<1x64xf32>
    %cst_42 = arith.constant dense<0.000000e+00> : vector<64xf32>
    %117 = vector.multi_reduction <add>, %114, %cst_42 [1] : vector<64x64xf32> to vector<64xf32>
    %118 = vector.shape_cast %117 : vector<64xf32> to vector<64x1xf32>
    %cst_43 = arith.constant 6.400000e+01 : f32
    %119 = vector.broadcast %cst_43 : f32 to vector<64x1xf32>
    %120 = arith.divf %118, %119 : vector<64x1xf32>
    %121 = vector.broadcast %120 : vector<64x1xf32> to vector<64x64xf32>
    %122 = arith.subf %114, %121 : vector<64x64xf32>
    %123 = arith.mulf %122, %122 : vector<64x64xf32>
    %cst_44 = arith.constant dense<0.000000e+00> : vector<64xf32>
    %124 = vector.multi_reduction <add>, %123, %cst_44 [1] : vector<64x64xf32> to vector<64xf32>
    %125 = vector.shape_cast %124 : vector<64xf32> to vector<64x1xf32>
    %cst_45 = arith.constant 6.400000e+01 : f32
    %126 = vector.broadcast %cst_45 : f32 to vector<64x1xf32>
    %127 = arith.divf %125, %126 : vector<64x1xf32>
    %cst_46 = arith.constant 9.99999974E-6 : f32
    %128 = vector.broadcast %cst_46 : f32 to vector<64x1xf32>
    %129 = arith.addf %127, %128 : vector<64x1xf32>
    %130 = math.rsqrt %129 : vector<64x1xf32>
    %131 = vector.broadcast %130 : vector<64x1xf32> to vector<64x64xf32>
    %132 = arith.mulf %122, %131 : vector<64x64xf32>
    %133 = vector.broadcast %115 : vector<1x64xf32> to vector<64x64xf32>
    %134 = arith.mulf %132, %133 : vector<64x64xf32>
    %135 = vector.broadcast %116 : vector<1x64xf32> to vector<64x64xf32>
    %136 = arith.addf %134, %135 : vector<64x64xf32>
    %137 = arith.truncf %136 : vector<64x64xf32> to vector<64x64xbf16>
    %c0_47 = arith.constant 0 : index
    %c0_48 = arith.constant 0 : index
    %138 = vector.load %arg9[%c0_47, %c0_48] : memref<64x128xbf16, #tpu.memory_space<vmem>>, vector<64x128xbf16>
    %cst_49 = arith.constant dense<0.000000e+00> : vector<64x128xf32>
    %139 = tpu.matmul %137, %138, %cst_49 {dimension_numbers = #tpu.dot_dimension_numbers<[1], [0], [0], [1], [0, 0, 1, 1], [], []>} : vector<64x64xbf16>, vector<64x128xbf16>, vector<64x128xf32> -> vector<64x128xf32>
    %c0_50 = arith.constant 0 : index
    %c0_51 = arith.constant 0 : index
    %140 = vector.load %arg10[%c0_50, %c0_51] : memref<1x128xf32, #tpu.memory_space<vmem>>, vector<1x128xf32>
    %141 = vector.broadcast %140 : vector<1x128xf32> to vector<64x128xf32>
    %142 = arith.addf %139, %141 : vector<64x128xf32>
    %cst_52 = arith.constant 5.000000e-01 : f32
    %143 = vector.broadcast %cst_52 : f32 to vector<64x128xf32>
    %144 = arith.mulf %143, %142 : vector<64x128xf32>
    %cst_53 = arith.constant 0.707106769 : f32
    %145 = vector.broadcast %cst_53 : f32 to vector<64x128xf32>
    %146 = arith.mulf %142, %145 : vector<64x128xf32>
    %147 = math.erf %146 : vector<64x128xf32>
    %cst_54 = arith.constant 1.000000e+00 : f32
    %148 = vector.broadcast %cst_54 : f32 to vector<64x128xf32>
    %149 = arith.addf %148, %147 : vector<64x128xf32>
    %150 = arith.mulf %144, %149 : vector<64x128xf32>
    %151 = arith.truncf %150 : vector<64x128xf32> to vector<64x128xbf16>
    %c0_55 = arith.constant 0 : index
    %c0_56 = arith.constant 0 : index
    %152 = vector.load %arg11[%c0_55, %c0_56] : memref<128x64xbf16, #tpu.memory_space<vmem>>, vector<128x64xbf16>
    %cst_57 = arith.constant dense<0.000000e+00> : vector<64x64xf32>
    %153 = tpu.matmul %151, %152, %cst_57 {dimension_numbers = #tpu.dot_dimension_numbers<[1], [0], [0], [1], [0, 0, 1, 1], [], []>} : vector<64x128xbf16>, vector<128x64xbf16>, vector<64x64xf32> -> vector<64x64xf32>
    %c0_58 = arith.constant 0 : index
    %c0_59 = arith.constant 0 : index
    %154 = vector.load %arg12[%c0_58, %c0_59] : memref<1x64xf32, #tpu.memory_space<vmem>>, vector<1x64xf32>
    %155 = vector.broadcast %154 : vector<1x64xf32> to vector<64x64xf32>
    %156 = arith.addf %153, %155 : vector<64x64xf32>
    %157 = arith.addf %114, %156 : vector<64x64xf32>
    %c0_60 = arith.constant 0 : index
    %c0_61 = arith.constant 0 : index
    %c0_62 = arith.constant 0 : index
    %158 = vector.load %arg13[%c0_60, %c0_61, %c0_62] : memref<1x64x64xf32, #tpu.memory_space<vmem>>, vector<1x64x64xf32>
    %159 = vector.shape_cast %158 : vector<1x64x64xf32> to vector<64x64xf32>
    %160 = vector.shape_cast %157 : vector<64x64xf32> to vector<1x64x64xf32>
    tpu.vector_store %arg13[%c0_60, %c0_61, %c0_62], %160 {strides = array<i32>} : memref<1x64x64xf32, #tpu.memory_space<vmem>>, vector<1x64x64xf32>,
    return
  }
  func.func @transform_0(%arg0: i32) -> (i32, i32, i32) {
    %c0_i32 = arith.constant 0 : i32
    %c0_i32_0 = arith.constant 0 : i32
    %c0_i32_1 = arith.constant 0 : i32
    return %arg0, %c0_i32, %c0_i32_0 : i32, i32, i32
  }
  func.func @transform_1(%arg0: i32) -> (i32, i32) {
    %c0_i32 = arith.constant 0 : i32
    %c0_i32_0 = arith.constant 0 : i32
    %c0_i32_1 = arith.constant 0 : i32
    return %c0_i32, %c0_i32_0 : i32, i32
  }
  func.func @transform_2(%arg0: i32) -> (i32, i32) {
    %c0_i32 = arith.constant 0 : i32
    %c0_i32_0 = arith.constant 0 : i32
    %c0_i32_1 = arith.constant 0 : i32
    return %c0_i32, %c0_i32_0 : i32, i32
  }
  func.func @transform_3(%arg0: i32) -> (i32, i32) {
    %c0_i32 = arith.constant 0 : i32
    %c0_i32_0 = arith.constant 0 : i32
    %c0_i32_1 = arith.constant 0 : i32
    return %c0_i32, %c0_i32_0 : i32, i32
  }
  func.func @transform_4(%arg0: i32) -> (i32, i32) {
    %c0_i32 = arith.constant 0 : i32
    %c0_i32_0 = arith.constant 0 : i32
    %c0_i32_1 = arith.constant 0 : i32
    return %c0_i32, %c0_i32_0 : i32, i32
  }
  func.func @transform_5(%arg0: i32) -> (i32, i32) {
    %c0_i32 = arith.constant 0 : i32
    %c0_i32_0 = arith.constant 0 : i32
    %c0_i32_1 = arith.constant 0 : i32
    return %c0_i32, %c0_i32_0 : i32, i32
  }
  func.func @transform_6(%arg0: i32) -> (i32, i32) {
    %c0_i32 = arith.constant 0 : i32
    %c0_i32_0 = arith.constant 0 : i32
    %c0_i32_1 = arith.constant 0 : i32
    return %c0_i32, %c0_i32_0 : i32, i32
  }
  func.func @transform_7(%arg0: i32) -> (i32, i32) {
    %c0_i32 = arith.constant 0 : i32
    %c0_i32_0 = arith.constant 0 : i32
    %c0_i32_1 = arith.constant 0 : i32
    return %c0_i32, %c0_i32_0 : i32, i32
  }
  func.func @transform_8(%arg0: i32) -> (i32, i32) {
    %c0_i32 = arith.constant 0 : i32
    %c0_i32_0 = arith.constant 0 : i32
    %c0_i32_1 = arith.constant 0 : i32
    return %c0_i32, %c0_i32_0 : i32, i32
  }
  func.func @transform_9(%arg0: i32) -> (i32, i32) {
    %c0_i32 = arith.constant 0 : i32
    %c0_i32_0 = arith.constant 0 : i32
    %c0_i32_1 = arith.constant 0 : i32
    return %c0_i32, %c0_i32_0 : i32, i32
  }
  func.func @transform_10(%arg0: i32) -> (i32, i32) {
    %c0_i32 = arith.constant 0 : i32
    %c0_i32_0 = arith.constant 0 : i32
    %c0_i32_1 = arith.constant 0 : i32
    return %c0_i32, %c0_i32_0 : i32, i32
  }
  func.func @transform_11(%arg0: i32) -> (i32, i32) {
    %c0_i32 = arith.constant 0 : i32
    %c0_i32_0 = arith.constant 0 : i32
    %c0_i32_1 = arith.constant 0 : i32
    return %c0_i32, %c0_i32_0 : i32, i32
  }
  func.func @transform_12(%arg0: i32) -> (i32, i32, i32) {
    %c0_i32 = arith.constant 0 : i32
    %c0_i32_0 = arith.constant 0 : i32
    %c0_i32_1 = arith.constant 0 : i32
    return %arg0, %c0_i32, %c0_i32_0 : i32, i32, i32
  }
}

module attributes {stable_mosaic.version = 11 : i64} {
  func.func @_tail_kernel(%arg0: i32, %arg1: memref<2x64x64xf32, #tpu.memory_space<vmem>>, %arg2: memref<1x64xf32, #tpu.memory_space<vmem>>, %arg3: memref<1x64xf32, #tpu.memory_space<vmem>>, %arg4: memref<64x4xf32, #tpu.memory_space<vmem>>, %arg5: memref<1x4xf32, #tpu.memory_space<vmem>>, %arg6: memref<4x64xf32, #tpu.memory_space<vmem>>, %arg7: memref<1x64xf32, #tpu.memory_space<vmem>>, %arg8: memref<64x10xf32, #tpu.memory_space<vmem>>, %arg9: memref<1x10xf32, #tpu.memory_space<vmem>>, %arg10: memref<2x10xf32, #tpu.memory_space<vmem>>) attributes {dimension_semantics = [#tpu.dimension_semantics<arbitrary>], iteration_bounds = array<i64: 1>, scalar_prefetch = 0 : i64, scratch_operands = 0 : i64, tpu.core_type = #tpu.core_type<tc>, window_params = [{pipeline_mode = #tpu.pipeline_mode<synchronous>, transform_indices = @transform_0, window_bounds = array<i64: 2, 64, 64>}, {pipeline_mode = #tpu.pipeline_mode<synchronous>, transform_indices = @transform_1, window_bounds = array<i64: 1, 64>}, {pipeline_mode = #tpu.pipeline_mode<synchronous>, transform_indices = @transform_2, window_bounds = array<i64: 1, 64>}, {pipeline_mode = #tpu.pipeline_mode<synchronous>, transform_indices = @transform_3, window_bounds = array<i64: 64, 4>}, {pipeline_mode = #tpu.pipeline_mode<synchronous>, transform_indices = @transform_4, window_bounds = array<i64: 1, 4>}, {pipeline_mode = #tpu.pipeline_mode<synchronous>, transform_indices = @transform_5, window_bounds = array<i64: 4, 64>}, {pipeline_mode = #tpu.pipeline_mode<synchronous>, transform_indices = @transform_6, window_bounds = array<i64: 1, 64>}, {pipeline_mode = #tpu.pipeline_mode<synchronous>, transform_indices = @transform_7, window_bounds = array<i64: 64, 10>}, {pipeline_mode = #tpu.pipeline_mode<synchronous>, transform_indices = @transform_8, window_bounds = array<i64: 1, 10>}, {pipeline_mode = #tpu.pipeline_mode<synchronous>, transform_indices = @transform_9, window_bounds = array<i64: 2, 10>}]} {
    %cst = arith.constant 1.000000e+00 : f32
    %0 = vector.broadcast %cst : f32 to vector<1x64xf32>
    %c0 = arith.constant 0 : index
    %c0_0 = arith.constant 0 : index
    %c0_1 = arith.constant 0 : index
    %1 = vector.load %arg1[%c0, %c0_0, %c0_1] : memref<2x64x64xf32, #tpu.memory_space<vmem>>, vector<1x64x64xf32>
    %2 = vector.shape_cast %1 : vector<1x64x64xf32> to vector<64x64xf32>
    %c0_2 = arith.constant 0 : index
    %c0_3 = arith.constant 0 : index
    %3 = vector.load %arg2[%c0_2, %c0_3] : memref<1x64xf32, #tpu.memory_space<vmem>>, vector<1x64xf32>
    %c0_4 = arith.constant 0 : index
    %c0_5 = arith.constant 0 : index
    %4 = vector.load %arg3[%c0_4, %c0_5] : memref<1x64xf32, #tpu.memory_space<vmem>>, vector<1x64xf32>
    %cst_6 = arith.constant dense<0.000000e+00> : vector<64xf32>
    %5 = vector.multi_reduction <add>, %2, %cst_6 [1] : vector<64x64xf32> to vector<64xf32>
    %6 = vector.shape_cast %5 : vector<64xf32> to vector<64x1xf32>
    %cst_7 = arith.constant 6.400000e+01 : f32
    %7 = vector.broadcast %cst_7 : f32 to vector<64x1xf32>
    %8 = arith.divf %6, %7 : vector<64x1xf32>
    %9 = vector.broadcast %8 : vector<64x1xf32> to vector<64x64xf32>
    %10 = arith.subf %2, %9 : vector<64x64xf32>
    %11 = arith.mulf %10, %10 : vector<64x64xf32>
    %cst_8 = arith.constant dense<0.000000e+00> : vector<64xf32>
    %12 = vector.multi_reduction <add>, %11, %cst_8 [1] : vector<64x64xf32> to vector<64xf32>
    %13 = vector.shape_cast %12 : vector<64xf32> to vector<64x1xf32>
    %cst_9 = arith.constant 6.400000e+01 : f32
    %14 = vector.broadcast %cst_9 : f32 to vector<64x1xf32>
    %15 = arith.divf %13, %14 : vector<64x1xf32>
    %cst_10 = arith.constant 9.99999974E-6 : f32
    %16 = vector.broadcast %cst_10 : f32 to vector<64x1xf32>
    %17 = arith.addf %15, %16 : vector<64x1xf32>
    %18 = math.rsqrt %17 : vector<64x1xf32>
    %19 = vector.broadcast %18 : vector<64x1xf32> to vector<64x64xf32>
    %20 = arith.mulf %10, %19 : vector<64x64xf32>
    %21 = vector.broadcast %3 : vector<1x64xf32> to vector<64x64xf32>
    %22 = arith.mulf %20, %21 : vector<64x64xf32>
    %23 = vector.broadcast %4 : vector<1x64xf32> to vector<64x64xf32>
    %24 = arith.addf %22, %23 : vector<64x64xf32>
    %cst_11 = arith.constant dense<0.000000e+00> : vector<1x64xf32>
    %25 = tpu.matmul %0, %24, %cst_11 {dimension_numbers = #tpu.dot_dimension_numbers<[1], [1], [0], [0], [0, 0, 1, 0], [], []>} : vector<1x64xf32>, vector<64x64xf32>, vector<1x64xf32> -> vector<1x64xf32>
    %cst_12 = arith.constant 1.562500e-02 : f32
    %26 = vector.broadcast %cst_12 : f32 to vector<1x64xf32>
    %27 = arith.mulf %25, %26 : vector<1x64xf32>
    %c0_13 = arith.constant 0 : index
    %c0_14 = arith.constant 0 : index
    %28 = vector.load %arg4[%c0_13, %c0_14] : memref<64x4xf32, #tpu.memory_space<vmem>>, vector<64x4xf32>
    %cst_15 = arith.constant dense<0.000000e+00> : vector<1x4xf32>
    %29 = tpu.matmul %27, %28, %cst_15 {dimension_numbers = #tpu.dot_dimension_numbers<[1], [0], [0], [1], [0, 0, 1, 1], [], []>} : vector<1x64xf32>, vector<64x4xf32>, vector<1x4xf32> -> vector<1x4xf32>
    %c0_16 = arith.constant 0 : index
    %c0_17 = arith.constant 0 : index
    %30 = vector.load %arg5[%c0_16, %c0_17] : memref<1x4xf32, #tpu.memory_space<vmem>>, vector<1x4xf32>
    %31 = arith.addf %29, %30 : vector<1x4xf32>
    %cst_18 = arith.constant 0.000000e+00 : f32
    %32 = vector.broadcast %cst_18 : f32 to vector<1x4xf32>
    %33 = arith.maximumf %31, %32 : vector<1x4xf32>
    %c0_19 = arith.constant 0 : index
    %c0_20 = arith.constant 0 : index
    %34 = vector.load %arg6[%c0_19, %c0_20] : memref<4x64xf32, #tpu.memory_space<vmem>>, vector<4x64xf32>
    %cst_21 = arith.constant dense<0.000000e+00> : vector<1x64xf32>
    %35 = tpu.matmul %33, %34, %cst_21 {dimension_numbers = #tpu.dot_dimension_numbers<[1], [0], [0], [1], [0, 0, 1, 1], [], []>} : vector<1x4xf32>, vector<4x64xf32>, vector<1x64xf32> -> vector<1x64xf32>
    %c0_22 = arith.constant 0 : index
    %c0_23 = arith.constant 0 : index
    %36 = vector.load %arg7[%c0_22, %c0_23] : memref<1x64xf32, #tpu.memory_space<vmem>>, vector<1x64xf32>
    %37 = arith.addf %35, %36 : vector<1x64xf32>
    %38 = arith.negf %37 : vector<1x64xf32>
    %39 = math.exp %38 : vector<1x64xf32>
    %cst_24 = arith.constant 1.000000e+00 : f32
    %40 = vector.broadcast %cst_24 : f32 to vector<1x64xf32>
    %41 = arith.addf %40, %39 : vector<1x64xf32>
    %42 = arith.divf %40, %41 : vector<1x64xf32>
    %cst_25 = arith.constant dense<0.000000e+00> : vector<1x64xf32>
    %43 = tpu.matmul %42, %24, %cst_25 {dimension_numbers = #tpu.dot_dimension_numbers<[1], [0], [0], [1], [0, 0, 1, 1], [], []>} : vector<1x64xf32>, vector<64x64xf32>, vector<1x64xf32> -> vector<1x64xf32>
    %cst_26 = arith.constant 1.562500e-02 : f32
    %44 = vector.broadcast %cst_26 : f32 to vector<1x64xf32>
    %45 = arith.mulf %43, %44 : vector<1x64xf32>
    %c0_27 = arith.constant 0 : index
    %c0_28 = arith.constant 0 : index
    %46 = vector.load %arg8[%c0_27, %c0_28] : memref<64x10xf32, #tpu.memory_space<vmem>>, vector<64x10xf32>
    %cst_29 = arith.constant dense<0.000000e+00> : vector<1x10xf32>
    %47 = tpu.matmul %45, %46, %cst_29 {dimension_numbers = #tpu.dot_dimension_numbers<[1], [0], [0], [1], [0, 0, 1, 1], [], []>} : vector<1x64xf32>, vector<64x10xf32>, vector<1x10xf32> -> vector<1x10xf32>
    %c0_30 = arith.constant 0 : index
    %c0_31 = arith.constant 0 : index
    %48 = vector.load %arg9[%c0_30, %c0_31] : memref<1x10xf32, #tpu.memory_space<vmem>>, vector<1x10xf32>
    %49 = arith.addf %47, %48 : vector<1x10xf32>
    %c1 = arith.constant 1 : index
    %c0_32 = arith.constant 0 : index
    %c0_33 = arith.constant 0 : index
    %50 = vector.load %arg1[%c1, %c0_32, %c0_33] : memref<2x64x64xf32, #tpu.memory_space<vmem>>, vector<1x64x64xf32>
    %51 = vector.shape_cast %50 : vector<1x64x64xf32> to vector<64x64xf32>
    %c0_34 = arith.constant 0 : index
    %c0_35 = arith.constant 0 : index
    %52 = vector.load %arg2[%c0_34, %c0_35] : memref<1x64xf32, #tpu.memory_space<vmem>>, vector<1x64xf32>
    %c0_36 = arith.constant 0 : index
    %c0_37 = arith.constant 0 : index
    %53 = vector.load %arg3[%c0_36, %c0_37] : memref<1x64xf32, #tpu.memory_space<vmem>>, vector<1x64xf32>
    %cst_38 = arith.constant dense<0.000000e+00> : vector<64xf32>
    %54 = vector.multi_reduction <add>, %51, %cst_38 [1] : vector<64x64xf32> to vector<64xf32>
    %55 = vector.shape_cast %54 : vector<64xf32> to vector<64x1xf32>
    %cst_39 = arith.constant 6.400000e+01 : f32
    %56 = vector.broadcast %cst_39 : f32 to vector<64x1xf32>
    %57 = arith.divf %55, %56 : vector<64x1xf32>
    %58 = vector.broadcast %57 : vector<64x1xf32> to vector<64x64xf32>
    %59 = arith.subf %51, %58 : vector<64x64xf32>
    %60 = arith.mulf %59, %59 : vector<64x64xf32>
    %cst_40 = arith.constant dense<0.000000e+00> : vector<64xf32>
    %61 = vector.multi_reduction <add>, %60, %cst_40 [1] : vector<64x64xf32> to vector<64xf32>
    %62 = vector.shape_cast %61 : vector<64xf32> to vector<64x1xf32>
    %cst_41 = arith.constant 6.400000e+01 : f32
    %63 = vector.broadcast %cst_41 : f32 to vector<64x1xf32>
    %64 = arith.divf %62, %63 : vector<64x1xf32>
    %cst_42 = arith.constant 9.99999974E-6 : f32
    %65 = vector.broadcast %cst_42 : f32 to vector<64x1xf32>
    %66 = arith.addf %64, %65 : vector<64x1xf32>
    %67 = math.rsqrt %66 : vector<64x1xf32>
    %68 = vector.broadcast %67 : vector<64x1xf32> to vector<64x64xf32>
    %69 = arith.mulf %59, %68 : vector<64x64xf32>
    %70 = vector.broadcast %52 : vector<1x64xf32> to vector<64x64xf32>
    %71 = arith.mulf %69, %70 : vector<64x64xf32>
    %72 = vector.broadcast %53 : vector<1x64xf32> to vector<64x64xf32>
    %73 = arith.addf %71, %72 : vector<64x64xf32>
    %cst_43 = arith.constant dense<0.000000e+00> : vector<1x64xf32>
    %74 = tpu.matmul %0, %73, %cst_43 {dimension_numbers = #tpu.dot_dimension_numbers<[1], [1], [0], [0], [0, 0, 1, 0], [], []>} : vector<1x64xf32>, vector<64x64xf32>, vector<1x64xf32> -> vector<1x64xf32>
    %cst_44 = arith.constant 1.562500e-02 : f32
    %75 = vector.broadcast %cst_44 : f32 to vector<1x64xf32>
    %76 = arith.mulf %74, %75 : vector<1x64xf32>
    %c0_45 = arith.constant 0 : index
    %c0_46 = arith.constant 0 : index
    %77 = vector.load %arg4[%c0_45, %c0_46] : memref<64x4xf32, #tpu.memory_space<vmem>>, vector<64x4xf32>
    %cst_47 = arith.constant dense<0.000000e+00> : vector<1x4xf32>
    %78 = tpu.matmul %76, %77, %cst_47 {dimension_numbers = #tpu.dot_dimension_numbers<[1], [0], [0], [1], [0, 0, 1, 1], [], []>} : vector<1x64xf32>, vector<64x4xf32>, vector<1x4xf32> -> vector<1x4xf32>
    %c0_48 = arith.constant 0 : index
    %c0_49 = arith.constant 0 : index
    %79 = vector.load %arg5[%c0_48, %c0_49] : memref<1x4xf32, #tpu.memory_space<vmem>>, vector<1x4xf32>
    %80 = arith.addf %78, %79 : vector<1x4xf32>
    %cst_50 = arith.constant 0.000000e+00 : f32
    %81 = vector.broadcast %cst_50 : f32 to vector<1x4xf32>
    %82 = arith.maximumf %80, %81 : vector<1x4xf32>
    %c0_51 = arith.constant 0 : index
    %c0_52 = arith.constant 0 : index
    %83 = vector.load %arg6[%c0_51, %c0_52] : memref<4x64xf32, #tpu.memory_space<vmem>>, vector<4x64xf32>
    %cst_53 = arith.constant dense<0.000000e+00> : vector<1x64xf32>
    %84 = tpu.matmul %82, %83, %cst_53 {dimension_numbers = #tpu.dot_dimension_numbers<[1], [0], [0], [1], [0, 0, 1, 1], [], []>} : vector<1x4xf32>, vector<4x64xf32>, vector<1x64xf32> -> vector<1x64xf32>
    %c0_54 = arith.constant 0 : index
    %c0_55 = arith.constant 0 : index
    %85 = vector.load %arg7[%c0_54, %c0_55] : memref<1x64xf32, #tpu.memory_space<vmem>>, vector<1x64xf32>
    %86 = arith.addf %84, %85 : vector<1x64xf32>
    %87 = arith.negf %86 : vector<1x64xf32>
    %88 = math.exp %87 : vector<1x64xf32>
    %cst_56 = arith.constant 1.000000e+00 : f32
    %89 = vector.broadcast %cst_56 : f32 to vector<1x64xf32>
    %90 = arith.addf %89, %88 : vector<1x64xf32>
    %91 = arith.divf %89, %90 : vector<1x64xf32>
    %cst_57 = arith.constant dense<0.000000e+00> : vector<1x64xf32>
    %92 = tpu.matmul %91, %73, %cst_57 {dimension_numbers = #tpu.dot_dimension_numbers<[1], [0], [0], [1], [0, 0, 1, 1], [], []>} : vector<1x64xf32>, vector<64x64xf32>, vector<1x64xf32> -> vector<1x64xf32>
    %cst_58 = arith.constant 1.562500e-02 : f32
    %93 = vector.broadcast %cst_58 : f32 to vector<1x64xf32>
    %94 = arith.mulf %92, %93 : vector<1x64xf32>
    %c0_59 = arith.constant 0 : index
    %c0_60 = arith.constant 0 : index
    %95 = vector.load %arg8[%c0_59, %c0_60] : memref<64x10xf32, #tpu.memory_space<vmem>>, vector<64x10xf32>
    %cst_61 = arith.constant dense<0.000000e+00> : vector<1x10xf32>
    %96 = tpu.matmul %94, %95, %cst_61 {dimension_numbers = #tpu.dot_dimension_numbers<[1], [0], [0], [1], [0, 0, 1, 1], [], []>} : vector<1x64xf32>, vector<64x10xf32>, vector<1x10xf32> -> vector<1x10xf32>
    %c0_62 = arith.constant 0 : index
    %c0_63 = arith.constant 0 : index
    %97 = vector.load %arg9[%c0_62, %c0_63] : memref<1x10xf32, #tpu.memory_space<vmem>>, vector<1x10xf32>
    %98 = arith.addf %96, %97 : vector<1x10xf32>
    %99 = tpu.concatenate %49, %98 in 0 : vector<1x10xf32>, vector<1x10xf32> -> vector<2x10xf32>
    %c0_64 = arith.constant 0 : index
    %c0_65 = arith.constant 0 : index
    %100 = vector.load %arg10[%c0_64, %c0_65] : memref<2x10xf32, #tpu.memory_space<vmem>>, vector<2x10xf32>
    tpu.vector_store %arg10[%c0_64, %c0_65], %99 {strides = array<i32>} : memref<2x10xf32, #tpu.memory_space<vmem>>, vector<2x10xf32>,
    return
  }
  func.func @transform_0(%arg0: i32) -> (i32, i32, i32) {
    %c0_i32 = arith.constant 0 : i32
    %c0_i32_0 = arith.constant 0 : i32
    %c0_i32_1 = arith.constant 0 : i32
    %c0_i32_2 = arith.constant 0 : i32
    return %c0_i32, %c0_i32_0, %c0_i32_1 : i32, i32, i32
  }
  func.func @transform_1(%arg0: i32) -> (i32, i32) {
    %c0_i32 = arith.constant 0 : i32
    %c0_i32_0 = arith.constant 0 : i32
    %c0_i32_1 = arith.constant 0 : i32
    return %c0_i32, %c0_i32_0 : i32, i32
  }
  func.func @transform_2(%arg0: i32) -> (i32, i32) {
    %c0_i32 = arith.constant 0 : i32
    %c0_i32_0 = arith.constant 0 : i32
    %c0_i32_1 = arith.constant 0 : i32
    return %c0_i32, %c0_i32_0 : i32, i32
  }
  func.func @transform_3(%arg0: i32) -> (i32, i32) {
    %c0_i32 = arith.constant 0 : i32
    %c0_i32_0 = arith.constant 0 : i32
    %c0_i32_1 = arith.constant 0 : i32
    return %c0_i32, %c0_i32_0 : i32, i32
  }
  func.func @transform_4(%arg0: i32) -> (i32, i32) {
    %c0_i32 = arith.constant 0 : i32
    %c0_i32_0 = arith.constant 0 : i32
    %c0_i32_1 = arith.constant 0 : i32
    return %c0_i32, %c0_i32_0 : i32, i32
  }
  func.func @transform_5(%arg0: i32) -> (i32, i32) {
    %c0_i32 = arith.constant 0 : i32
    %c0_i32_0 = arith.constant 0 : i32
    %c0_i32_1 = arith.constant 0 : i32
    return %c0_i32, %c0_i32_0 : i32, i32
  }
  func.func @transform_6(%arg0: i32) -> (i32, i32) {
    %c0_i32 = arith.constant 0 : i32
    %c0_i32_0 = arith.constant 0 : i32
    %c0_i32_1 = arith.constant 0 : i32
    return %c0_i32, %c0_i32_0 : i32, i32
  }
  func.func @transform_7(%arg0: i32) -> (i32, i32) {
    %c0_i32 = arith.constant 0 : i32
    %c0_i32_0 = arith.constant 0 : i32
    %c0_i32_1 = arith.constant 0 : i32
    return %c0_i32, %c0_i32_0 : i32, i32
  }
  func.func @transform_8(%arg0: i32) -> (i32, i32) {
    %c0_i32 = arith.constant 0 : i32
    %c0_i32_0 = arith.constant 0 : i32
    %c0_i32_1 = arith.constant 0 : i32
    return %c0_i32, %c0_i32_0 : i32, i32
  }
  func.func @transform_9(%arg0: i32) -> (i32, i32) {
    %c0_i32 = arith.constant 0 : i32
    %c0_i32_0 = arith.constant 0 : i32
    %c0_i32_1 = arith.constant 0 : i32
    return %c0_i32, %c0_i32_0 : i32, i32
  }
}

</mosaic_0001>

<bundles_post_ra>
// kernel: secct_forward.4
= control target key start
LH: loop header
LB: loop body
LE: loop exit
PB: predicated region body
PF: predicated region fallthrough
CT: control target
= control target key end

     0   :  { %s1037_s9 = smov 0   ;;  %s1209_s0 = inlined_call_operand.vmem [shape: bf16[512,256], index: 0, kind: input, shape index: {}]   ;;  %s1210_s1 = inlined_call_operand.vmem [shape: bf16[256,64], index: 1, kind: input, shape index: {}]   ;;  %s1211_s2 = inlined_call_operand.vmem [shape: f32[512,64], index: 2, kind: output, shape index: {}]  }
   0x1 LB: > { %s753_s10 = sadd.s32 4294967295, %s1020_s9   ;;  %p757_p0 = scmp.ge.s32.totalorder %s1020_s9, 1  ;;  %s1020_s9 = sphi %s1037_s9, %s12_s9  }
   0x2   : > { %p114_p1 = scmp.lt.s32.totalorder %s1020_s9, 3 }
   0x4   : > { %p115_p2 = pnand %p757_p0, %p114_p1 }
   0x5   : > { %v950_v0 = vld [vmem:[%s1210_s1 + $0x40] sm:$0xff] (!%p115_p2)   ;;  %s758_s13 = sshll.u32 (!%p115_p2), %s753_s10, 5  ;;  %v952_v2 = vld [vmem:[%s1210_s1 + $0x48] sm:$0xff] (!%p115_p2)   ;;  %v954_v4 = vld [vmem:[%s1210_s1 + $0x50] sm:$0xff] (!%p115_p2)   ;;  %vm664_vm0 = vcmask (!%p115_p2), 523264  }
   0x6   : > { %118 = sbr.rel (%p115_p2) target bundleno = 314 (0x13a), region = 28  ;;  %v951_v1 = vld [vmem:[%s1210_s1] sm:$0xff] (!%p115_p2)   ;;  %814 = vmatprep.subr.bf16.mxu0 (!%p115_p2), %v950_v0  ;;  %926 = vmatprep.subr.bf16.mxu1 (!%p115_p2), %v950_v0  ;;  %v953_v3 = vld [vmem:[%s1210_s1 + $0x8] sm:$0xff] (!%p115_p2)   ;;  %p138_p3 = scmp.lt.s32.totalorder (!%p115_p2), %s758_s13, 63  ;;  %v955_v5 = vld [vmem:[%s1210_s1 + $0x10] sm:$0xff] (!%p115_p2)  }
   0x7   : > { %815 = vmatpush3.bf16.msra.mxu0 (!%p115_p2), %v951_v1  ;;  %934 = vmatpush3.bf16.msra.mxu1 (!%p115_p2), %v951_v1  ;;  %v956_v6 = vld [vmem:[%s1210_s1 + $0x58] sm:$0xff] (!%p115_p2)   ;;  %v958_v8 = vld [vmem:[%s1210_s1 + $0x60] sm:$0xff] (!%p115_p2)   ;;  %v960_v10 = vld [vmem:[%s1210_s1 + $0x68] sm:$0xff] (!%p115_p2)  }
   0x8   : > { %816 = vmatprep.subr.bf16.mxu0 (!%p115_p2), %v952_v2  ;;  %927 = vmatprep.subr.bf16.mxu1 (!%p115_p2), %v952_v2  ;;  %v957_v7 = vld [vmem:[%s1210_s1 + $0x18] sm:$0xff] (!%p115_p2)   ;;  %v959_v9 = vld [vmem:[%s1210_s1 + $0x20] sm:$0xff] (!%p115_p2)   ;;  %v961_v13 = vld [vmem:[%s1210_s1 + $0x28] sm:$0xff] (!%p115_p2)  }
   0x9   : > { %v962_v14 = vld [vmem:[%s1210_s1 + $0x70] sm:$0xff] (!%p115_p2)   ;;  %v964_v16 = vld [vmem:[%s1210_s1 + $0x78] sm:$0xff] (!%p115_p2)  }
   0xa   : > { %v963_v15 = vld [vmem:[%s1210_s1 + $0x30] sm:$0xff] (!%p115_p2)   ;;  %v965_v17 = vld [vmem:[%s1210_s1 + $0x38] sm:$0xff] (!%p115_p2)  }
   0xb   : > { %817 = vmatpush3.bf16.msra.mxu0 (!%p115_p2), %v953_v3  ;;  %935 = vmatpush3.bf16.msra.mxu1 (!%p115_p2), %v953_v3 }
   0xc   : > { %818 = vmatprep.subr.bf16.mxu0 (!%p115_p2), %v954_v4  ;;  %928 = vmatprep.subr.bf16.mxu1 (!%p115_p2), %v954_v4 }
   0xd   : > { %s1213_s13 = smov (!%p138_p3, %s758_s13), 63 }
   0xe   : > { %s813_s28 = sshll.u32 %s1213_s13, 3 }
   0xf   : > { %819 = vmatpush3.bf16.msra.mxu0 %v955_v5  ;;  %936 = vmatpush3.bf16.msra.mxu1 %v955_v5  ;;  %s1080_s5 = scalar_lea.vmem %s1209_s0, %s813_s28  ;;  %s1140_s24 = scalar_lea.vmem %s1211_s2, %s813_s28 }
  0x10   : > { %820 = vmatprep.subr.bf16.mxu0 %v956_v6  ;;  %929 = vmatprep.subr.bf16.mxu1 %v956_v6  ;;  %v968_v11 = vld [vmem:[%s1080_s5 + $0x4] ss:$8 sps:$4 sm:$0xff]   ;;  %v966_v18 = vld [vmem:[%s1080_s5] ss:$8 sps:$4 sm:$0xff]   ;;  %v972_v20 = vld [vmem:[%s1080_s5 + $0x14] ss:$8 sps:$4 sm:$0xff]  }
  0x11   : > { %v971_v12 = vld [vmem:[%s1080_s5 + $0x84] ss:$8 sps:$4 sm:$0xff]   ;;  %503 = vmatprep.mubr.bf16.mxu0 %v968_v11  ;;  %v969_v19 = vld [vmem:[%s1080_s5 + $0x80] ss:$8 sps:$4 sm:$0xff]   ;;  %v974_v21 = vld [vmem:[%s1080_s5 + $0x94] ss:$8 sps:$4 sm:$0xff]  }
  0x12   : > { %567 = vmatprep.mubr.bf16.mxu1 %v971_v12  ;;  %v976_v22 = vld [vmem:[%s1080_s5 + $0x10] ss:$8 sps:$4 sm:$0xff]   ;;  %v978_v24 = vld [vmem:[%s1080_s5 + $0x24] ss:$8 sps:$4 sm:$0xff]   ;;  %v982_v26 = vld [vmem:[%s1080_s5 + $0x20] ss:$8 sps:$4 sm:$0xff]  }
  0x13   : > { %821 = vmatpush3.bf16.msra.mxu0 %v957_v7  ;;  %937 = vmatpush3.bf16.msra.mxu1 %v957_v7  ;;  %v977_v23 = vld [vmem:[%s1080_s5 + $0x90] ss:$8 sps:$4 sm:$0xff]   ;;  %v980_v25 = vld [vmem:[%s1080_s5 + $0xa4] ss:$8 sps:$4 sm:$0xff]   ;;  %v983_v27 = vld [vmem:[%s1080_s5 + $0xa0] ss:$8 sps:$4 sm:$0xff]  }
  0x14   : > { %822 = vmatprep.subr.bf16.mxu0 %v958_v8  ;;  %930 = vmatprep.subr.bf16.mxu1 %v958_v8  ;;  %v984_v28 = vld [vmem:[%s1080_s5 + $0x34] ss:$8 sps:$4 sm:$0xff]   ;;  %v988_v30 = vld [vmem:[%s1080_s5 + $0x30] ss:$8 sps:$4 sm:$0xff]   ;;  %v990_v32 = vld [vmem:[%s1080_s5 + $0x44] ss:$8 sps:$4 sm:$0xff]  }
  0x15   : > { %v986_v29 = vld [vmem:[%s1080_s5 + $0xb4] ss:$8 sps:$4 sm:$0xff]   ;;  %v989_v31 = vld [vmem:[%s1080_s5 + $0xb0] ss:$8 sps:$4 sm:$0xff]   ;;  %v992_v33 = vld [vmem:[%s1080_s5 + $0xc4] ss:$8 sps:$4 sm:$0xff]  }
  0x16   : > { %v994_v34 = vld [vmem:[%s1080_s5 + $0x40] ss:$8 sps:$4 sm:$0xff]   ;;  %v996_v36 = vld [vmem:[%s1080_s5 + $0x54] ss:$8 sps:$4 sm:$0xff]   ;;  %v1000_v38 = vld [vmem:[%s1080_s5 + $0x50] ss:$8 sps:$4 sm:$0xff]  }
  0x17   : > { %823 = vmatpush3.bf16.msra.mxu0 %v959_v9  ;;  %938 = vmatpush3.bf16.msra.mxu1 %v959_v9  ;;  %v995_v35 = vld [vmem:[%s1080_s5 + $0xc0] ss:$8 sps:$4 sm:$0xff]   ;;  %v998_v37 = vld [vmem:[%s1080_s5 + $0xd4] ss:$8 sps:$4 sm:$0xff]   ;;  %v1001_v39 = vld [vmem:[%s1080_s5 + $0xd0] ss:$8 sps:$4 sm:$0xff]  }
  0x18   : > { %824 = vmatprep.subr.bf16.mxu0 %v960_v10  ;;  %931 = vmatprep.subr.bf16.mxu1 %v960_v10  ;;  %v1002_v40 = vld [vmem:[%s1080_s5 + $0x64] ss:$8 sps:$4 sm:$0xff]   ;;  %v1006_v42 = vld [vmem:[%s1080_s5 + $0x60] ss:$8 sps:$4 sm:$0xff]   ;;  %v1008_v44 = vld [vmem:[%s1080_s5 + $0x74] ss:$8 sps:$4 sm:$0xff]  }
  0x19   : > { %v1004_v41 = vld [vmem:[%s1080_s5 + $0xe4] ss:$8 sps:$4 sm:$0xff]   ;;  %v1007_v43 = vld [vmem:[%s1080_s5 + $0xe0] ss:$8 sps:$4 sm:$0xff]   ;;  %v1010_v45 = vld [vmem:[%s1080_s5 + $0xf4] ss:$8 sps:$4 sm:$0xff]  }
  0x1a   : > { %v1012_v46 = vld [vmem:[%s1080_s5 + $0x70] ss:$8 sps:$4 sm:$0xff]  }
  0x1b   : > { %825 = vmatpush3.bf16.msra.mxu0 %v961_v13  ;;  %939 = vmatpush3.bf16.msra.mxu1 %v961_v13  ;;  %v1013_v47 = vld [vmem:[%s1080_s5 + $0xf0] ss:$8 sps:$4 sm:$0xff]  }
  0x1c   : > { %826 = vmatprep.subr.bf16.mxu0 %v962_v14  ;;  %932 = vmatprep.subr.bf16.mxu1 %v962_v14 }
  0x1f   : > { %827 = vmatpush3.bf16.msra.mxu0 %v963_v15  ;;  %940 = vmatpush3.bf16.msra.mxu1 %v963_v15 }
  0x20   : > { %828 = vmatprep.subr.bf16.mxu0 %v964_v16  ;;  %933 = vmatprep.subr.bf16.mxu1 %v964_v16 }
  0x23   : > { %829 = vmatpush3.bf16.msra.mxu0 %v965_v17  ;;  %941 = vmatpush3.bf16.msra.mxu1 %v965_v17 }
  0x26   : > { %504 = vmatmul.mubr.bf16.vlgmr.msra.gmra.mrb[0].mxu0 %v966_v18  ;;  %568 = vmatmul.mubr.bf16.vlgmr.msra.gmra.mrb[0].mxu1 %v969_v19 }
  0x27   : > { %511 = vmatprep.mubr.bf16.mxu0 %v972_v20  ;;  %575 = vmatprep.mubr.bf16.mxu1 %v974_v21 }
  0x2e   : > { %512 = vmatmul.mubr.bf16.gmra.mrb[4].mxu0 %v976_v22  ;;  %576 = vmatmul.mubr.bf16.gmra.mrb[4].mxu1 %v977_v23 }
  0x2f   : > { %519 = vmatprep.mubr.bf16.mxu0 %v978_v24  ;;  %583 = vmatprep.mubr.bf16.mxu1 %v980_v25 }
  0x36   : > { %520 = vmatmul.mubr.bf16.gmra.mrb[8].mxu0 %v982_v26  ;;  %584 = vmatmul.mubr.bf16.gmra.mrb[8].mxu1 %v983_v27 }
  0x37   : > { %527 = vmatprep.mubr.bf16.mxu0 %v984_v28  ;;  %591 = vmatprep.mubr.bf16.mxu1 %v986_v29 }
  0x3e   : > { %528 = vmatmul.mubr.bf16.gmra.mrb[12].mxu0 %v988_v30  ;;  %592 = vmatmul.mubr.bf16.gmra.mrb[12].mxu1 %v989_v31 }
  0x3f   : > { %535 = vmatprep.mubr.bf16.mxu0 %v990_v32  ;;  %599 = vmatprep.mubr.bf16.mxu1 %v992_v33 }
  0x46   : > { %536 = vmatmul.mubr.bf16.gmra.mrb[16].mxu0 %v994_v34  ;;  %600 = vmatmul.mubr.bf16.gmra.mrb[16].mxu1 %v995_v35 }
  0x47   : > { %543 = vmatprep.mubr.bf16.mxu0 %v996_v36  ;;  %607 = vmatprep.mubr.bf16.mxu1 %v998_v37 }
  0x4e   : > { %544 = vmatmul.mubr.bf16.gmra.mrb[20].mxu0 %v1000_v38  ;;  %608 = vmatmul.mubr.bf16.gmra.mrb[20].mxu1 %v1001_v39 }
  0x4f   : > { %551 = vmatprep.mubr.bf16.mxu0 %v1002_v40  ;;  %615 = vmatprep.mubr.bf16.mxu1 %v1004_v41 }
  0x56   : > { %552 = vmatmul.mubr.bf16.gmra.mrb[24].mxu0 %v1006_v42  ;;  %616 = vmatmul.mubr.bf16.gmra.mrb[24].mxu1 %v1007_v43 }
  0x57   : > { %559 = vmatprep.mubr.bf16.mxu0 %v1008_v44  ;;  %623 = vmatprep.mubr.bf16.mxu1 %v1010_v45 }
  0x5e   : > { %560 = vmatmul.mubr.bf16.gmra.mrb[28].mxu0 %v1012_v46  ;;  %624 = vmatmul.mubr.bf16.gmra.mrb[28].mxu1 %v1013_v47 }
  0xf9   : > { %v830_v48 = vpop.f32.mrb[0].mxu0  ;;  %v878_v49 = vpop.f32.mrb[0].mxu1 }
  0xfa   : > { %v831_v50 = vpop.f32.mrb[1].mxu0  ;;  %v879_v51 = vpop.f32.mrb[1].mxu1 }
  0xfb   : > { %v832_v52 = vadd.f32 %v831_v50, %v830_v48  ;;  %v880_v53 = vadd.f32 %v879_v51, %v878_v49  ;;  %v833_v54 = vpop.f32.mrb[2].mxu0  ;;  %v881_v55 = vpop.f32.mrb[2].mxu1 }
  0xfc   : > { %v834_v56 = vpop.f32.mrb[3].mxu0  ;;  %v882_v57 = vpop.f32.mrb[3].mxu1 }
  0xfd   : > { %v632_v58 = vmax.f32 %v832_v52, 0.0  ;;  %v648_v59 = vmax.f32 %v880_v53, 0.0  ;;  %v835_v60 = vadd.f32 %v834_v56, %v833_v54  ;;  %v883_v61 = vadd.f32 %v882_v57, %v881_v55 }
  0xff   : > { %665 = vst.msk [vmem:[%s1140_s24] sm:$0xff] %vm664_vm0, %v632_v58  ;;  %681 = vst.msk [vmem:[%s1140_s24 + $0x80] sm:$0xff] %vm664_vm0, %v648_v59  ;;  %v633_v62 = vmax.f32 %v835_v60, 0.0  ;;  %v649_v63 = vmax.f32 %v883_v61, 0.0 }
 0x101   : > { %666 = vst.msk [vmem:[%s1140_s24 + $0x8] sm:$0xff] %vm664_vm0, %v633_v62  ;;  %682 = vst.msk [vmem:[%s1140_s24 + $0x88] sm:$0xff] %vm664_vm0, %v649_v63  ;;  %v836_v0 = vpop.f32.mrb[4].mxu0  ;;  %v884_v1 = vpop.f32.mrb[4].mxu1 }
 0x102   : > { %v837_v2 = vpop.f32.mrb[5].mxu0  ;;  %v885_v3 = vpop.f32.mrb[5].mxu1 }
 0x103   : > { %v838_v4 = vadd.f32 %v837_v2, %v836_v0  ;;  %v886_v5 = vadd.f32 %v885_v3, %v884_v1  ;;  %v839_v6 = vpop.f32.mrb[6].mxu0  ;;  %v887_v7 = vpop.f32.mrb[6].mxu1 }
 0x104   : > { %v840_v8 = vpop.f32.mrb[7].mxu0  ;;  %v888_v9 = vpop.f32.mrb[7].mxu1 }
 0x105   : > { %v634_v10 = vmax.f32 %v838_v4, 0.0  ;;  %v650_v11 = vmax.f32 %v886_v5, 0.0  ;;  %v841_v12 = vadd.f32 %v840_v8, %v839_v6  ;;  %v889_v13 = vadd.f32 %v888_v9, %v887_v7 }
 0x107   : > { %667 = vst.msk [vmem:[%s1140_s24 + $0x10] sm:$0xff] %vm664_vm0, %v634_v10  ;;  %683 = vst.msk [vmem:[%s1140_s24 + $0x90] sm:$0xff] %vm664_vm0, %v650_v11  ;;  %v635_v14 = vmax.f32 %v841_v12, 0.0  ;;  %v651_v15 = vmax.f32 %v889_v13, 0.0 }
 0x109   : > { %668 = vst.msk [vmem:[%s1140_s24 + $0x18] sm:$0xff] %vm664_vm0, %v635_v14  ;;  %684 = vst.msk [vmem:[%s1140_s24 + $0x98] sm:$0xff] %vm664_vm0, %v651_v15  ;;  %v842_v16 = vpop.f32.mrb[8].mxu0  ;;  %v890_v17 = vpop.f32.mrb[8].mxu1 }
 0x10a   : > { %v843_v18 = vpop.f32.mrb[9].mxu0  ;;  %v891_v19 = vpop.f32.mrb[9].mxu1 }
 0x10b   : > { %v844_v20 = vadd.f32 %v843_v18, %v842_v16  ;;  %v892_v21 = vadd.f32 %v891_v19, %v890_v17  ;;  %v845_v22 = vpop.f32.mrb[10].mxu0  ;;  %v893_v23 = vpop.f32.mrb[10].mxu1 }
 0x10c   : > { %v846_v24 = vpop.f32.mrb[11].mxu0  ;;  %v894_v25 = vpop.f32.mrb[11].mxu1 }
 0x10d   : > { %v636_v26 = vmax.f32 %v844_v20, 0.0  ;;  %v652_v27 = vmax.f32 %v892_v21, 0.0  ;;  %v847_v28 = vadd.f32 %v846_v24, %v845_v22  ;;  %v895_v29 = vadd.f32 %v894_v25, %v893_v23 }
 0x10f   : > { %669 = vst.msk [vmem:[%s1140_s24 + $0x20] sm:$0xff] %vm664_vm0, %v636_v26  ;;  %685 = vst.msk [vmem:[%s1140_s24 + $0xa0] sm:$0xff] %vm664_vm0, %v652_v27  ;;  %v637_v30 = vmax.f32 %v847_v28, 0.0  ;;  %v653_v31 = vmax.f32 %v895_v29, 0.0 }
 0x111   : > { %670 = vst.msk [vmem:[%s1140_s24 + $0x28] sm:$0xff] %vm664_vm0, %v637_v30  ;;  %686 = vst.msk [vmem:[%s1140_s24 + $0xa8] sm:$0xff] %vm664_vm0, %v653_v31  ;;  %v848_v32 = vpop.f32.mrb[12].mxu0  ;;  %v896_v33 = vpop.f32.mrb[12].mxu1 }
 0x112   : > { %v849_v34 = vpop.f32.mrb[13].mxu0  ;;  %v897_v35 = vpop.f32.mrb[13].mxu1 }
 0x113   : > { %v850_v36 = vadd.f32 %v849_v34, %v848_v32  ;;  %v898_v37 = vadd.f32 %v897_v35, %v896_v33  ;;  %v851_v38 = vpop.f32.mrb[14].mxu0  ;;  %v899_v39 = vpop.f32.mrb[14].mxu1 }
 0x114   : > { %v852_v40 = vpop.f32.mrb[15].mxu0  ;;  %v900_v41 = vpop.f32.mrb[15].mxu1 }
 0x115   : > { %v638_v42 = vmax.f32 %v850_v36, 0.0  ;;  %v654_v43 = vmax.f32 %v898_v37, 0.0  ;;  %v853_v44 = vadd.f32 %v852_v40, %v851_v38  ;;  %v901_v45 = vadd.f32 %v900_v41, %v899_v39 }
 0x117   : > { %671 = vst.msk [vmem:[%s1140_s24 + $0x30] sm:$0xff] %vm664_vm0, %v638_v42  ;;  %687 = vst.msk [vmem:[%s1140_s24 + $0xb0] sm:$0xff] %vm664_vm0, %v654_v43  ;;  %v639_v46 = vmax.f32 %v853_v44, 0.0  ;;  %v655_v47 = vmax.f32 %v901_v45, 0.0 }
 0x119   : > { %672 = vst.msk [vmem:[%s1140_s24 + $0x38] sm:$0xff] %vm664_vm0, %v639_v46  ;;  %688 = vst.msk [vmem:[%s1140_s24 + $0xb8] sm:$0xff] %vm664_vm0, %v655_v47  ;;  %v854_v48 = vpop.f32.mrb[16].mxu0  ;;  %v902_v49 = vpop.f32.mrb[16].mxu1 }
 0x11a   : > { %v855_v50 = vpop.f32.mrb[17].mxu0  ;;  %v903_v51 = vpop.f32.mrb[17].mxu1 }
 0x11b   : > { %v856_v52 = vadd.f32 %v855_v50, %v854_v48  ;;  %v904_v53 = vadd.f32 %v903_v51, %v902_v49  ;;  %v857_v54 = vpop.f32.mrb[18].mxu0  ;;  %v905_v55 = vpop.f32.mrb[18].mxu1 }
 0x11c   : > { %v858_v56 = vpop.f32.mrb[19].mxu0  ;;  %v906_v57 = vpop.f32.mrb[19].mxu1 }
 0x11d   : > { %v640_v58 = vmax.f32 %v856_v52, 0.0  ;;  %v656_v59 = vmax.f32 %v904_v53, 0.0  ;;  %v859_v60 = vadd.f32 %v858_v56, %v857_v54  ;;  %v907_v61 = vadd.f32 %v906_v57, %v905_v55 }
 0x11f   : > { %673 = vst.msk [vmem:[%s1140_s24 + $0x40] sm:$0xff] %vm664_vm0, %v640_v58  ;;  %689 = vst.msk [vmem:[%s1140_s24 + $0xc0] sm:$0xff] %vm664_vm0, %v656_v59  ;;  %v641_v62 = vmax.f32 %v859_v60, 0.0  ;;  %v657_v63 = vmax.f32 %v907_v61, 0.0 }
 0x121   : > { %674 = vst.msk [vmem:[%s1140_s24 + $0x48] sm:$0xff] %vm664_vm0, %v641_v62  ;;  %690 = vst.msk [vmem:[%s1140_s24 + $0xc8] sm:$0xff] %vm664_vm0, %v657_v63  ;;  %v860_v0 = vpop.f32.mrb[20].mxu0  ;;  %v908_v1 = vpop.f32.mrb[20].mxu1 }
 0x122   : > { %v861_v2 = vpop.f32.mrb[21].mxu0  ;;  %v909_v3 = vpop.f32.mrb[21].mxu1 }
 0x123   : > { %v862_v4 = vadd.f32 %v861_v2, %v860_v0  ;;  %v910_v5 = vadd.f32 %v909_v3, %v908_v1  ;;  %v863_v6 = vpop.f32.mrb[22].mxu0  ;;  %v911_v7 = vpop.f32.mrb[22].mxu1 }
 0x124   : > { %v864_v8 = vpop.f32.mrb[23].mxu0  ;;  %v912_v9 = vpop.f32.mrb[23].mxu1 }
 0x125   : > { %v642_v10 = vmax.f32 %v862_v4, 0.0  ;;  %v658_v11 = vmax.f32 %v910_v5, 0.0  ;;  %v865_v12 = vadd.f32 %v864_v8, %v863_v6  ;;  %v913_v13 = vadd.f32 %v912_v9, %v911_v7 }
 0x127   : > { %675 = vst.msk [vmem:[%s1140_s24 + $0x50] sm:$0xff] %vm664_vm0, %v642_v10  ;;  %691 = vst.msk [vmem:[%s1140_s24 + $0xd0] sm:$0xff] %vm664_vm0, %v658_v11  ;;  %v643_v14 = vmax.f32 %v865_v12, 0.0  ;;  %v659_v15 = vmax.f32 %v913_v13, 0.0 }
 0x129   : > { %676 = vst.msk [vmem:[%s1140_s24 + $0x58] sm:$0xff] %vm664_vm0, %v643_v14  ;;  %692 = vst.msk [vmem:[%s1140_s24 + $0xd8] sm:$0xff] %vm664_vm0, %v659_v15  ;;  %v866_v16 = vpop.f32.mrb[24].mxu0  ;;  %v914_v17 = vpop.f32.mrb[24].mxu1 }
 0x12a   : > { %v867_v18 = vpop.f32.mrb[25].mxu0  ;;  %v915_v19 = vpop.f32.mrb[25].mxu1 }
 0x12b   : > { %v868_v20 = vadd.f32 %v867_v18, %v866_v16  ;;  %v916_v21 = vadd.f32 %v915_v19, %v914_v17  ;;  %v869_v22 = vpop.f32.mrb[26].mxu0  ;;  %v917_v23 = vpop.f32.mrb[26].mxu1 }
 0x12c   : > { %v870_v24 = vpop.f32.mrb[27].mxu0  ;;  %v918_v25 = vpop.f32.mrb[27].mxu1 }
 0x12d   : > { %v644_v26 = vmax.f32 %v868_v20, 0.0  ;;  %v660_v27 = vmax.f32 %v916_v21, 0.0  ;;  %v871_v28 = vadd.f32 %v870_v24, %v869_v22  ;;  %v919_v29 = vadd.f32 %v918_v25, %v917_v23 }
 0x12f   : > { %677 = vst.msk [vmem:[%s1140_s24 + $0x60] sm:$0xff] %vm664_vm0, %v644_v26  ;;  %693 = vst.msk [vmem:[%s1140_s24 + $0xe0] sm:$0xff] %vm664_vm0, %v660_v27  ;;  %v645_v30 = vmax.f32 %v871_v28, 0.0  ;;  %v661_v31 = vmax.f32 %v919_v29, 0.0 }
 0x131   : > { %678 = vst.msk [vmem:[%s1140_s24 + $0x68] sm:$0xff] %vm664_vm0, %v645_v30  ;;  %694 = vst.msk [vmem:[%s1140_s24 + $0xe8] sm:$0xff] %vm664_vm0, %v661_v31  ;;  %v872_v32 = vpop.f32.mrb[28].mxu0  ;;  %v920_v33 = vpop.f32.mrb[28].mxu1 }
 0x132   : > { %v873_v34 = vpop.f32.mrb[29].mxu0  ;;  %v921_v35 = vpop.f32.mrb[29].mxu1 }
 0x133   : > { %v874_v36 = vadd.f32 %v873_v34, %v872_v32  ;;  %v922_v37 = vadd.f32 %v921_v35, %v920_v33  ;;  %v875_v38 = vpop.f32.mrb[30].mxu0  ;;  %v923_v39 = vpop.f32.mrb[30].mxu1 }
 0x134   : > { %v876_v40 = vpop.f32.mrb[31].mxu0  ;;  %v924_v41 = vpop.f32.mrb[31].mxu1 }
 0x135   : > { %v646_v42 = vmax.f32 %v874_v36, 0.0  ;;  %v662_v43 = vmax.f32 %v922_v37, 0.0  ;;  %v877_v44 = vadd.f32 %v876_v40, %v875_v38  ;;  %v925_v45 = vadd.f32 %v924_v41, %v923_v39 }
 0x137   : > { %679 = vst.msk [vmem:[%s1140_s24 + $0x70] sm:$0xff] %vm664_vm0, %v646_v42  ;;  %695 = vst.msk [vmem:[%s1140_s24 + $0xf0] sm:$0xff] %vm664_vm0, %v662_v43  ;;  %v647_v46 = vmax.f32 %v877_v44, 0.0  ;;  %v663_v47 = vmax.f32 %v925_v45, 0.0 }
 0x139   : > { %680 = vst.msk [vmem:[%s1140_s24 + $0x78] sm:$0xff] %vm664_vm0, %v647_v46  ;;  %696 = vst.msk [vmem:[%s1140_s24 + $0xf8] sm:$0xff] %vm664_vm0, %v663_v47 }
 0x13a PF: > { %s12_s9 = sadd.s32 1, %s1020_s9  }
 0x13b   : > { %p9_p4 = scmp.ge.s32.totalorder %s12_s9, 4  }
 0x13d   :  { %11 = sbr.rel (!%p9_p4) target bundleno = 1 (0x1), region = 58 }

// kernel: secct_forward.7
= control target key start
LH: loop header
LB: loop body
LE: loop exit
PB: predicated region body
PF: predicated region fallthrough
CT: control target
= control target key end

     0   :  { %vm43_vm0 = vcmask 523264   ;;  %s2091_s0 = inlined_call_operand.vmem [shape: f32[2,64,64], index: 0, kind: input, shape index: {}]   ;;  %s2092_s1 = inlined_call_operand.vmem [shape: f32[1,64], index: 1, kind: input, shape index: {}]   ;;  %s2093_s2 = inlined_call_operand.vmem [shape: f32[1,64], index: 2, kind: input, shape index: {}]   ;;  %s2094_s3 = inlined_call_operand.vmem [shape: f32[64,4], index: 3, kind: input, shape index: {}]   ;;  %s2095_s4 = inlined_call_operand.vmem [shape: f32[1,4], index: 4, kind: input, shape index: {}]   ;;  %s2096_s5 = inlined_call_operand.vmem [shape: f32[4,64], index: 5, kind: input, shape index: {}]   ;;  %s2097_s6 = inlined_call_operand.vmem [shape: f32[1,64], index: 6, kind: input, shape index: {}]   ;;  %s2098_s7 = inlined_call_operand.vmem [shape: f32[64,10], index: 7, kind: input, shape index: {}]   ;;  %s2099_s8 = inlined_call_operand.vmem [shape: f32[1,10], index: 8, kind: input, shape index: {}]   ;;  %s2100_s9 = inlined_call_operand.hbm [shape: f32[2,10], index: 9, kind: output, shape index: {}]  }
   0x1   :  { %v33_v0 = vld [vmem:[%s2091_s0] sm:$0xff]  ;;  %v35_v1 = vld [vmem:[%s2091_s0 + $0x10] sm:$0xff]  ;;  %v34_v2 = vld [vmem:[%s2091_s0 + $0x8] sm:$0xff] }
   0x2   :  { %v44_v3 = vsel %vm43_vm0, %v33_v0, 0.0  ;;  %v50_v4 = vsel %vm43_vm0, %v35_v1, 0.0  ;;  %v36_v5 = vld [vmem:[%s2091_s0 + $0x18] sm:$0xff]  ;;  %v47_v6 = vsel %vm43_vm0, %v34_v2, 0.0 }
   0x3   :  { %45 = vadd.xlane.f32.xlu0 %v44_v3  ;;  %51 = vadd.xlane.f32.xlu1 %v50_v4  ;;  %v53_v7 = vsel %vm43_vm0, %v36_v5, 0.0 }
   0x4   :  { %14 = vsyncpa [#allocation3], 0  ;;  %v37_v8 = vld [vmem:[%s2091_s0 + $0x20] sm:$0xff]  ;;  %v38_v9 = vld [vmem:[%s2091_s0 + $0x28] sm:$0xff]  ;;  %v1596_v56 = vmov 0.0|0.0   ;;  %vm1597_vm1 = vmmov 0  }
   0x5   :  { %v56_v10 = vsel %vm43_vm0, %v37_v8, 0.0  ;;  %v59_v11 = vsel %vm43_vm0, %v38_v9, 0.0  ;;  %v39_v12 = vld [vmem:[%s2091_s0 + $0x30] sm:$0xff]  ;;  %v40_v13 = vld [vmem:[%s2091_s0 + $0x38] sm:$0xff]  ;;  %1423 = vmatprep.subr.bf16.mxu0 %v1596_v56  ;;  %1439 = vmatprep.subr.bf16.mxu1 %v1596_v56  ;;  %v1598_v57 = vmov 0.0   ;;  %v1732_v58 = vld [vmem:[%s2091_s0 + $0x48] sm:$0xff] }
   0x6   :  { %v62_v14 = vsel %vm43_vm0, %v39_v12, 0.0  ;;  %v65_v15 = vsel %vm43_vm0, %v40_v13, 0.0  ;;  %1277 = vmatprep.mubr.msk.f32.mxu0 %vm1597_vm1, %v1598_v57  ;;  %1296 = vmatprep.mubr.msk.f32.mxu1 %vm1597_vm1, %v1598_v57  ;;  %v1737_v59 = vld [vmem:[%s2091_s0 + $0x40] sm:$0xff]  ;;  %v612_v61 = vsel %vm43_vm0, %v1732_v58, 0.0  ;;  %v276_v63 = vld [vmem:[%s2094_s3 + $0x8] sm:$0xff]  ;;  %v1760_v3 = vld [vmem:[%s2091_s0 + $0x58] sm:$0xff] }
   0x7   :  { %48 = vadd.xlane.f32.xlu0 %v47_v6  ;;  %54 = vadd.xlane.f32.xlu1 %v53_v7  ;;  %v275_v60 = vld [vmem:[%s2094_s3] sm:$0xff]  ;;  %v609_v62 = vsel %vm43_vm0, %v1737_v59, 0.0  ;;  %v1765_v4 = vld [vmem:[%s2091_s0 + $0x50] sm:$0xff]  ;;  %vm1807_vm2 = vmpackc.low %vm43_vm0, %vm43_vm0  ;;  %vm364_vm3 = vcmask 1043456   ;;  %vm360_vm4 = vcmask 31744   ;;  %s1600_s12 = smov [#allocation2]  }
   0x8   :  { %v615_v6 = vsel %vm43_vm0, %v1765_v4, 0.0  ;;  %s1137_s13 = sshll.u32 %s1600_s12, 4  ;;  %vm1127_vm5 = vcmask 1040384   ;;  %vm1129_vm6 = vcmask 74752   ;;  %s1138_s13 = int_to_ptr.vmem [resolvable:$true] %s1137_s13 }
   0x9   :  { %p1577_p1 = scmp.lt.s32.totalorder %s1138_s13, %s1138_s13 }
   0xb   :  { %57 = vadd.xlane.f32.xlu0 %v56_v10  ;;  %60 = vadd.xlane.f32.xlu1 %v59_v11 }
   0xf   :  { %63 = vadd.xlane.f32.xlu0 %v62_v14  ;;  %66 = vadd.xlane.f32.xlu1 %v65_v15 }
  0x90   :  { %v46_v16 = vpop.xlane.xlu0 %45  ;;  %v52_v17 = vpop.xlane.xlu1 %51 }
  0x91   :  { %v69_v18 = vmul.f32 0.015625, %v46_v16  ;;  %v71_v19 = vmul.f32 0.015625, %v52_v17 }
  0x93   :  { %v1683_v20 = vsub.f32 %v33_v0, %v69_v18  ;;  %v1685_v21 = vsub.f32 %v35_v1, %v71_v19  ;;  %v277_v0 = vld [vmem:[%s2094_s3 + $0x10] sm:$0xff]  ;;  %v278_v1 = vld [vmem:[%s2094_s3 + $0x18] sm:$0xff] }
  0x94   :  { %v49_v22 = vpop.xlane.xlu0 %48  ;;  %v55_v23 = vpop.xlane.xlu1 %54  ;;  %v1772_v7 = vpack.c.bf16 %v278_v1, %v277_v0 }
  0x95   :  { %v70_v24 = vmul.f32 0.015625, %v49_v22  ;;  %v72_v25 = vmul.f32 0.015625, %v55_v23  ;;  %v85_v26 = vmul.f32 %v1683_v20, %v1683_v20  ;;  %v87_v27 = vmul.f32 %v1685_v21, %v1685_v21 }
  0x97   :  { %v1691_v28 = vsub.f32 %v34_v2, %v70_v24  ;;  %v1693_v29 = vsub.f32 %v36_v5, %v72_v25  ;;  %v93_v30 = vsel %vm43_vm0, %v85_v26, 0.0  ;;  %v99_v33 = vsel %vm43_vm0, %v87_v27, 0.0 }
  0x98   :  { %94 = vadd.xlane.f32.xlu0 %v93_v30  ;;  %v58_v31 = vpop.xlane.xlu0 %57  ;;  %v61_v32 = vpop.xlane.xlu1 %60  ;;  %v1755_v2 = vpack.c.bf16 %v276_v63, %v275_v60  ;;  %v618_v5 = vsel %vm43_vm0, %v1760_v3, 0.0 }
  0x99   :  { %v73_v34 = vmul.f32 0.015625, %v58_v31  ;;  %v74_v35 = vmul.f32 0.015625, %v61_v32  ;;  %v86_v36 = vmul.f32 %v1691_v28, %v1691_v28  ;;  %v88_v37 = vmul.f32 %v1693_v29, %v1693_v29 }
  0x9a   :  { %1441 = vmatpush3.bf16.msra.mxu1 %v1755_v2 }
  0x9b   :  { %v1701_v38 = vsub.f32 %v37_v8, %v73_v34  ;;  %v1703_v39 = vsub.f32 %v38_v9, %v74_v35  ;;  %v96_v40 = vsel %vm43_vm0, %v86_v36, 0.0  ;;  %v102_v43 = vsel %vm43_vm0, %v88_v37, 0.0  ;;  %1442 = vmatprep.subr.bf16.mxu1 %v1596_v56  ;;  %v279_v8 = vld [vmem:[%s2094_s3 + $0x20] sm:$0xff]  ;;  %v280_v9 = vld [vmem:[%s2094_s3 + $0x28] sm:$0xff] }
  0x9c   :  { %100 = vadd.xlane.f32.xlu0 %v99_v33  ;;  %97 = vadd.xlane.f32.xlu1 %v96_v40  ;;  %v64_v41 = vpop.xlane.xlu0 %63  ;;  %v67_v42 = vpop.xlane.xlu1 %66  ;;  %v1782_v10 = vpack.c.bf16 %v280_v9, %v279_v8  ;;  %v1791_v40 = vld [vmem:[%s2092_s1] ss:$0 sm:$0xff] }
  0x9d   :  { %v75_v44 = vmul.f32 0.015625, %v64_v41  ;;  %v76_v45 = vmul.f32 0.015625, %v67_v42  ;;  %v89_v46 = vmul.f32 %v1701_v38, %v1701_v38  ;;  %v90_v47 = vmul.f32 %v1703_v39, %v1703_v39 }
  0x9e   :  { %1444 = vmatpush3.bf16.msra.mxu1 %v1772_v7 }
  0x9f   :  { %v1711_v48 = vsub.f32 %v39_v12, %v75_v44  ;;  %v1713_v49 = vsub.f32 %v40_v13, %v76_v45  ;;  %v105_v50 = vsel %vm43_vm0, %v89_v46, 0.0  ;;  %v108_v51 = vsel %vm43_vm0, %v90_v47, 0.0  ;;  %1445 = vmatprep.subr.bf16.mxu1 %v1596_v56 }
  0xa0   :  { %103 = vadd.xlane.f32.xlu1 %v102_v43  ;;  %106 = vadd.xlane.f32.xlu0 %v105_v50 }
  0xa1   :  { %v91_v52 = vmul.f32 %v1711_v48, %v1711_v48  ;;  %v92_v53 = vmul.f32 %v1713_v49, %v1713_v49 }
  0xa2   :  { %1447 = vmatpush3.bf16.msra.mxu1 %v1782_v10 }
  0xa3   :  { %v111_v54 = vsel %vm43_vm0, %v91_v52, 0.0  ;;  %v114_v55 = vsel %vm43_vm0, %v92_v53, 0.0  ;;  %1448 = vmatprep.subr.bf16.mxu1 %v1596_v56 }
  0xa4   :  { %109 = vadd.xlane.f32.xlu1 %v108_v51  ;;  %112 = vadd.xlane.f32.xlu0 %v111_v54 }
  0xa8   :  { %115 = vadd.xlane.f32.xlu1 %v114_v55  ;;  %610 = vadd.xlane.f32.xlu0 %v609_v62 }
  0xac   :  { %613 = vadd.xlane.f32.xlu1 %v612_v61  ;;  %616 = vadd.xlane.f32.xlu0 %v615_v6 }
  0xb0   :  { %619 = vadd.xlane.f32.xlu1 %v618_v5 }
 0x125   :  { %v95_v11 = vpop.xlane.xlu0 %94 }
 0x126   :  { %v117_v12 = vmul.f32 0.015625, %v95_v11 }
 0x128   :  { %v125_v13 = vadd.f32 1e-05, %v117_v12 }
 0x129   :  { %v98_v14 = vpop.xlane.xlu1 %97  ;;  %v101_v15 = vpop.xlane.xlu0 %100 }
 0x12a   :  { %1532 = vrsqrt.f32 %v125_v13  ;;  %v118_v16 = vmul.f32 0.015625, %v98_v14  ;;  %v119_v17 = vmul.f32 0.015625, %v101_v15 }
 0x12c   :  { %v126_v18 = vadd.f32 1e-05, %v118_v16  ;;  %v127_v19 = vadd.f32 1e-05, %v119_v17 }
 0x12d   :  { %v104_v22 = vpop.xlane.xlu1 %103  ;;  %v107_v23 = vpop.xlane.xlu0 %106 }
 0x12e   :  { %1534 = vrsqrt.f32 %v126_v18  ;;  %v120_v24 = vmul.f32 0.015625, %v104_v22  ;;  %v121_v26 = vmul.f32 0.015625, %v107_v23  ;;  %v281_v22 = vld [vmem:[%s2094_s3 + $0x30] sm:$0xff]  ;;  %v282_v23 = vld [vmem:[%s2094_s3 + $0x38] sm:$0xff]  ;;  %s1572_s3 = scalar_lea.vmem %s1138_s13, 32 }
 0x12f   :  { %1536 = vrsqrt.f32 %v127_v19  ;;  %p1573_p0 = scmp.ne.s32.totalorder %s1138_s13, %s1572_s3  ;;  %p1578_p2 = scmp.lt.s32.totalorder %s1572_s3, %s1572_s3 }
 0x130   :  { %v128_v25 = vadd.f32 1e-05, %v120_v24  ;;  %v129_v32 = vadd.f32 1e-05, %v121_v26  ;;  %v1861_v24 = vpack.c.bf16 %v282_v23, %v281_v22  ;;  %v1166_v26 = vld [vmem:[%s2091_s0 + $0x60] sm:$0xff] }
 0x131   :  { %v110_v27 = vpop.xlane.xlu1 %109  ;;  %v113_v34 = vpop.xlane.xlu0 %112  ;;  %p1579_p3 = por %p1578_p2, %p1577_p1 }
 0x132   :  { %1538 = vrsqrt.f32 %v128_v25  ;;  %v122_v30 = vmul.f32 0.015625, %v110_v27  ;;  %v123_v42 = vmul.f32 0.015625, %v113_v34  ;;  %v1167_v25 = vld [vmem:[%s2091_s0 + $0x68] sm:$0xff]  ;;  %1450 = vmatpush3.bf16.msra.mxu1 %v1861_v24 }
 0x133   :  { %v624_v27 = vsel %vm43_vm0, %v1167_v25, 0.0  ;;  %1299 = vmatprep.subr.mxu1 %v1598_v57  ;;  %p1580_p4 = pnand %p1579_p3, %p1573_p0 }
 0x134   :  { %v1533_v31 = vpop.eup %1532  ;;  %v130_v33 = vadd.f32 1e-05, %v122_v30  ;;  %v131_v51 = vadd.f32 1e-05, %v123_v42  ;;  %v621_v30 = vsel %vm43_vm0, %v1166_v26, 0.0  ;;  %625 = vadd.xlane.f32.xlu1 %v624_v27 }
 0x135   :  { %v116_v35 = vpop.xlane.xlu1 %115  ;;  %v141_v36 = vmul.f32 %v1533_v31, %v1683_v20  ;;  %v1798_v20 = vld [vmem:[%s2093_s2] ss:$0 sm:$0xff]  ;;  %622 = vadd.xlane.f32.xlu0 %v621_v30  ;;  %v1169_v31 = vld [vmem:[%s2091_s0 + $0x78] sm:$0xff]  ;;  %v611_v34 = vpop.xlane.xlu0 %610 }
 0x136   :  { %1540 = vrsqrt.f32 %v130_v33  ;;  %v124_v37 = vmul.f32 0.015625, %v116_v35  ;;  %v630_v35 = vsel %vm43_vm0, %v1169_v31, 0.0  ;;  %v1939_v27 = vld [vmem:[%s2095_s4] sm:$0x1] }
 0x137   :  { %1542 = vrsqrt.f32 %v129_v32  ;;  %v155_v44 = vmul.f32 %v1791_v40, %v141_v36  ;;  %v1168_v32 = vld [vmem:[%s2091_s0 + $0x70] sm:$0xff] }
 0x138   :  { %v1535_v41 = vpop.eup %1534  ;;  %v132_v46 = vadd.f32 1e-05, %v124_v37  ;;  %v627_v36 = vsel %vm43_vm0, %v1168_v32, 0.0  ;;  %631 = vadd.xlane.f32.xlu1 %v630_v35 }
 0x139   :  { %v142_v43 = vmul.f32 %v1535_v41, %v1691_v28  ;;  %v1537_v45 = vpop.eup %1536  ;;  %v169_v54 = vadd.f32 %v1798_v20, %v155_v44  ;;  %v614_v33 = vpop.xlane.xlu1 %613  ;;  %v633_v41 = vmul.f32 0.015625, %v611_v34  ;;  %628 = vadd.xlane.f32.xlu0 %v627_v36  ;;  %v519_v34 = vld [vmem:[%s2098_s7 + $0x8] sm:$0xff]  ;;  %v522_v36 = vld [vmem:[%s2098_s7 + $0x20] sm:$0xff] }
 0x13a   :  { %v143_v52 = vmul.f32 %v1537_v45, %v1685_v21  ;;  %1544 = vrsqrt.f32 %v132_v46  ;;  %v634_v37 = vmul.f32 0.015625, %v614_v33  ;;  %v617_v45 = vpop.xlane.xlu0 %616 }
 0x13b   :  { %v156_v47 = vmul.f32 %v1791_v40, %v142_v43  ;;  %1546 = vrsqrt.f32 %v131_v51  ;;  %v1885_v43 = vsub.f32 %v1737_v59, %v633_v41 }
 0x13c   :  { %v1539_v50 = vpop.eup %1538  ;;  %v157_v21 = vmul.f32 %v1791_v40, %v143_v52  ;;  %v1882_v42 = vsub.f32 %v1732_v58, %v634_v37  ;;  %v523_v37 = vld [vmem:[%s2098_s7 + $0x28] sm:$0xff] }
 0x13d   :  { %v144_v53 = vmul.f32 %v1539_v50, %v1693_v29  ;;  %v170_v28 = vadd.f32 %v1798_v20, %v156_v47  ;;  %v620_v44 = vpop.xlane.xlu1 %619  ;;  %v649_v50 = vmul.f32 %v1885_v43, %v1885_v43  ;;  %v1978_v41 = vpack.c.bf16 %v523_v37, %v522_v36 }
 0x13e   :  { %v171_v5 = vadd.f32 %v1798_v20, %v157_v21  ;;  %v650_v46 = vmul.f32 %v1882_v42, %v1882_v42  ;;  %v636_v47 = vmul.f32 0.015625, %v620_v44 }
 0x13f   :  { %v1811_v60 = vpack.c.bf16 %v170_v28, %v169_v54  ;;  %v158_v61 = vmul.f32 %v1791_v40, %v144_v53  ;;  %v657_v58 = vsel %vm43_vm0, %v649_v50, 0.0  ;;  %v635_v53 = vmul.f32 0.015625, %v617_v45 }
 0x140   :  { %v1541_v62 = vpop.eup %1540  ;;  %v660_v51 = vsel %vm43_vm0, %v650_v46, 0.0  ;;  %v1893_v52 = vsub.f32 %v1760_v3, %v636_v47  ;;  %658 = vadd.xlane.f32.xlu0 %v657_v58 }
 0x141   :  { %1426 = vmatpush3.bf16.xpose.msk.msra.mxu0 %vm1807_vm2, %v1811_v60  ;;  %v1543_v29 = vpop.eup %1542  ;;  %v146_v63 = vmul.f32 %v1541_v62, %v1703_v39  ;;  %v172_v0 = vadd.f32 %v1798_v20, %v158_v61  ;;  %661 = vadd.xlane.f32.xlu1 %v660_v51  ;;  %v1899_v54 = vsub.f32 %v1765_v4, %v635_v53  ;;  %v1986_v51 = vld [vmem:[%s2097_s6] sm:$0x1] }
 0x142   :  { %1427 = vmatprep.subr.bf16.mxu0 %v1596_v56  ;;  %v145_v1 = vmul.f32 %v1543_v29, %v1701_v38  ;;  %v652_v59 = vmul.f32 %v1893_v52, %v1893_v52 }
 0x143   :  { %v1823_v6 = vpack.c.bf16 %v172_v0, %v171_v5  ;;  %v160_v8 = vmul.f32 %v1791_v40, %v146_v63  ;;  %v651_v61 = vmul.f32 %v1899_v54, %v1899_v54 }
 0x144   :  { %v1545_v9 = vpop.eup %1544  ;;  %v159_v11 = vmul.f32 %v1791_v40, %v145_v1  ;;  %v666_v28 = vsel %vm43_vm0, %v652_v59, 0.0 }
 0x145   :  { %v1547_v12 = vpop.eup %1546  ;;  %v148_v39 = vmul.f32 %v1545_v9, %v1713_v49  ;;  %v174_v38 = vadd.f32 %v1798_v20, %v160_v8  ;;  %667 = vadd.xlane.f32.xlu1 %v666_v28  ;;  %v663_v3 = vsel %vm43_vm0, %v651_v61, 0.0 }
 0x146   :  { %v147_v13 = vmul.f32 %v1547_v12, %v1711_v48  ;;  %v173_v14 = vadd.f32 %v1798_v20, %v159_v11  ;;  %v1599_v48 = vmov 1.0   ;;  %664 = vadd.xlane.f32.xlu0 %v663_v3 }
 0x147   :  { %v162_v16 = vmul.f32 %v1791_v40, %v148_v39 }
 0x148   :  { %v1835_v15 = vpack.c.bf16 %v174_v38, %v173_v14  ;;  %v161_v17 = vmul.f32 %v1791_v40, %v147_v13 }
 0x149   :  { %1430 = vmatpush3.bf16.xpose.msk.msra.mxu0 %vm1807_vm2, %v1823_v6  ;;  %v176_v49 = vadd.f32 %v1798_v20, %v162_v16 }
 0x14a   :  { %1431 = vmatprep.subr.bf16.mxu0 %v1596_v56  ;;  %v175_v18 = vadd.f32 %v1798_v20, %v161_v17 }
 0x14c   :  { %v1845_v19 = vpack.c.bf16 %v176_v49, %v175_v18 }
 0x151   :  { %1434 = vmatpush3.bf16.xpose.msk.msra.mxu0 %vm1807_vm2, %v1835_v15 }
 0x152   :  { %1435 = vmatprep.subr.bf16.mxu0 %v1596_v56 }
 0x159   :  { %1438 = vmatpush3.bf16.xpose.msk.msra.mxu0 %vm1807_vm2, %v1845_v19 }
 0x15a   :  { %1463 = vmatprep.subr.bf16.mxu0 %v1596_v56 }
 0x160   :  { %1278 = vmatmul.mubr.msk.f32.vlgmr.msra.gmra.mrb[0].mxu0 %vm43_vm0, %v1599_v48 }
 0x161   :  { %1339 = vmatprep.mubr.msk.f32.mxu0 %vm1597_vm1, %v1598_v57 }
 0x1c1   :  { %v626_v63 = vpop.xlane.xlu1 %625 }
 0x1c2   :  { %v623_v4 = vpop.xlane.xlu0 %622  ;;  %v638_v0 = vmul.f32 0.015625, %v626_v63 }
 0x1c3   :  { %v637_v1 = vmul.f32 0.015625, %v623_v4 }
 0x1c4   :  { %v1908_v5 = vsub.f32 %v1167_v25, %v638_v0 }
 0x1c5   :  { %v1910_v8 = vsub.f32 %v1166_v26, %v637_v1  ;;  %v632_v9 = vpop.xlane.xlu1 %631  ;;  %v1931_v26 = vld [vmem:[%s2096_s5] sm:$0xf] }
 0x1c6   :  { %v629_v11 = vpop.xlane.xlu0 %628  ;;  %v654_v12 = vmul.f32 %v1908_v5, %v1908_v5  ;;  %v640_v39 = vmul.f32 0.015625, %v632_v9 }
 0x1c7   :  { %v653_v38 = vmul.f32 %v1910_v8, %v1910_v8  ;;  %v639_v13 = vmul.f32 0.015625, %v629_v11 }
 0x1c8   :  { %v672_v14 = vsel %vm43_vm0, %v654_v12, 0.0  ;;  %v1917_v16 = vsub.f32 %v1169_v31, %v640_v39 }
 0x1c9   :  { %v669_v17 = vsel %vm43_vm0, %v653_v38, 0.0  ;;  %v1920_v49 = vsub.f32 %v1168_v32, %v639_v13  ;;  %673 = vadd.xlane.f32.xlu1 %v672_v14 }
 0x1ca   :  { %670 = vadd.xlane.f32.xlu0 %v669_v17  ;;  %v656_v18 = vmul.f32 %v1917_v16, %v1917_v16 }
 0x1cb   :  { %v655_v22 = vmul.f32 %v1920_v49, %v1920_v49 }
 0x1cc   :  { %v678_v23 = vsel %vm43_vm0, %v656_v18, 0.0 }
 0x1cd   :  { %v675_v25 = vsel %vm43_vm0, %v655_v22, 0.0  ;;  %679 = vadd.xlane.f32.xlu1 %v678_v23  ;;  %v659_v45 = vpop.xlane.xlu0 %658 }
 0x1ce   :  { %676 = vadd.xlane.f32.xlu0 %v675_v25  ;;  %v662_v44 = vpop.xlane.xlu1 %661  ;;  %v681_v47 = vmul.f32 0.015625, %v659_v45 }
 0x1cf   :  { %v682_v46 = vmul.f32 0.015625, %v662_v44 }
 0x1d0   :  { %v689_v58 = vadd.f32 1e-05, %v681_v47 }
 0x1d1   :  { %v690_v50 = vadd.f32 1e-05, %v682_v46 }
 0x1d2   :  { %v668_v53 = vpop.xlane.xlu1 %667 }
 0x1d3   :  { %v665_v59 = vpop.xlane.xlu0 %664  ;;  %1548 = vrsqrt.f32 %v690_v50 }
 0x1d4   :  { %1550 = vrsqrt.f32 %v689_v58 }
 0x1dd   :  { %v1549_v12 = vpop.eup %1548 }
 0x1de   :  { %v1551_v39 = vpop.eup %1550  ;;  %v706_v18 = vmul.f32 %v1549_v12, %v1882_v42 }
 0x1df   :  { %v705_v22 = vmul.f32 %v1551_v39, %v1885_v43 }
 0x233   :  { %v270_v62 = vpop.f32.mrb[0].mxu0 }
 0x234   :  { %v274_v21 = vmul.f32 0.015625, %v270_v62  ;;  %v1279_v29 = vpop.f32.mrb[1].mxu0  ;;  %v684_v62 = vmul.f32 0.015625, %v668_v53 }
 0x236   :  { %1297 = vmatmul.mubr.msk.f32.vlgmr.msra.gmra.mrb[0].mxu1 %vm43_vm0, %v274_v21  ;;  %v683_v21 = vmul.f32 0.015625, %v665_v59  ;;  %v692_v63 = vadd.f32 1e-05, %v684_v62 }
 0x237   :  { %1301 = vmatprep.mubr.msk.f32.mxu1 %vm1597_vm1, %v1598_v57  ;;  %1300 = vmatpush3.msk.msra.mxu1 %vm364_vm3, %v1931_v26 }
 0x238   :  { %1451 = vmatprep.subr.bf16.mxu1 %v1596_v56  ;;  %v691_v0 = vadd.f32 1e-05, %v683_v21 }
 0x256   :  { %v674_v4 = vpop.xlane.xlu1 %673 }
 0x257   :  { %v671_v1 = vpop.xlane.xlu0 %670  ;;  %v686_v9 = vmul.f32 0.015625, %v674_v4 }
 0x258   :  { %v685_v11 = vmul.f32 0.015625, %v671_v1 }
 0x259   :  { %v694_v38 = vadd.f32 1e-05, %v686_v9 }
 0x25a   :  { %v693_v14 = vadd.f32 1e-05, %v685_v11  ;;  %v680_v17 = vpop.xlane.xlu1 %679 }
 0x25b   :  { %v677_v23 = vpop.xlane.xlu0 %676 }
 0x309   :  { %v353_v30 = vpop.f32.mrb[0].mxu1 }
 0x30a   :  { %v354_v31 = vadd.f32 %v353_v30, %v1939_v27  ;;  %v1298_v32 = vpop.f32.mrb[1].mxu1  ;;  %v688_v30 = vmul.f32 0.015625, %v680_v17 }
 0x30c   :  { %v357_v33 = vmax.f32 %v354_v31, 0.0  ;;  %v687_v31 = vmul.f32 0.015625, %v677_v23 }
 0x30e   :  { %1302 = vmatmul.mubr.msk.f32.vlgmr.msra.gmra.mrb[2].mxu1 %vm360_vm4, %v357_v33  ;;  %v714_v33 = vmul.f32 %v1791_v40, %v706_v18 }
 0x30f   :  { %1453 = vmatpush3.bf16.msra.mxu1 %v1811_v60  ;;  %1320 = vmatprep.mubr.msk.f32.mxu1 %vm1597_vm1, %v1598_v57  ;;  %v518_v60 = vld [vmem:[%s2098_s7] sm:$0xff] }
 0x310   :  { %1454 = vmatprep.subr.bf16.mxu1 %v1596_v56  ;;  %v1962_v35 = vpack.c.bf16 %v519_v34, %v518_v60  ;;  %v713_v60 = vmul.f32 %v1791_v40, %v705_v22  ;;  %v722_v37 = vadd.f32 %v1798_v20, %v714_v33 }
 0x312   :  { %1465 = vmatpush3.bf16.msra.mxu0 %v1962_v35  ;;  %v721_v43 = vadd.f32 %v1798_v20, %v713_v60 }
 0x313   :  { %1456 = vmatpush3.bf16.msra.mxu1 %v1823_v6  ;;  %v520_v6 = vld [vmem:[%s2098_s7 + $0x10] sm:$0xff]  ;;  %1466 = vmatprep.subr.bf16.mxu0 %v1596_v56 }
 0x314   :  { %1457 = vmatprep.subr.bf16.mxu1 %v1596_v56  ;;  %v1999_v50 = vpack.c.bf16 %v722_v37, %v721_v43 }
 0x317   :  { %1459 = vmatpush3.bf16.msra.mxu1 %v1835_v15  ;;  %v521_v15 = vld [vmem:[%s2098_s7 + $0x18] sm:$0xff] }
 0x318   :  { %1460 = vmatprep.subr.bf16.mxu1 %v1596_v56 }
 0x31b   :  { %1462 = vmatpush3.bf16.msra.mxu1 %v1845_v19  ;;  %v1968_v19 = vpack.c.bf16 %v521_v15, %v520_v6  ;;  %v696_v6 = vadd.f32 1e-05, %v688_v30  ;;  %v695_v15 = vadd.f32 1e-05, %v687_v31 }
 0x31c   :  { %1475 = vmatprep.subr.bf16.mxu1 %v1596_v56 }
 0x31d   :  { %1468 = vmatpush3.bf16.msra.mxu0 %v1968_v19 }
 0x31e   :  { %1469 = vmatprep.subr.bf16.mxu0 %v1596_v56 }
 0x321   :  { %1471 = vmatpush3.bf16.msra.mxu0 %v1978_v41 }
 0x322   :  { %1472 = vmatprep.subr.bf16.mxu0 %v1596_v56 }
 0x3e1   :  { %v434_v28 = vpop.f32.mrb[2].mxu1 }
 0x3e2   :  { %v435_v61 = vadd.f32 %v434_v28, %v1986_v51  ;;  %v1303_v3 = vpop.f32.mrb[3].mxu1 }
 0x3e4   :  { %v1159_v29 = vmul.f32 -1.442695, %v435_v61 }
 0x3e6   :  { %1552 = vpow2.f32 %v1159_v29 }
 0x3e7   :  { %1554 = vrsqrt.f32 %v692_v63 }
 0x3e8   :  { %1556 = vrsqrt.f32 %v691_v0 }
 0x3e9   :  { %1558 = vrsqrt.f32 %v694_v38 }
 0x3f0   :  { %v1553_v13 = vpop.eup %1552 }
 0x3f1   :  { %v441_v25 = vadd.f32 1.0, %v1553_v13  ;;  %v1555_v32 = vpop.eup %1554 }
 0x3f2   :  { %v1557_v34 = vpop.eup %1556  ;;  %v708_v36 = vmul.f32 %v1555_v32, %v1893_v52 }
 0x3f3   :  { %1560 = vrcp.f32 %v441_v25  ;;  %v707_v42 = vmul.f32 %v1557_v34, %v1899_v54  ;;  %v1559_v44 = vpop.eup %1558 }
 0x3f4   :  { %1562 = vrsqrt.f32 %v693_v14  ;;  %v716_v46 = vmul.f32 %v1791_v40, %v708_v36  ;;  %v710_v52 = vmul.f32 %v1559_v44, %v1908_v5 }
 0x3f5   :  { %1564 = vrsqrt.f32 %v696_v6  ;;  %v715_v47 = vmul.f32 %v1791_v40, %v707_v42 }
 0x3f6   :  { %1566 = vrsqrt.f32 %v695_v15  ;;  %v724_v59 = vadd.f32 %v1798_v20, %v716_v46  ;;  %v718_v61 = vmul.f32 %v1791_v40, %v710_v52 }
 0x3f7   :  { %v723_v53 = vadd.f32 %v1798_v20, %v715_v47 }
 0x3f8   :  { %v726_v63 = vadd.f32 %v1798_v20, %v718_v61 }
 0x3f9   :  { %v1480_v62 = vpack.c.bf16 %v724_v59, %v723_v53 }
 0x3fd   :  { %v1561_v45 = vpop.eup %1560 }
 0x3fe   :  { %v1563_v58 = vpop.eup %1562  ;;  %1321 = vmatmul.mubr.msk.f32.vlgmr.msra.gmra.mrb[4].mxu1 %vm43_vm0, %v1561_v45 }
 0x3ff   :  { %1478 = vmatpush3.bf16.xpose.msk.msra.mxu1 %vm1807_vm2, %v1999_v50  ;;  %1358 = vmatprep.mubr.msk.f32.mxu1 %vm1597_vm1, %v1598_v57  ;;  %v709_v54 = vmul.f32 %v1563_v58, %v1910_v8  ;;  %v1565_v28 = vpop.eup %1564 }
 0x400   :  { %1479 = vmatprep.subr.bf16.mxu1 %v1596_v56  ;;  %v1567_v21 = vpop.eup %1566  ;;  %v712_v5 = vmul.f32 %v1565_v28, %v1917_v16 }
 0x401   :  { %v717_v3 = vmul.f32 %v1791_v40, %v709_v54  ;;  %v711_v8 = vmul.f32 %v1567_v21, %v1920_v49 }
 0x402   :  { %v720_v4 = vmul.f32 %v1791_v40, %v712_v5 }
 0x403   :  { %v725_v29 = vadd.f32 %v1798_v20, %v717_v3  ;;  %v719_v0 = vmul.f32 %v1791_v40, %v711_v8  ;;  %v524_v40 = vld [vmem:[%s2098_s7 + $0x30] sm:$0xff] }
 0x404   :  { %v728_v16 = vadd.f32 %v1798_v20, %v720_v4 }
 0x405   :  { %v1484_v1 = vpack.c.bf16 %v726_v63, %v725_v29  ;;  %v727_v9 = vadd.f32 %v1798_v20, %v719_v0  ;;  %v525_v20 = vld [vmem:[%s2098_s7 + $0x38] sm:$0xff] }
 0x406   :  { %v1473_v55 = vpack.c.bf16 %v525_v20, %v524_v40 }
 0x407   :  { %1482 = vmatpush3.bf16.xpose.msk.msra.mxu1 %vm1807_vm2, %v1480_v62  ;;  %v1488_v11 = vpack.c.bf16 %v728_v16, %v727_v9 }
 0x408   :  { %1483 = vmatprep.subr.bf16.mxu1 %v1596_v56  ;;  %1474 = vmatpush3.bf16.msra.mxu0 %v1473_v55 }
 0x409   :  { %1491 = vmatprep.subr.bf16.mxu0 %v1596_v56 }
 0x40f   :  { %1486 = vmatpush3.bf16.xpose.msk.msra.mxu1 %vm1807_vm2, %v1484_v1 }
 0x410   :  { %1487 = vmatprep.subr.bf16.mxu1 %v1596_v56 }
 0x417   :  { %1490 = vmatpush3.bf16.xpose.msk.msra.mxu1 %vm1807_vm2, %v1488_v11 }
 0x418   :  { %1515 = vmatprep.subr.bf16.mxu1 %v1596_v56 }
 0x41e   :  { %1359 = vmatmul.mubr.msk.f32.vlgmr.msra.gmra.mrb[6].mxu1 %vm43_vm0, %v1599_v48 }
 0x41f   :  { %1517 = vmatpush3.bf16.msra.mxu1 %v1962_v35  ;;  %1420 = vmatprep.mubr.msk.f32.mxu1 %vm1597_vm1, %v1598_v57 }
 0x420   :  { %1518 = vmatprep.subr.bf16.mxu1 %v1596_v56 }
 0x423   :  { %1520 = vmatpush3.bf16.msra.mxu1 %v1968_v19 }
 0x424   :  { %1521 = vmatprep.subr.bf16.mxu1 %v1596_v56 }
 0x427   :  { %1523 = vmatpush3.bf16.msra.mxu1 %v1978_v41 }
 0x428   :  { %1524 = vmatprep.subr.bf16.mxu1 %v1596_v56 }
 0x42b   :  { %1526 = vmatpush3.bf16.msra.mxu1 %v1473_v55 }
 0x4d1   :  { %v513_v48 = vpop.f32.mrb[4].mxu1 }
 0x4d2   :  { %v517_v49 = vmul.f32 0.015625, %v513_v48  ;;  %v1322_v35 = vpop.f32.mrb[5].mxu1 }
 0x4d4   :  { %1340 = vmatmul.mubr.msk.f32.vlgmr.msra.gmra.mrb[2].mxu0 %vm43_vm0, %v517_v49 }
 0x4d5   :  { %1493 = vmatpush3.bf16.msra.mxu0 %v1755_v2  ;;  %1377 = vmatprep.mubr.msk.f32.mxu0 %vm1597_vm1, %v1598_v57 }
 0x4d6   :  { %1494 = vmatprep.subr.bf16.mxu0 %v1596_v56 }
 0x4d9   :  { %1496 = vmatpush3.bf16.msra.mxu0 %v1772_v7 }
 0x4da   :  { %1497 = vmatprep.subr.bf16.mxu0 %v1596_v56 }
 0x4dd   :  { %1499 = vmatpush3.bf16.msra.mxu0 %v1782_v10 }
 0x4de   :  { %1500 = vmatprep.subr.bf16.mxu0 %v1596_v56 }
 0x4e1   :  { %1502 = vmatpush3.bf16.msra.mxu0 %v1861_v24 }
 0x4e2   :  { %1380 = vmatprep.subr.mxu0 %v1598_v57 }
 0x4f1   :  { %v819_v19 = vpop.f32.mrb[6].mxu1 }
 0x4f2   :  { %v823_v41 = vmul.f32 0.015625, %v819_v19  ;;  %v1360_v2 = vpop.f32.mrb[7].mxu1 }
 0x4f4   :  { %1378 = vmatmul.mubr.msk.f32.vlgmr.msra.gmra.mrb[4].mxu0 %vm43_vm0, %v823_v41 }
 0x4f5   :  { %1381 = vmatpush3.msk.msra.mxu0 %vm364_vm3, %v1931_v26  ;;  %1382 = vmatprep.mubr.msk.f32.mxu0 %vm1597_vm1, %v1598_v57 }
 0x4f6   :  { %1503 = vmatprep.subr.bf16.mxu0 %v1596_v56 }
 0x5a7   :  { %v596_v7 = vpop.f32.mrb[2].mxu0 }
 0x5a8   :  { %v1341_v10 = vpop.f32.mrb[3].mxu0 }
 0x5c7   :  { %v893_v12 = vpop.f32.mrb[4].mxu0 }
 0x5c8   :  { %v894_v24 = vadd.f32 %v893_v12, %v1939_v27  ;;  %v1379_v39 = vpop.f32.mrb[5].mxu0 }
 0x5ca   :  { %v897_v38 = vmax.f32 %v894_v24, 0.0 }
 0x5cc   :  { %1383 = vmatmul.mubr.msk.f32.vlgmr.msra.gmra.mrb[6].mxu0 %vm360_vm4, %v897_v38 }
 0x5cd   :  { %1505 = vmatpush3.bf16.msra.mxu0 %v1999_v50  ;;  %1401 = vmatprep.mubr.msk.f32.mxu0 %vm1597_vm1, %v1598_v57 }
 0x5ce   :  { %1506 = vmatprep.subr.bf16.mxu0 %v1596_v56 }
 0x5d1   :  { %1508 = vmatpush3.bf16.msra.mxu0 %v1480_v62 }
 0x5d2   :  { %1509 = vmatprep.subr.bf16.mxu0 %v1596_v56 }
 0x5d5   :  { %1511 = vmatpush3.bf16.msra.mxu0 %v1484_v1 }
 0x5d6   :  { %1512 = vmatprep.subr.bf16.mxu0 %v1596_v56  ;;  %v526_v56 = vld [vmem:[%s2099_s8] sm:$0x1] }
 0x5d7   :  { %v597_v32 = vadd.f32 %v596_v7, %v526_v56 }
 0x5d9   :  { %1514 = vmatpush3.bf16.msra.mxu0 %v1488_v11 }
 0x69f   :  { %v967_v26 = vpop.f32.mrb[6].mxu0 }
 0x6a0   :  { %v968_v27 = vadd.f32 %v967_v26, %v1986_v51  ;;  %v1384_v13 = vpop.f32.mrb[7].mxu0 }
 0x6a2   :  { %v1182_v14 = vmul.f32 -1.442695, %v968_v27 }
 0x6a4   :  { %1568 = vpow2.f32 %v1182_v14 }
 0x6ae   :  { %v1569_v17 = vpop.eup %1568 }
 0x6af   :  { %v974_v18 = vadd.f32 1.0, %v1569_v17 }
 0x6b1   :  { %1570 = vrcp.f32 %v974_v18 }
 0x6bb   :  { %v1571_v22 = vpop.eup %1570 }
 0x6bc   :  { %1402 = vmatmul.mubr.msk.f32.vlgmr.msra.gmra.mrb[8].mxu0 %vm43_vm0, %v1571_v22 }
 0x78f   :  { %v1046_v57 = vpop.f32.mrb[8].mxu0 }
 0x790   :  { %v1050_v23 = vmul.f32 0.015625, %v1046_v57  ;;  %v1403_v25 = vpop.f32.mrb[9].mxu0 }
 0x792   :  { %1421 = vmatmul.mubr.msk.f32.vlgmr.msra.gmra.mrb[8].mxu1 %vm43_vm0, %v1050_v23 }
 0x865   :  { %v1120_v30 = vpop.f32.mrb[8].mxu1 }
 0x866   :  { %v1121_v51 = vadd.f32 %v1120_v30, %v526_v56  ;;  %v1422_v31 = vpop.f32.mrb[9].mxu1 }
 0x868   :  { %v1125_v33 = vrot.slane %v1121_v51, 7 }
 0x86a   :  { %v1128_v60 = vsel %vm1127_vm5, %v597_v32, %v1125_v33 }
 0x86b   :  { %1130 = vst.msk [vmem:[#allocation2] sm:$0x3] %vm1129_vm6, %v1128_v60 }
 0x86c   :  { %1583 = shalt.err (!%p1580_p4)
}
 0x86d   :  { %s1584_s15 = scalar_lea.hbm %s2100_s9, 32 }
 0x86e   :  { %p1585_p5 = scmp.ne.s32.totalorder %s2100_s9, %s1584_s15  ;;  %p1588_p6 = scmp.lt.u32.totalorder %s1584_s15, %s2100_s9 }
 0x870   :  { %p1590_p7 = pnand %p1588_p6, %p1585_p5 }
 0x872   :  { %1593 = shalt.err (!%p1590_p7)
}
 0x873   :  { %1140 = dma.vmem_to_hbm [thread:$0]  %s1138_s13, 32, %s2100_s9, [#allocation3]  }
 0x874   :  { %1594 = dma.done.wait [#allocation3], 32  }
 0x875   :  { %1595 = vsyncadd [#allocation3], 4294967264 }
 0x876   :  { %1144 = vsyncpa [#allocation3], 1 }

// kernel: secct_forward.5
= control target key start
LH: loop header
LB: loop body
LE: loop exit
PB: predicated region body
PF: predicated region fallthrough
CT: control target
= control target key end

     0   :  { %s3373_s21 = smov 0   ;;  %s4236_s0 = inlined_call_operand.vmem [shape: f32[2,64,64], index: 0, kind: input, shape index: {}]   ;;  %s4237_s1 = inlined_call_operand.vmem [shape: f32[1,64], index: 1, kind: input, shape index: {}]   ;;  %s4238_s2 = inlined_call_operand.vmem [shape: f32[1,64], index: 2, kind: input, shape index: {}]   ;;  %s4239_s3 = inlined_call_operand.vmem [shape: bf16[64,192], index: 3, kind: input, shape index: {}]   ;;  %s4240_s4 = inlined_call_operand.vmem [shape: bf16[64,64], index: 4, kind: input, shape index: {}]   ;;  %s4241_s5 = inlined_call_operand.vmem [shape: f32[1,64], index: 5, kind: input, shape index: {}]   ;;  %s4242_s6 = inlined_call_operand.vmem [shape: f32[1,64], index: 6, kind: input, shape index: {}]   ;;  %s4243_s7 = inlined_call_operand.vmem [shape: f32[1,64], index: 7, kind: input, shape index: {}]   ;;  %s4244_s8 = inlined_call_operand.vmem [shape: bf16[64,128], index: 8, kind: input, shape index: {}]   ;;  %s4245_s9 = inlined_call_operand.vmem [shape: f32[1,128], index: 9, kind: input, shape index: {}]   ;;  %s4246_s10 = inlined_call_operand.vmem [shape: bf16[128,64], index: 10, kind: input, shape index: {}]   ;;  %s4247_s11 = inlined_call_operand.vmem [shape: f32[1,64], index: 11, kind: input, shape index: {}]   ;;  %s4248_s12 = inlined_call_operand.vmem [shape: f32[2,64,64], index: 12, kind: output, shape index: {}]  }
   0x1 LB: > { %s2624_s22 = sadd.s32 4294967295, %s3298_s21   ;;  %p2628_p0 = scmp.ge.s32.totalorder %s3298_s21, 1  ;;  %s3298_s21 = sphi %s3373_s21, %s22_s21  }
   0x2   : > { %p362_p1 = scmp.lt.s32.totalorder %s3298_s21, 3 }
   0x4   : > { %p363_p2 = pnand %p2628_p0, %p362_p1 }
   0x5   : > { %p404_p3 = scmp.lt.s32.totalorder (!%p363_p2), %s2624_s22, 1  ;;  %vm425_vm0 = vcmask (!%p363_p2), 523264   ;;  %v3080_v56 = vld [vmem:[%s4239_s3 + $0x4] ss:$8 sps:$4 sm:$0xff] (!%p363_p2)   ;;  %v3082_v57 = vld [vmem:[%s4239_s3] ss:$8 sps:$4 sm:$0xff] (!%p363_p2)  }
   0x6   : > { %366 = sbr.rel (%p363_p2) target bundleno = 3897 (0xf39), region = 68  ;;  %623 = vmatprep.subr.bf16.mxu1 (!%p363_p2), %v3080_v56  ;;  %v3083_v58 = vld [vmem:[%s4239_s3 + $0x14] ss:$8 sps:$4 sm:$0xff] (!%p363_p2)   ;;  %v3085_v59 = vld [vmem:[%s4239_s3 + $0x10] ss:$8 sps:$4 sm:$0xff] (!%p363_p2)   ;;  %vm712_vm1 = vcmask (!%p363_p2), 130048  }
   0x7   : > { %624 = vmatpush1.bf16.msra.mxu1 (!%p363_p2), %v3082_v57  ;;  %v3086_v60 = vld [vmem:[%s4239_s3 + $0x24] ss:$8 sps:$4 sm:$0xff] (!%p363_p2)   ;;  %v3088_v61 = vld [vmem:[%s4239_s3 + $0x20] ss:$8 sps:$4 sm:$0xff] (!%p363_p2)   ;;  %v3089_v62 = vld [vmem:[%s4239_s3 + $0x34] ss:$8 sps:$4 sm:$0xff] (!%p363_p2)  }
   0x8   : > { %625 = vmatprep.subr.bf16.mxu1 (!%p363_p2), %v3083_v58  ;;  %v3091_v63 = vld [vmem:[%s4239_s3 + $0x30] ss:$8 sps:$4 sm:$0xff] (!%p363_p2)   ;;  %s3301_s15 = smov (!%p363_p2), 64   ;;  %s3302_s16 = smov (!%p363_p2), 48   ;;  %vm1973_vm2 = vcmask (!%p363_p2), 261120   ;;  %vm1982_vm3 = vcmask (!%p363_p2), 392192  }
   0x9   : > { %s3303_s17 = smov (!%p363_p2), 112   ;;  %s3304_s18 = smov (!%p363_p2), 32  }
   0xa   : > { %s3305_s19 = smov (!%p363_p2), 96   ;;  %s3306_s20 = smov (!%p363_p2), 16  }
   0xb   : > { %626 = vmatpush1.bf16.msra.mxu1 (!%p363_p2), %v3085_v59  ;;  %s3307_s24 = smov (!%p363_p2), 80  }
   0xc   : > { %627 = vmatprep.subr.bf16.mxu1 (!%p363_p2), %v3086_v60 }
   0xd   : > { %s4250_s22 = smov (!%p404_p3, %s2624_s22), 1 }
   0xe   : > { %s2710_s23 = sshll.u32 %s4250_s22, 6 }
   0xf   : > { %s3389_s26 = scalar_lea.vmem %s4236_s0, %s2710_s23  ;;  %628 = vmatpush1.bf16.msra.mxu1 %v3088_v61 }
  0x10   : > { %v415_v0 = vld [vmem:[%s3389_s26] sm:$0xff]  ;;  %v417_v1 = vld [vmem:[%s3389_s26 + $0x10] sm:$0xff]  ;;  %v416_v2 = vld [vmem:[%s3389_s26 + $0x8] sm:$0xff]  ;;  %629 = vmatprep.subr.bf16.mxu1 %v3089_v62 }
  0x11   : > { %v426_v3 = vsel %vm425_vm0, %v415_v0, 0.0  ;;  %v432_v4 = vsel %vm425_vm0, %v417_v1, 0.0  ;;  %v418_v5 = vld [vmem:[%s3389_s26 + $0x18] sm:$0xff]  ;;  %v419_v6 = vld [vmem:[%s3389_s26 + $0x20] sm:$0xff]  ;;  %v420_v7 = vld [vmem:[%s3389_s26 + $0x28] sm:$0xff]  ;;  %v429_v8 = vsel %vm425_vm0, %v416_v2, 0.0 }
  0x12   : > { %427 = vadd.xlane.f32.xlu0 %v426_v3  ;;  %433 = vadd.xlane.f32.xlu1 %v432_v4  ;;  %v435_v9 = vsel %vm425_vm0, %v418_v5, 0.0  ;;  %v438_v10 = vsel %vm425_vm0, %v419_v6, 0.0  ;;  %v441_v11 = vsel %vm425_vm0, %v420_v7, 0.0  ;;  %v421_v12 = vld [vmem:[%s3389_s26 + $0x30] sm:$0xff]  ;;  %v422_v13 = vld [vmem:[%s3389_s26 + $0x38] sm:$0xff] }
  0x13   : > { %v444_v14 = vsel %vm425_vm0, %v421_v12, 0.0  ;;  %v447_v15 = vsel %vm425_vm0, %v422_v13, 0.0  ;;  %630 = vmatpush1.bf16.msra.mxu1 %v3091_v63 }
  0x16   : > { %430 = vadd.xlane.f32.xlu0 %v429_v8  ;;  %436 = vadd.xlane.f32.xlu1 %v435_v9 }
  0x1a   : > { %439 = vadd.xlane.f32.xlu0 %v438_v10  ;;  %442 = vadd.xlane.f32.xlu1 %v441_v11 }
  0x1e   : > { %445 = vadd.xlane.f32.xlu0 %v444_v14  ;;  %448 = vadd.xlane.f32.xlu1 %v447_v15 }
  0x9f   : > { %v428_v16 = vpop.xlane.xlu0 %427  ;;  %v434_v17 = vpop.xlane.xlu1 %433 }
  0xa0   : > { %v451_v18 = vmul.f32 0.015625, %v428_v16  ;;  %v453_v19 = vmul.f32 0.015625, %v434_v17 }
  0xa2   : > { %v3407_v20 = vsub.f32 %v415_v0, %v451_v18  ;;  %v3409_v21 = vsub.f32 %v417_v1, %v453_v19  ;;  %v3300_v0 = vmov 0  }
  0xa3   : > { %v431_v22 = vpop.xlane.xlu0 %430  ;;  %v437_v23 = vpop.xlane.xlu1 %436  ;;  %655 = vmatprep.mubr.bf16.mxu1 %v3300_v0 }
  0xa4   : > { %v452_v24 = vmul.f32 0.015625, %v431_v22  ;;  %v454_v25 = vmul.f32 0.015625, %v437_v23  ;;  %v467_v26 = vmul.f32 %v3407_v20, %v3407_v20  ;;  %v469_v27 = vmul.f32 %v3409_v21, %v3409_v21 }
  0xa6   : > { %v3415_v28 = vsub.f32 %v416_v2, %v452_v24  ;;  %v3417_v29 = vsub.f32 %v418_v5, %v454_v25  ;;  %v475_v30 = vsel %vm425_vm0, %v467_v26, 0.0  ;;  %v481_v33 = vsel %vm425_vm0, %v469_v27, 0.0  ;;  %v2633_v26 = vld [vmem:[%s4237_s1] ss:$0 sm:$0xff] }
  0xa7   : > { %476 = vadd.xlane.f32.xlu0 %v475_v30  ;;  %v440_v31 = vpop.xlane.xlu0 %439  ;;  %v443_v32 = vpop.xlane.xlu1 %442 }
  0xa8   : > { %v455_v34 = vmul.f32 0.015625, %v440_v31  ;;  %v456_v35 = vmul.f32 0.015625, %v443_v32  ;;  %v468_v36 = vmul.f32 %v3415_v28, %v3415_v28  ;;  %v470_v37 = vmul.f32 %v3417_v29, %v3417_v29 }
  0xaa   : > { %v3425_v38 = vsub.f32 %v419_v6, %v455_v34  ;;  %v3427_v39 = vsub.f32 %v420_v7, %v456_v35  ;;  %v478_v40 = vsel %vm425_vm0, %v468_v36, 0.0  ;;  %v484_v43 = vsel %vm425_vm0, %v470_v37, 0.0  ;;  %v2634_v35 = vld [vmem:[%s4238_s2] ss:$0 sm:$0xff] }
  0xab   : > { %482 = vadd.xlane.f32.xlu0 %v481_v33  ;;  %479 = vadd.xlane.f32.xlu1 %v478_v40  ;;  %v446_v41 = vpop.xlane.xlu0 %445  ;;  %v449_v42 = vpop.xlane.xlu1 %448 }
  0xac   : > { %v457_v44 = vmul.f32 0.015625, %v446_v41  ;;  %v458_v45 = vmul.f32 0.015625, %v449_v42  ;;  %v471_v46 = vmul.f32 %v3425_v38, %v3425_v38  ;;  %v472_v47 = vmul.f32 %v3427_v39, %v3427_v39 }
  0xae   : > { %v3435_v48 = vsub.f32 %v421_v12, %v457_v44  ;;  %v3437_v49 = vsub.f32 %v422_v13, %v458_v45  ;;  %v487_v50 = vsel %vm425_vm0, %v471_v46, 0.0  ;;  %v490_v51 = vsel %vm425_vm0, %v472_v47, 0.0 }
  0xaf   : > { %485 = vadd.xlane.f32.xlu1 %v484_v43  ;;  %488 = vadd.xlane.f32.xlu0 %v487_v50 }
  0xb0   : > { %v473_v52 = vmul.f32 %v3435_v48, %v3435_v48  ;;  %v474_v53 = vmul.f32 %v3437_v49, %v3437_v49 }
  0xb2   : > { %v493_v54 = vsel %vm425_vm0, %v473_v52, 0.0  ;;  %v496_v55 = vsel %vm425_vm0, %v474_v53, 0.0 }
  0xb3   : > { %491 = vadd.xlane.f32.xlu1 %v490_v51  ;;  %494 = vadd.xlane.f32.xlu0 %v493_v54 }
  0xb7   : > { %497 = vadd.xlane.f32.xlu1 %v496_v55 }
 0x134   : > { %v477_v1 = vpop.xlane.xlu0 %476 }
 0x135   : > { %v499_v2 = vmul.f32 0.015625, %v477_v1 }
 0x137   : > { %v507_v3 = vadd.f32 1e-05, %v499_v2 }
 0x138   : > { %v480_v4 = vpop.xlane.xlu1 %479  ;;  %v483_v5 = vpop.xlane.xlu0 %482 }
 0x139   : > { %3108 = vrsqrt.f32 %v507_v3  ;;  %v500_v6 = vmul.f32 0.015625, %v480_v4  ;;  %v501_v7 = vmul.f32 0.015625, %v483_v5 }
 0x13b   : > { %v508_v8 = vadd.f32 1e-05, %v500_v6  ;;  %v509_v9 = vadd.f32 1e-05, %v501_v7 }
 0x13c   : > { %v486_v10 = vpop.xlane.xlu1 %485  ;;  %v489_v11 = vpop.xlane.xlu0 %488 }
 0x13d   : > { %3110 = vrsqrt.f32 %v508_v8  ;;  %v502_v12 = vmul.f32 0.015625, %v486_v10  ;;  %v503_v14 = vmul.f32 0.015625, %v489_v11 }
 0x13e   : > { %3112 = vrsqrt.f32 %v509_v9 }
 0x13f   : > { %v510_v13 = vadd.f32 1e-05, %v502_v12  ;;  %v511_v18 = vadd.f32 1e-05, %v503_v14 }
 0x140   : > { %v492_v15 = vpop.xlane.xlu1 %491  ;;  %v495_v22 = vpop.xlane.xlu0 %494 }
 0x141   : > { %3114 = vrsqrt.f32 %v510_v13  ;;  %v504_v16 = vmul.f32 0.015625, %v492_v15  ;;  %v505_v30 = vmul.f32 0.015625, %v495_v22 }
 0x143   : > { %v3109_v17 = vpop.eup %3108  ;;  %v512_v19 = vadd.f32 1e-05, %v504_v16  ;;  %v513_v37 = vadd.f32 1e-05, %v505_v30 }
 0x144   : > { %v498_v23 = vpop.xlane.xlu1 %497  ;;  %v523_v24 = vmul.f32 %v3109_v17, %v3407_v20 }
 0x145   : > { %3116 = vrsqrt.f32 %v512_v19  ;;  %v506_v25 = vmul.f32 0.015625, %v498_v23 }
 0x146   : > { %3118 = vrsqrt.f32 %v511_v18  ;;  %v537_v32 = vmul.f32 %v2633_v26, %v523_v24 }
 0x147   : > { %v3111_v27 = vpop.eup %3110  ;;  %v514_v34 = vadd.f32 1e-05, %v506_v25 }
 0x148   : > { %v524_v31 = vmul.f32 %v3111_v27, %v3415_v28  ;;  %v3113_v33 = vpop.eup %3112  ;;  %v551_v40 = vadd.f32 %v2634_v35, %v537_v32 }
 0x149   : > { %v525_v42 = vmul.f32 %v3113_v33, %v3409_v21  ;;  %3120 = vrsqrt.f32 %v514_v34 }
 0x14a   : > { %v538_v36 = vmul.f32 %v2633_v26, %v524_v31  ;;  %3122 = vrsqrt.f32 %v513_v37 }
 0x14b   : > { %v3115_v20 = vpop.eup %3114  ;;  %v539_v46 = vmul.f32 %v2633_v26, %v525_v42 }
 0x14c   : > { %v552_v41 = vadd.f32 %v2634_v35, %v538_v36  ;;  %v526_v43 = vmul.f32 %v3115_v20, %v3417_v29 }
 0x14d   : > { %v553_v52 = vadd.f32 %v2634_v35, %v539_v46 }
 0x14e   : > { %v559_v44 = vpack.c.bf16 %v552_v41, %v551_v40  ;;  %v540_v45 = vmul.f32 %v2633_v26, %v526_v43 }
 0x14f   : > { %v3117_v28 = vpop.eup %3116 }
 0x150   : > { %2643 = vmatmul.mubr.msk.bf16.vlgmr.msra.gmra.mrb[0].mxu1 %vm425_vm0, %v559_v44  ;;  %v3119_v47 = vpop.eup %3118  ;;  %v554_v50 = vadd.f32 %v2634_v35, %v540_v45  ;;  %v528_v51 = vmul.f32 %v3117_v28, %v3427_v39 }
 0x151   : > { %665 = vmatprep.mubr.bf16.mxu1 %v3300_v0  ;;  %v527_v53 = vmul.f32 %v3119_v47, %v3425_v38 }
 0x152   : > { %v560_v21 = vpack.c.bf16 %v554_v50, %v553_v52  ;;  %v542_v54 = vmul.f32 %v2633_v26, %v528_v51 }
 0x153   : > { %v3121_v29 = vpop.eup %3120  ;;  %v541_v55 = vmul.f32 %v2633_v26, %v527_v53 }
 0x154   : > { %v3123_v56 = vpop.eup %3122  ;;  %v556_v57 = vadd.f32 %v2634_v35, %v542_v54  ;;  %v530_v58 = vmul.f32 %v3121_v29, %v3437_v49 }
 0x155   : > { %v555_v59 = vadd.f32 %v2634_v35, %v541_v55  ;;  %v529_v60 = vmul.f32 %v3123_v56, %v3435_v48 }
 0x156   : > { %v544_v39 = vmul.f32 %v2633_v26, %v530_v58 }
 0x157   : > { %v561_v61 = vpack.c.bf16 %v556_v57, %v555_v59  ;;  %v543_v38 = vmul.f32 %v2633_v26, %v529_v60 }
 0x158   : > { %2644 = vmatmul.mubr.msk.bf16.gmra.mrb[4].mxu1 %vm425_vm0, %v560_v21  ;;  %v558_v62 = vadd.f32 %v2634_v35, %v544_v39 }
 0x159   : > { %675 = vmatprep.mubr.bf16.mxu1 %v3300_v0  ;;  %v557_v63 = vadd.f32 %v2634_v35, %v543_v38 }
 0x15b   : > { %v562_v1 = vpack.c.bf16 %v558_v62, %v557_v63 }
 0x160   : > { %2645 = vmatmul.mubr.msk.bf16.gmra.mrb[8].mxu1 %vm425_vm0, %v561_v61 }
 0x161   : > { %685 = vmatprep.mubr.bf16.mxu1 %v3300_v0 }
 0x168   : > { %2646 = vmatmul.mubr.msk.bf16.gmra.mrb[12].mxu1 %vm425_vm0, %v562_v1 }
 0x223   : > { %v657_v2 = vpop.f32.mrb[0].mxu1 }
 0x224   : > { %v659_v3 = vpop.f32.mrb[1].mxu1 }
 0x225   : > { %v661_v4 = vpop.f32.mrb[2].mxu1 }
 0x226   : > { %v3493_v49 = vpack.c.bf16 %v661_v4, %v657_v2  ;;  %v663_v5 = vpop.f32.mrb[3].mxu1 }
 0x227   : > { %v3495_v48 = vpack.c.bf16 %v663_v5, %v659_v3 }
 0x228   : > { %704 = vrot.lane.b32.xlu0 %v3493_v49, %s3301_s15  ;;  %2812 = vmatprep.mubr.msk.bf16.mxu1 %vm712_vm1, %v3493_v49 }
 0x229   : > { %2820 = vmatprep.subr.bf16.mxu0 %v3495_v48 }
 0x22a   : > { %2821 = vmatpush3.bf16.msra.mxu0 %v3495_v48 }
 0x22b   : > { %v667_v0 = vpop.f32.mrb[4].mxu1 }
 0x22c   : > { %991 = vrot.lane.b32.xlu0 %v3493_v49, %s3302_s16  ;;  %v669_v6 = vpop.f32.mrb[5].mxu1 }
 0x22d   : > { %v671_v7 = vpop.f32.mrb[6].mxu1 }
 0x22e   : > { %v3505_v8 = vpack.c.bf16 %v671_v7, %v667_v0  ;;  %v673_v9 = vpop.f32.mrb[7].mxu1 }
 0x22f   : > { %v3507_v10 = vpack.c.bf16 %v673_v9, %v669_v6 }
 0x230   : > { %706 = vrot.lane.b32.xlu1 %v3505_v8, %s3301_s15 }
 0x231   : > { %2822 = vmatprep.subr.bf16.mxu0 %v3507_v10 }
 0x232   : > { %2823 = vmatpush3.bf16.msra.mxu0 %v3507_v10 }
 0x233   : > { %v677_v11 = vpop.f32.mrb[8].mxu1 }
 0x234   : > { %v679_v12 = vpop.f32.mrb[9].mxu1 }
 0x235   : > { %v681_v13 = vpop.f32.mrb[10].mxu1 }
 0x236   : > { %v3513_v14 = vpack.c.bf16 %v681_v13, %v677_v11  ;;  %v683_v15 = vpop.f32.mrb[11].mxu1 }
 0x237   : > { %v3515_v16 = vpack.c.bf16 %v683_v15, %v679_v12 }
 0x238   : > { %995 = vrot.lane.b32.xlu0 %v3513_v14, %s3302_s16  ;;  %708 = vrot.lane.b32.xlu1 %v3513_v14, %s3301_s15 }
 0x239   : > { %2824 = vmatprep.subr.bf16.mxu0 %v3515_v16 }
 0x23a   : > { %2825 = vmatpush3.bf16.msra.mxu0 %v3515_v16 }
 0x23b   : > { %v687_v17 = vpop.f32.mrb[12].mxu1 }
 0x23c   : > { %983 = vrot.lane.b32.xlu0 %v3493_v49, %s3303_s17  ;;  %v689_v18 = vpop.f32.mrb[13].mxu1 }
 0x23d   : > { %v691_v19 = vpop.f32.mrb[14].mxu1 }
 0x23e   : > { %v3525_v22 = vpack.c.bf16 %v691_v19, %v687_v17  ;;  %v693_v23 = vpop.f32.mrb[15].mxu1 }
 0x23f   : > { %v3527_v24 = vpack.c.bf16 %v693_v23, %v689_v18 }
 0x240   : > { %987 = vrot.lane.b32.xlu0 %v3513_v14, %s3303_s17  ;;  %710 = vrot.lane.b32.xlu1 %v3525_v22, %s3301_s15 }
 0x241   : > { %2826 = vmatprep.subr.bf16.mxu0 %v3527_v24 }
 0x242   : > { %2827 = vmatpush3.bf16.msra.mxu0 %v3527_v24 }
 0x244   : > { %993 = vrot.lane.b32.xlu1 %v3505_v8, %s3302_s16 }
 0x248   : > { %997 = vrot.lane.b32.xlu1 %v3525_v22, %s3302_s16 }
 0x24c   : > { %985 = vrot.lane.b32.xlu1 %v3505_v8, %s3303_s17 }
 0x250   : > { %989 = vrot.lane.b32.xlu1 %v3525_v22, %s3303_s17 }
 0x29a   : > { %v705_v25 = vpop.permute.xlu0 %704 }
 0x29b   : > { %2988 = vmatprep.subr.msk.bf16.mxu1 %vm712_vm1, %v705_v25  ;;  %v726_v26 = vsel %vm712_vm1, %v705_v25, 0 }
 0x29c   : > { %2805 = vmatpush3.bf16.xpose.msra.mxu1 %v726_v26 }
 0x29e   : > { %v992_v35 = vpop.permute.xlu0 %991 }
 0x29f   : > { %v1012_v36 = vsel %vm712_vm1, %v992_v35, 0 }
 0x2a2   : > { %v707_v27 = vpop.permute.xlu1 %706 }
 0x2a3   : > { %2989 = vmatprep.subr.msk.bf16.mxu1 %vm712_vm1, %v707_v27  ;;  %v729_v30 = vsel %vm712_vm1, %v707_v27, 0 }
 0x2a4   : > { %2807 = vmatpush3.bf16.xpose.msra.mxu1 %v729_v30 }
 0x2aa   : > { %v709_v31 = vpop.permute.xlu1 %708  ;;  %v996_v37 = vpop.permute.xlu0 %995 }
 0x2ab   : > { %2990 = vmatprep.subr.msk.bf16.mxu1 %vm712_vm1, %v709_v31  ;;  %v732_v32 = vsel %vm712_vm1, %v709_v31, 0  ;;  %v1018_v42 = vsel %vm712_vm1, %v996_v37, 0 }
 0x2ac   : > { %2809 = vmatpush3.bf16.xpose.msra.mxu1 %v732_v32 }
 0x2ae   : > { %v984_v40 = vpop.permute.xlu0 %983 }
 0x2b2   : > { %v711_v33 = vpop.permute.xlu1 %710  ;;  %v988_v28 = vpop.permute.xlu0 %987 }
 0x2b3   : > { %2991 = vmatprep.subr.msk.bf16.mxu1 %vm712_vm1, %v711_v33  ;;  %v735_v34 = vsel %vm712_vm1, %v711_v33, 0 }
 0x2b4   : > { %2811 = vmatpush3.bf16.xpose.msra.mxu1 %v735_v34 }
 0x2b5   : > { %2992 = vmatprep.subr.msk.bf16.mxu1 %vm712_vm1, %v992_v35 }
 0x2b6   : > { %v994_v20 = vpop.permute.xlu1 %993 }
 0x2b7   : > { %v1015_v41 = vsel %vm712_vm1, %v994_v20, 0 }
 0x2ba   : > { %v998_v43 = vpop.permute.xlu1 %997 }
 0x2bb   : > { %2813 = vmatmul.mubr.msk.bf16.vlgmr.msra.gmra.mrb[16].mxu1 %vm712_vm1, %v3505_v8  ;;  %v1021_v44 = vsel %vm712_vm1, %v998_v43, 0 }
 0x2bc   : > { %2816 = vmatprep.mubr.msk.bf16.mxu1 %vm712_vm1, %v3513_v14  ;;  %2837 = vmatpush3.bf16.xpose.msra.mxu1 %v1012_v36 }
 0x2bd   : > { %2993 = vmatprep.subr.msk.bf16.mxu1 %vm712_vm1, %v994_v20 }
 0x2be   : > { %v986_v45 = vpop.permute.xlu1 %985 }
 0x2c2   : > { %v990_v46 = vpop.permute.xlu1 %989 }
 0x2c3   : > { %2817 = vmatmul.mubr.msk.bf16.gmra.mrb[20].mxu1 %vm712_vm1, %v3525_v22 }
 0x2c4   : > { %2839 = vmatpush3.bf16.xpose.msra.mxu1 %v1015_v41  ;;  %2844 = vmatprep.mubr.msk.bf16.mxu1 %vm712_vm1, %v984_v40 }
 0x2c5   : > { %2994 = vmatprep.subr.msk.bf16.mxu1 %vm712_vm1, %v996_v37 }
 0x2cc   : > { %2841 = vmatpush3.bf16.xpose.msra.mxu1 %v1018_v42 }
 0x2cd   : > { %2995 = vmatprep.subr.msk.bf16.mxu1 %vm712_vm1, %v998_v43 }
 0x2d4   : > { %2843 = vmatpush3.bf16.xpose.msra.mxu1 %v1021_v44 }
 0x2db   : > { %2845 = vmatmul.mubr.msk.bf16.vlgmr.msra.gmra.mrb[24].mxu1 %vm712_vm1, %v986_v45 }
 0x2dc   : > { %2848 = vmatprep.mubr.msk.bf16.mxu1 %vm712_vm1, %v988_v28 }
 0x2e3   : > { %2849 = vmatmul.mubr.msk.bf16.gmra.mrb[28].mxu1 %vm712_vm1, %v990_v46 }
 0x38e   : > { %v2814_v47 = vpop.f32.mrb[16].mxu1 }
 0x38f   : > { %v3569_v50 = vmul.f32 0.25, %v2814_v47  ;;  %v771_v51 = vpop.f32.mrb[17].mxu1 }
 0x390   : > { %v2815_v52 = vpop.f32.mrb[18].mxu1  ;;  %v3571_v53 = vmul.f32 0.25, %v771_v51 }
 0x391   : > { %v774_v21 = vpop.f32.mrb[19].mxu1  ;;  %v816_v54 = vsel %vm425_vm0, %v3569_v50, -inf  ;;  %v3579_v56 = vmul.f32 0.25, %v2815_v52 }
 0x392   : > { %v3575_v29 = vmul.f32 0.25, %v774_v21  ;;  %817 = vmax.xlane.f32.xlu0 %v816_v54  ;;  %v810_v57 = vsel %vm425_vm0, %v3571_v53, -inf }
 0x393   : > { %v819_v62 = vsel %vm425_vm0, %v3579_v56, -inf }
 0x394   : > { %v813_v55 = vsel %vm425_vm0, %v3575_v29, -inf }
 0x395   : > { %814 = vmax.xlane.f32.xlu1 %v813_v55 }
 0x396   : > { %811 = vmax.xlane.f32.xlu0 %v810_v57  ;;  %v2818_v58 = vpop.f32.mrb[20].mxu1 }
 0x397   : > { %v787_v59 = vpop.f32.mrb[21].mxu1  ;;  %v3583_v61 = vmul.f32 0.25, %v2818_v58 }
 0x398   : > { %v2819_v60 = vpop.f32.mrb[22].mxu1  ;;  %v3593_v2 = vmul.f32 0.25, %v787_v59 }
 0x399   : > { %v3585_v39 = vmul.f32 0.25, %v2819_v60  ;;  %v790_v38 = vpop.f32.mrb[23].mxu1  ;;  %v828_v3 = vsel %vm425_vm0, %v3583_v61, -inf }
 0x39a   : > { %820 = vmax.xlane.f32.xlu0 %v819_v62  ;;  %v3589_v63 = vmul.f32 0.25, %v790_v38  ;;  %v822_v5 = vsel %vm425_vm0, %v3593_v2, -inf }
 0x39b   : > { %v831_v1 = vsel %vm425_vm0, %v3585_v39, -inf }
 0x39c   : > { %832 = vmax.xlane.f32.xlu1 %v831_v1  ;;  %v825_v4 = vsel %vm425_vm0, %v3589_v63, -inf }
 0x39e   : > { %829 = vmax.xlane.f32.xlu0 %v828_v3 }
 0x3a0   : > { %826 = vmax.xlane.f32.xlu1 %v825_v4 }
 0x3a2   : > { %823 = vmax.xlane.f32.xlu0 %v822_v5 }
 0x3ae   : > { %v2846_v0 = vpop.f32.mrb[24].mxu1 }
 0x3af   : > { %v3601_v6 = vmul.f32 0.25, %v2846_v0  ;;  %v1057_v7 = vpop.f32.mrb[25].mxu1 }
 0x3b0   : > { %v2847_v9 = vpop.f32.mrb[26].mxu1  ;;  %v3603_v11 = vmul.f32 0.25, %v1057_v7 }
 0x3b1   : > { %v3605_v12 = vmul.f32 0.25, %v2847_v9  ;;  %v1060_v13 = vpop.f32.mrb[27].mxu1  ;;  %v1102_v15 = vsel %vm425_vm0, %v3601_v6, -inf }
 0x3b2   : > { %1103 = vmax.xlane.f32.xlu0 %v1102_v15  ;;  %v3609_v17 = vmul.f32 0.25, %v1060_v13  ;;  %v1096_v19 = vsel %vm425_vm0, %v3603_v11, -inf }
 0x3b3   : > { %v1105_v18 = vsel %vm425_vm0, %v3605_v12, -inf }
 0x3b4   : > { %1106 = vmax.xlane.f32.xlu1 %v1105_v18  ;;  %v1099_v27 = vsel %vm425_vm0, %v3609_v17, -inf }
 0x3b6   : > { %1097 = vmax.xlane.f32.xlu0 %v1096_v19  ;;  %v2850_v23 = vpop.f32.mrb[28].mxu1 }
 0x3b7   : > { %v3615_v25 = vmul.f32 0.25, %v2850_v23  ;;  %v1073_v26 = vpop.f32.mrb[29].mxu1 }
 0x3b8   : > { %1100 = vmax.xlane.f32.xlu1 %v1099_v27  ;;  %v2851_v30 = vpop.f32.mrb[30].mxu1  ;;  %v3619_v31 = vmul.f32 0.25, %v1073_v26 }
 0x3b9   : > { %v1076_v32 = vpop.f32.mrb[31].mxu1  ;;  %v1114_v33 = vsel %vm425_vm0, %v3615_v25, -inf  ;;  %v3631_v35 = vmul.f32 0.25, %v2851_v30 }
 0x3ba   : > { %1115 = vmax.xlane.f32.xlu0 %v1114_v33  ;;  %v1108_v34 = vsel %vm425_vm0, %v3619_v31, -inf  ;;  %v3633_v36 = vmul.f32 0.25, %v1076_v32 }
 0x3bb   : > { %v1117_v20 = vsel %vm425_vm0, %v3631_v35, -inf }
 0x3bc   : > { %v1111_v37 = vsel %vm425_vm0, %v3633_v36, -inf }
 0x3be   : > { %1109 = vmax.xlane.f32.xlu0 %v1108_v34 }
 0x3c9   : > { %1194 = vrot.lane.b32.xlu1 %v3507_v10, %s3303_s17 }
 0x3cd   : > { %1196 = vrot.lane.b32.xlu1 %v3515_v16, %s3303_s17 }
 0x3d4   : > { %1192 = vrot.lane.b32.xlu0 %v3495_v48, %s3303_s17 }
 0x3f1   : > { %1118 = vmax.xlane.f32.xlu1 %v1117_v20 }
 0x3f5   : > { %1112 = vmax.xlane.f32.xlu1 %v1111_v37 }
 0x406   : > { %1198 = vrot.lane.b32.xlu1 %v3527_v24, %s3303_s17 }
 0x41f   : > { %v818_v40 = vpop.xlane.xlu0 %817 }
 0x420   : > { %v836_v41 = vsub.f32 %v3569_v50, %v818_v40 }
 0x422   : > { %v846_v42 = vmul.f32 1.442695, %v836_v41  ;;  %v815_v43 = vpop.xlane.xlu1 %814 }
 0x423   : > { %v812_v44 = vpop.xlane.xlu0 %811  ;;  %v835_v28 = vsub.f32 %v3575_v29, %v815_v43 }
 0x424   : > { %3124 = vpow2.f32 %v846_v42  ;;  %v834_v45 = vsub.f32 %v3571_v53, %v812_v44 }
 0x425   : > { %v844_v21 = vmul.f32 1.442695, %v835_v28 }
 0x426   : > { %v842_v46 = vmul.f32 1.442695, %v834_v45 }
 0x427   : > { %v821_v47 = vpop.xlane.xlu0 %820 }
 0x428   : > { %3126 = vpow2.f32 %v842_v46  ;;  %v837_v51 = vsub.f32 %v3579_v56, %v821_v47 }
 0x429   : > { %v833_v52 = vpop.xlane.xlu1 %832 }
 0x42a   : > { %v848_v54 = vmul.f32 1.442695, %v837_v51  ;;  %v841_v55 = vsub.f32 %v3585_v39, %v833_v52 }
 0x42b   : > { %v830_v57 = vpop.xlane.xlu0 %829 }
 0x42c   : > { %3128 = vpow2.f32 %v848_v54  ;;  %v840_v50 = vsub.f32 %v3583_v61, %v830_v57  ;;  %v856_v53 = vmul.f32 1.442695, %v841_v55 }
 0x42d   : > { %v827_v58 = vpop.xlane.xlu1 %826  ;;  %3130 = vpow2.f32 %v844_v21 }
 0x42e   : > { %v3647_v59 = vpop.eup %3124  ;;  %v854_v29 = vmul.f32 1.442695, %v840_v50  ;;  %v839_v60 = vsub.f32 %v3589_v63, %v827_v58 }
 0x42f   : > { %v824_v38 = vpop.xlane.xlu0 %823  ;;  %v864_v56 = vsel %vm425_vm0, %v3647_v59, 0.0 }
 0x430   : > { %3132 = vpow2.f32 %v854_v29  ;;  %v838_v62 = vsub.f32 %v3593_v2, %v824_v38  ;;  %865 = vadd.xlane.f32.xlu0 %v864_v56  ;;  %v852_v61 = vmul.f32 1.442695, %v839_v60 }
 0x431   : > { %3134 = vpow2.f32 %v856_v53 }
 0x432   : > { %v3653_v39 = vpop.eup %3126  ;;  %v850_v1 = vmul.f32 1.442695, %v838_v62 }
 0x433   : > { %v858_v3 = vsel %vm425_vm0, %v3653_v39, 0.0 }
 0x434   : > { %3136 = vpow2.f32 %v850_v1  ;;  %859 = vadd.xlane.f32.xlu0 %v858_v3 }
 0x435   : > { %3138 = vpow2.f32 %v852_v61 }
 0x436   : > { %v3657_v4 = vpop.eup %3128 }
 0x437   : > { %v867_v63 = vsel %vm425_vm0, %v3657_v4, 0.0  ;;  %v3661_v5 = vpop.eup %3130 }
 0x438   : > { %868 = vadd.xlane.f32.xlu1 %v867_v63  ;;  %v861_v0 = vsel %vm425_vm0, %v3661_v5, 0.0 }
 0x43a   : > { %v3663_v2 = vpop.eup %3132 }
 0x43b   : > { %v876_v7 = vsel %vm425_vm0, %v3663_v2, 0.0  ;;  %v3669_v9 = vpop.eup %3134 }
 0x43c   : > { %862 = vadd.xlane.f32.xlu1 %v861_v0  ;;  %877 = vadd.xlane.f32.xlu0 %v876_v7  ;;  %v879_v18 = vsel %vm425_vm0, %v3669_v9, 0.0 }
 0x43e   : > { %v3671_v13 = vpop.eup %3136 }
 0x43f   : > { %v1104_v15 = vpop.xlane.xlu0 %1103  ;;  %v870_v19 = vsel %vm425_vm0, %v3671_v13, 0.0  ;;  %v3677_v23 = vpop.eup %3138 }
 0x440   : > { %v1122_v26 = vsub.f32 %v3601_v6, %v1104_v15  ;;  %880 = vadd.xlane.f32.xlu1 %v879_v18  ;;  %871 = vadd.xlane.f32.xlu0 %v870_v19  ;;  %v873_v34 = vsel %vm425_vm0, %v3677_v23, 0.0 }
 0x441   : > { %v1107_v27 = vpop.xlane.xlu1 %1106 }
 0x442   : > { %v1132_v30 = vmul.f32 1.442695, %v1122_v26  ;;  %v1123_v32 = vsub.f32 %v3605_v12, %v1107_v27 }
 0x443   : > { %v1098_v33 = vpop.xlane.xlu0 %1097 }
 0x444   : > { %3140 = vpow2.f32 %v1132_v30  ;;  %v1134_v20 = vmul.f32 1.442695, %v1123_v32  ;;  %v1120_v37 = vsub.f32 %v3603_v11, %v1098_v33  ;;  %874 = vadd.xlane.f32.xlu1 %v873_v34 }
 0x445   : > { %v1101_v40 = vpop.xlane.xlu1 %1100 }
 0x446   : > { %3142 = vpow2.f32 %v1134_v20  ;;  %v1128_v41 = vmul.f32 1.442695, %v1120_v37  ;;  %v1121_v6 = vsub.f32 %v3609_v17, %v1101_v40 }
 0x447   : > { %v1116_v42 = vpop.xlane.xlu0 %1115 }
 0x448   : > { %3144 = vpow2.f32 %v1128_v41  ;;  %v1130_v43 = vmul.f32 1.442695, %v1121_v6  ;;  %v1126_v44 = vsub.f32 %v3615_v25, %v1116_v42 }
 0x449   : > { %v3718_v53 = vpop.permute.xlu1 %1194 }
 0x44a   : > { %3146 = vpow2.f32 %v1130_v43  ;;  %v1140_v12 = vmul.f32 1.442695, %v1126_v44 }
 0x44b   : > { %v1110_v45 = vpop.xlane.xlu0 %1109 }
 0x44c   : > { %3148 = vpow2.f32 %v1140_v12  ;;  %v1124_v28 = vsub.f32 %v3619_v31, %v1110_v45 }
 0x44d   : > { %v3720_v29 = vpop.permute.xlu1 %1196 }
 0x44e   : > { %v3687_v46 = vpop.eup %3140  ;;  %v1136_v11 = vmul.f32 1.442695, %v1124_v28 }
 0x44f   : > { %v3689_v47 = vpop.permute.xlu0 %1192  ;;  %v1150_v51 = vsel %vm425_vm0, %v3687_v46, 0.0 }
 0x450   : > { %v3693_v17 = vpop.eup %3142  ;;  %3150 = vpow2.f32 %v1136_v11  ;;  %1151 = vadd.xlane.f32.xlu0 %v1150_v51  ;;  %2852 = vmatprep.subr.bf16.mxu0 %v3689_v47 }
 0x451   : > { %v1153_v25 = vsel %vm425_vm0, %v3693_v17, 0.0 }
 0x452   : > { %v3698_v52 = vpop.eup %3144  ;;  %1154 = vadd.xlane.f32.xlu1 %v1153_v25 }
 0x453   : > { %v1144_v31 = vsel %vm425_vm0, %v3698_v52, 0.0 }
 0x454   : > { %v3702_v21 = vpop.eup %3146  ;;  %1145 = vadd.xlane.f32.xlu0 %v1144_v31 }
 0x455   : > { %v1147_v54 = vsel %vm425_vm0, %v3702_v21, 0.0 }
 0x456   : > { %v3706_v55 = vpop.eup %3148  ;;  %1148 = vadd.xlane.f32.xlu1 %v1147_v54 }
 0x457   : > { %v1162_v57 = vsel %vm425_vm0, %v3706_v55, 0.0 }
 0x458   : > { %1163 = vadd.xlane.f32.xlu0 %v1162_v57 }
 0x45a   : > { %v3710_v50 = vpop.eup %3150 }
 0x45b   : > { %v1156_v58 = vsel %vm425_vm0, %v3710_v50, 0.0 }
 0x45c   : > { %1157 = vadd.xlane.f32.xlu0 %v1156_v58 }
 0x467   : > { %1291 = vrot.lane.b32.xlu1 %v3505_v8, %s3304_s18 }
 0x46b   : > { %1293 = vrot.lane.b32.xlu1 %v3513_v14, %s3304_s18 }
 0x47e   : > { %v1119_v60 = vpop.xlane.xlu1 %1118 }
 0x47f   : > { %v1127_v38 = vsub.f32 %v3631_v35, %v1119_v60 }
 0x481   : > { %v1142_v56 = vmul.f32 1.442695, %v1127_v38 }
 0x482   : > { %v1113_v62 = vpop.xlane.xlu1 %1112 }
 0x483   : > { %3152 = vpow2.f32 %v1142_v56  ;;  %v1125_v61 = vsub.f32 %v3633_v36, %v1113_v62 }
 0x485   : > { %v1138_v1 = vmul.f32 1.442695, %v1125_v61 }
 0x486   : > { %v1199_v36 = vpop.permute.xlu1 %1198 }
 0x487   : > { %3154 = vpow2.f32 %v1138_v1 }
 0x48d   : > { %v3724_v3 = vpop.eup %3152 }
 0x48e   : > { %v1165_v63 = vsel %vm425_vm0, %v3724_v3, 0.0 }
 0x48f   : > { %1166 = vadd.xlane.f32.xlu0 %v1165_v63 }
 0x491   : > { %v3728_v0 = vpop.eup %3154 }
 0x492   : > { %v1159_v7 = vsel %vm425_vm0, %v3728_v0, 0.0 }
 0x493   : > { %1160 = vadd.xlane.f32.xlu1 %v1159_v7 }
 0x4a4   : > { %1295 = vrot.lane.b32.xlu1 %v3525_v22, %s3304_s18 }
 0x4a5   : > { %1289 = vrot.lane.b32.xlu0 %v3493_v49, %s3304_s18 }
 0x4a8   : > { %1283 = vrot.lane.b32.xlu1 %v3505_v8, %s3305_s19 }
 0x4a9   : > { %1281 = vrot.lane.b32.xlu0 %v3493_v49, %s3305_s19 }
 0x4ac   : > { %1287 = vrot.lane.b32.xlu1 %v3525_v22, %s3305_s19 }
 0x4ad   : > { %1285 = vrot.lane.b32.xlu0 %v3513_v14, %s3305_s19 }
 0x4bd   : > { %v866_v35 = vpop.xlane.xlu0 %865 }
 0x4c1   : > { %v860_v15 = vpop.xlane.xlu0 %859 }
 0x4c5   : > { %v869_v18 = vpop.xlane.xlu1 %868 }
 0x4c6   : > { %3156 = vrcp.f32 %v869_v18 }
 0x4c7   : > { %3158 = vrcp.f32 %v860_v15 }
 0x4c8   : > { %3160 = vrcp.f32 %v866_v35 }
 0x4c9   : > { %v863_v19 = vpop.xlane.xlu1 %862  ;;  %v878_v26 = vpop.xlane.xlu0 %877 }
 0x4ca   : > { %3162 = vrcp.f32 %v863_v19 }
 0x4cd   : > { %v881_v27 = vpop.xlane.xlu1 %880  ;;  %v872_v30 = vpop.xlane.xlu0 %871 }
 0x4ce   : > { %3164 = vrcp.f32 %v881_v27 }
 0x4cf   : > { %3166 = vrcp.f32 %v872_v30 }
 0x4d0   : > { %v3157_v32 = vpop.eup %3156  ;;  %3168 = vrcp.f32 %v878_v26 }
 0x4d1   : > { %v875_v33 = vpop.xlane.xlu1 %874  ;;  %v3159_v34 = vpop.eup %3158  ;;  %v889_v40 = vmul.f32 %v3157_v32, %v3657_v4 }
 0x4d2   : > { %3170 = vrcp.f32 %v875_v33  ;;  %v3161_v20 = vpop.eup %3160  ;;  %v883_v41 = vmul.f32 %v3159_v34, %v3653_v39 }
 0x4d3   : > { %v887_v42 = vmul.f32 %v3161_v20, %v3647_v59 }
 0x4d4   : > { %v3163_v37 = vpop.eup %3162 }
 0x4d5   : > { %v885_v6 = vmul.f32 %v3163_v37, %v3661_v5  ;;  %v899_v44 = vpack.c.bf16 %v889_v40, %v887_v42 }
 0x4d7   : > { %v898_v43 = vpack.c.bf16 %v885_v6, %v883_v41 }
 0x4d8   : > { %v3165_v12 = vpop.eup %3164 }
 0x4d9   : > { %2828 = vmatprep.mubr.msk.bf16.mxu0 %vm425_vm0, %v898_v43  ;;  %v3167_v45 = vpop.eup %3166  ;;  %v897_v39 = vmul.f32 %v3165_v12, %v3669_v9 }
 0x4da   : > { %2829 = vmatmul.mubr.msk.bf16.vlgmr.msra.gmra.mrb[0].mxu0 %vm425_vm0, %v899_v44  ;;  %v3169_v28 = vpop.eup %3168  ;;  %v891_v5 = vmul.f32 %v3167_v45, %v3671_v13 }
 0x4db   : > { %2853 = vmatpush3.bf16.msra.mxu0 %v3689_v47  ;;  %v895_v51 = vmul.f32 %v3169_v28, %v3663_v2 }
 0x4dc   : > { %v3171_v11 = vpop.eup %3170  ;;  %2854 = vmatprep.subr.bf16.mxu0 %v3718_v53 }
 0x4dd   : > { %v1152_v4 = vpop.xlane.xlu0 %1151  ;;  %v893_v59 = vmul.f32 %v3171_v11, %v3677_v23  ;;  %v901_v54 = vpack.c.bf16 %v897_v39, %v895_v51 }
 0x4df   : > { %2855 = vmatpush3.bf16.msra.mxu0 %v3718_v53  ;;  %v1155_v25 = vpop.xlane.xlu1 %1154  ;;  %v900_v31 = vpack.c.bf16 %v893_v59, %v891_v5 }
 0x4e0   : > { %2856 = vmatprep.subr.bf16.mxu0 %v3720_v29  ;;  %3172 = vrcp.f32 %v1155_v25 }
 0x4e1   : > { %2832 = vmatprep.mubr.msk.bf16.mxu0 %vm425_vm0, %v900_v31  ;;  %v1146_v47 = vpop.xlane.xlu0 %1145 }
 0x4e2   : > { %3174 = vrcp.f32 %v1146_v47  ;;  %2833 = vmatmul.mubr.msk.bf16.gmra.mrb[4].mxu0 %vm425_vm0, %v901_v54 }
 0x4e3   : > { %3176 = vrcp.f32 %v1152_v4  ;;  %2857 = vmatpush3.bf16.msra.mxu0 %v3720_v29  ;;  %v1149_v9 = vpop.xlane.xlu1 %1148 }
 0x4e4   : > { %3178 = vrcp.f32 %v1149_v9  ;;  %2858 = vmatprep.subr.bf16.mxu0 %v1199_v36 }
 0x4e5   : > { %v1164_v29 = vpop.xlane.xlu0 %1163 }
 0x4e7   : > { %2859 = vmatpush3.bf16.msra.mxu0 %v1199_v36  ;;  %v1292_v61 = vpop.permute.xlu1 %1291 }
 0x4e8   : > { %v1313_v36 = vsel %vm712_vm1, %v1292_v61, 0 }
 0x4e9   : > { %v1158_v1 = vpop.xlane.xlu0 %1157 }
 0x4ea   : > { %v3173_v2 = vpop.eup %3172 }
 0x4eb   : > { %v1175_v58 = vmul.f32 %v3173_v2, %v3693_v17  ;;  %v1294_v63 = vpop.permute.xlu1 %1293 }
 0x4ec   : > { %v3175_v13 = vpop.eup %3174  ;;  %v1316_v34 = vsel %vm712_vm1, %v1294_v63, 0 }
 0x4ed   : > { %v3177_v23 = vpop.eup %3176  ;;  %v1169_v53 = vmul.f32 %v3175_v13, %v3698_v52 }
 0x4ee   : > { %v3179_v57 = vpop.eup %3178  ;;  %v1173_v38 = vmul.f32 %v3177_v23, %v3687_v46 }
 0x4ef   : > { %v1171_v60 = vmul.f32 %v3179_v57, %v3702_v21 }
 0x4f0   : > { %v1185_v62 = vpack.c.bf16 %v1175_v58, %v1173_v38 }
 0x4f1   : > { %v1184_v56 = vpack.c.bf16 %v1171_v60, %v1169_v53 }
 0x4f3   : > { %2860 = vmatprep.mubr.msk.bf16.mxu0 %vm425_vm0, %v1184_v56 }
 0x4f4   : > { %2861 = vmatmul.mubr.msk.bf16.vlgmr.msra.gmra.mrb[8].mxu0 %vm425_vm0, %v1185_v62 }
 0x51c   : > { %v1167_v7 = vpop.xlane.xlu0 %1166 }
 0x51d   : > { %3180 = vrcp.f32 %v1167_v7 }
 0x51e   : > { %3182 = vrcp.f32 %v1158_v1 }
 0x51f   : > { %3184 = vrcp.f32 %v1164_v29 }
 0x520   : > { %v1161_v17 = vpop.xlane.xlu1 %1160  ;;  %v1290_v52 = vpop.permute.xlu0 %1289 }
 0x521   : > { %3186 = vrcp.f32 %v1161_v17  ;;  %v1310_v21 = vsel %vm712_vm1, %v1290_v52, 0  ;;  %2996 = vmatprep.subr.msk.bf16.mxu0 %vm712_vm1, %v1290_v52 }
 0x522   : > { %2869 = vmatpush3.bf16.xpose.msra.mxu0 %v1310_v21 }
 0x523   : > { %2997 = vmatprep.subr.msk.bf16.mxu0 %vm712_vm1, %v1292_v61 }
 0x524   : > { %v1282_v20 = vpop.permute.xlu0 %1281  ;;  %v1296_v37 = vpop.permute.xlu1 %1295 }
 0x527   : > { %v3181_v46 = vpop.eup %3180 }
 0x528   : > { %v3183_v35 = vpop.eup %3182  ;;  %v1183_v19 = vmul.f32 %v3181_v46, %v3724_v3  ;;  %v1284_v3 = vpop.permute.xlu1 %1283 }
 0x529   : > { %v3185_v15 = vpop.eup %3184  ;;  %v1177_v26 = vmul.f32 %v3183_v35, %v3710_v50  ;;  %v1319_v50 = vsel %vm712_vm1, %v1296_v37, 0 }
 0x52a   : > { %2871 = vmatpush3.bf16.xpose.msra.mxu0 %v1313_v36  ;;  %v1181_v30 = vmul.f32 %v3185_v15, %v3706_v55  ;;  %v1286_v55 = vpop.permute.xlu0 %1285 }
 0x52b   : > { %v3187_v18 = vpop.eup %3186  ;;  %2998 = vmatprep.subr.msk.bf16.mxu0 %vm712_vm1, %v1294_v63 }
 0x52c   : > { %v1179_v27 = vmul.f32 %v3187_v18, %v3728_v0  ;;  %v1187_v33 = vpack.c.bf16 %v1183_v19, %v1181_v30  ;;  %v1288_v0 = vpop.permute.xlu1 %1287 }
 0x52e   : > { %v1186_v32 = vpack.c.bf16 %v1179_v27, %v1177_v26 }
 0x530   : > { %2864 = vmatprep.mubr.msk.bf16.mxu0 %vm425_vm0, %v1186_v32 }
 0x531   : > { %2865 = vmatmul.mubr.msk.bf16.gmra.mrb[12].mxu0 %vm425_vm0, %v1187_v33 }
 0x532   : > { %2873 = vmatpush3.bf16.xpose.msra.mxu0 %v1316_v34  ;;  %2876 = vmatprep.mubr.msk.bf16.mxu0 %vm712_vm1, %v1282_v20 }
 0x533   : > { %2999 = vmatprep.subr.msk.bf16.mxu0 %vm712_vm1, %v1296_v37 }
 0x53a   : > { %2875 = vmatpush3.bf16.xpose.msra.mxu0 %v1319_v50 }
 0x541   : > { %2877 = vmatmul.mubr.msk.bf16.vlgmr.msra.gmra.mrb[16].mxu0 %vm712_vm1, %v1284_v3 }
 0x542   : > { %2880 = vmatprep.mubr.msk.bf16.mxu0 %vm712_vm1, %v1286_v55 }
 0x549   : > { %2881 = vmatmul.mubr.msk.bf16.gmra.mrb[20].mxu0 %vm712_vm1, %v1288_v0 }
 0x5ad   : > { %v3785_v40 = vpop.f32.mrb[0].mxu0 }
 0x5ae   : > { %v3787_v41 = vpop.f32.mrb[1].mxu0 }
 0x5af   : > { %v3789_v6 = vpop.f32.mrb[2].mxu0 }
 0x5b0   : > { %v3791_v42 = vpop.f32.mrb[3].mxu0 }
 0x5b5   : > { %v3793_v43 = vpop.f32.mrb[4].mxu0 }
 0x5b6   : > { %v3795_v44 = vpop.f32.mrb[5].mxu0 }
 0x5b7   : > { %v3797_v12 = vpop.f32.mrb[6].mxu0 }
 0x5b8   : > { %v3799_v45 = vpop.f32.mrb[7].mxu0 }
 0x5c7   : > { %v3801_v28 = vpop.f32.mrb[8].mxu0 }
 0x5c8   : > { %v3803_v11 = vpop.f32.mrb[9].mxu0 }
 0x5c9   : > { %v3805_v39 = vpop.f32.mrb[10].mxu0 }
 0x5ca   : > { %v3025_v4 = vpack.i.bf16 %v3805_v39, %v3801_v28  ;;  %v3809_v5 = vpop.f32.mrb[11].mxu0 }
 0x5cb   : > { %v3020_v59 = vpack.i.bf16 %v3809_v5, %v3803_v11 }
 0x604   : > { %v3813_v51 = vpop.f32.mrb[12].mxu0 }
 0x605   : > { %v3815_v25 = vpop.f32.mrb[13].mxu0 }
 0x606   : > { %v3817_v31 = vpop.f32.mrb[14].mxu0 }
 0x607   : > { %v3045_v54 = vpack.i.bf16 %v3817_v31, %v3813_v51  ;;  %v3821_v47 = vpop.f32.mrb[15].mxu0 }
 0x608   : > { %v3040_v9 = vpack.i.bf16 %v3821_v47, %v3815_v25 }
 0x614   : > { %v2878_v2 = vpop.f32.mrb[16].mxu0 }
 0x615   : > { %v1388_v13 = vmul.f32 0.25, %v2878_v2  ;;  %v1355_v23 = vpop.f32.mrb[17].mxu0 }
 0x616   : > { %v2879_v57 = vpop.f32.mrb[18].mxu0  ;;  %v1386_v58 = vmul.f32 0.25, %v1355_v23 }
 0x617   : > { %v1358_v53 = vpop.f32.mrb[19].mxu0  ;;  %v1400_v60 = vsel %vm425_vm0, %v1388_v13, -inf  ;;  %v1389_v62 = vmul.f32 0.25, %v2879_v57 }
 0x618   : > { %v1387_v38 = vmul.f32 0.25, %v1358_v53  ;;  %1401 = vmax.xlane.f32.xlu0 %v1400_v60  ;;  %v1394_v29 = vsel %vm425_vm0, %v1386_v58, -inf }
 0x619   : > { %v1403_v52 = vsel %vm425_vm0, %v1389_v62, -inf }
 0x61a   : > { %v1397_v56 = vsel %vm425_vm0, %v1387_v38, -inf }
 0x61b   : > { %1398 = vmax.xlane.f32.xlu1 %v1397_v56 }
 0x61c   : > { %1395 = vmax.xlane.f32.xlu0 %v1394_v29  ;;  %v2882_v61 = vpop.f32.mrb[20].mxu0 }
 0x61d   : > { %v1371_v1 = vpop.f32.mrb[21].mxu0  ;;  %v1392_v7 = vmul.f32 0.25, %v2882_v61 }
 0x61e   : > { %v2883_v63 = vpop.f32.mrb[22].mxu0  ;;  %v1390_v21 = vmul.f32 0.25, %v1371_v1 }
 0x61f   : > { %v1374_v17 = vpop.f32.mrb[23].mxu0  ;;  %v1412_v46 = vsel %vm425_vm0, %v1392_v7, -inf  ;;  %v3837_v36 = vmul.f32 0.25, %v2883_v63 }
 0x620   : > { %1404 = vmax.xlane.f32.xlu0 %v1403_v52  ;;  %v1406_v35 = vsel %vm425_vm0, %v1390_v21, -inf  ;;  %v3839_v15 = vmul.f32 0.25, %v1374_v17 }
 0x621   : > { %v1415_v18 = vsel %vm425_vm0, %v3837_v36, -inf }
 0x622   : > { %v1409_v19 = vsel %vm425_vm0, %v3839_v15, -inf }
 0x624   : > { %1413 = vmax.xlane.f32.xlu0 %v1412_v46 }
 0x628   : > { %1407 = vmax.xlane.f32.xlu0 %v1406_v35 }
 0x62c   : > { %1488 = vrot.lane.b32.xlu1 %v3507_v10, %s3305_s19 }
 0x630   : > { %1490 = vrot.lane.b32.xlu1 %v3515_v16, %s3305_s19 }
 0x63e   : > { %1486 = vrot.lane.b32.xlu0 %v3495_v48, %s3305_s19 }
 0x654   : > { %1416 = vmax.xlane.f32.xlu1 %v1415_v18 }
 0x658   : > { %1410 = vmax.xlane.f32.xlu1 %v1409_v19 }
 0x669   : > { %1492 = vrot.lane.b32.xlu1 %v3527_v24, %s3305_s19 }
 0x6a5   : > { %v1402_v26 = vpop.xlane.xlu0 %1401 }
 0x6a6   : > { %v1420_v27 = vsub.f32 %v1388_v13, %v1402_v26 }
 0x6a8   : > { %v1430_v30 = vmul.f32 1.442695, %v1420_v27  ;;  %v1399_v32 = vpop.xlane.xlu1 %1398 }
 0x6a9   : > { %v1396_v33 = vpop.xlane.xlu0 %1395  ;;  %v1419_v20 = vsub.f32 %v1387_v38, %v1399_v32 }
 0x6aa   : > { %3188 = vpow2.f32 %v1430_v30  ;;  %v1418_v34 = vsub.f32 %v1386_v58, %v1396_v33 }
 0x6ab   : > { %v1428_v55 = vmul.f32 1.442695, %v1419_v20 }
 0x6ac   : > { %v1426_v37 = vmul.f32 1.442695, %v1418_v34 }
 0x6ad   : > { %v1405_v50 = vpop.xlane.xlu0 %1404 }
 0x6ae   : > { %3190 = vpow2.f32 %v1426_v37  ;;  %v1421_v3 = vsub.f32 %v1389_v62, %v1405_v50  ;;  %v1489_v62 = vpop.permute.xlu1 %1488 }
 0x6b0   : > { %v1432_v0 = vmul.f32 1.442695, %v1421_v3 }
 0x6b1   : > { %v1414_v2 = vpop.xlane.xlu0 %1413 }
 0x6b2   : > { %3192 = vpow2.f32 %v1432_v0  ;;  %v1424_v23 = vsub.f32 %v1392_v7, %v1414_v2  ;;  %v1491_v17 = vpop.permute.xlu1 %1490 }
 0x6b3   : > { %3194 = vpow2.f32 %v1428_v55 }
 0x6b4   : > { %v3847_v57 = vpop.eup %3188  ;;  %v1438_v53 = vmul.f32 1.442695, %v1424_v23 }
 0x6b5   : > { %v1408_v13 = vpop.xlane.xlu0 %1407  ;;  %v1448_v60 = vsel %vm425_vm0, %v3847_v57, 0.0 }
 0x6b6   : > { %3196 = vpow2.f32 %v1438_v53  ;;  %v1422_v58 = vsub.f32 %v1390_v21, %v1408_v13  ;;  %1449 = vadd.xlane.f32.xlu0 %v1448_v60 }
 0x6b8   : > { %v3851_v38 = vpop.eup %3190  ;;  %v1434_v56 = vmul.f32 1.442695, %v1422_v58 }
 0x6b9   : > { %v1487_v29 = vpop.permute.xlu0 %1486  ;;  %v1442_v61 = vsel %vm425_vm0, %v3851_v38, 0.0 }
 0x6ba   : > { %3198 = vpow2.f32 %v1434_v56  ;;  %1443 = vadd.xlane.f32.xlu0 %v1442_v61  ;;  %2884 = vmatprep.subr.bf16.mxu1 %v1487_v29 }
 0x6bb   : > { %2885 = vmatpush3.bf16.msra.mxu1 %v1487_v29 }
 0x6bc   : > { %v3193_v1 = vpop.eup %3192  ;;  %2886 = vmatprep.subr.bf16.mxu1 %v1489_v62 }
 0x6bd   : > { %v1451_v63 = vsel %vm425_vm0, %v3193_v1, 0.0  ;;  %v3195_v7 = vpop.eup %3194 }
 0x6be   : > { %1452 = vadd.xlane.f32.xlu1 %v1451_v63  ;;  %v1445_v21 = vsel %vm425_vm0, %v3195_v7, 0.0 }
 0x6bf   : > { %2887 = vmatpush3.bf16.msra.mxu1 %v1489_v62 }
 0x6c0   : > { %v3856_v52 = vpop.eup %3196  ;;  %2888 = vmatprep.subr.bf16.mxu1 %v1491_v17 }
 0x6c1   : > { %v1460_v46 = vsel %vm425_vm0, %v3856_v52, 0.0 }
 0x6c2   : > { %1446 = vadd.xlane.f32.xlu1 %v1445_v21  ;;  %1461 = vadd.xlane.f32.xlu0 %v1460_v46 }
 0x6c3   : > { %2889 = vmatpush3.bf16.msra.mxu1 %v1491_v17 }
 0x6c4   : > { %v3861_v35 = vpop.eup %3198 }
 0x6c5   : > { %v1454_v18 = vsel %vm425_vm0, %v3861_v35, 0.0 }
 0x6c6   : > { %1455 = vadd.xlane.f32.xlu0 %v1454_v18 }
 0x6d3   : > { %1585 = vrot.lane.b32.xlu1 %v3505_v8, %s3306_s20 }
 0x6d7   : > { %1587 = vrot.lane.b32.xlu1 %v3513_v14, %s3306_s20 }
 0x6e1   : > { %v1417_v19 = vpop.xlane.xlu1 %1416 }
 0x6e2   : > { %v1425_v26 = vsub.f32 %v3837_v36, %v1417_v19 }
 0x6e4   : > { %v1440_v27 = vmul.f32 1.442695, %v1425_v26 }
 0x6e5   : > { %v1411_v30 = vpop.xlane.xlu1 %1410 }
 0x6e6   : > { %3200 = vpow2.f32 %v1440_v27  ;;  %v1423_v32 = vsub.f32 %v3839_v15, %v1411_v30 }
 0x6e8   : > { %v1436_v33 = vmul.f32 1.442695, %v1423_v32 }
 0x6e9   : > { %v1493_v34 = vpop.permute.xlu1 %1492 }
 0x6ea   : > { %2890 = vmatprep.subr.bf16.mxu1 %v1493_v34  ;;  %3202 = vpow2.f32 %v1436_v33 }
 0x6eb   : > { %2891 = vmatpush3.bf16.msra.mxu1 %v1493_v34 }
 0x6f0   : > { %v3201_v20 = vpop.eup %3200 }
 0x6f1   : > { %v1463_v37 = vsel %vm425_vm0, %v3201_v20, 0.0 }
 0x6f2   : > { %1464 = vadd.xlane.f32.xlu0 %v1463_v37 }
 0x6f4   : > { %v3203_v50 = vpop.eup %3202 }
 0x6f5   : > { %v1457_v3 = vsel %vm425_vm0, %v3203_v50, 0.0 }
 0x6fb   : > { %1458 = vadd.xlane.f32.xlu1 %v1457_v3 }
 0x708   : > { %1583 = vrot.lane.b32.xlu0 %v3493_v49, %s3306_s20 }
 0x70c   : > { %1589 = vrot.lane.b32.xlu1 %v3525_v22, %s3306_s20  ;;  %1575 = vrot.lane.b32.xlu0 %v3493_v49, %s3307_s24 }
 0x710   : > { %1577 = vrot.lane.b32.xlu1 %v3505_v8, %s3307_s24  ;;  %1579 = vrot.lane.b32.xlu0 %v3513_v14, %s3307_s24 }
 0x714   : > { %1581 = vrot.lane.b32.xlu1 %v3525_v22, %s3307_s24 }
 0x743   : > { %v1450_v36 = vpop.xlane.xlu0 %1449 }
 0x747   : > { %v1444_v15 = vpop.xlane.xlu0 %1443 }
 0x74b   : > { %v1453_v55 = vpop.xlane.xlu1 %1452 }
 0x74c   : > { %3204 = vrcp.f32 %v1453_v55 }
 0x74d   : > { %3206 = vrcp.f32 %v1444_v15 }
 0x74e   : > { %3208 = vrcp.f32 %v1450_v36 }
 0x74f   : > { %v1447_v0 = vpop.xlane.xlu1 %1446  ;;  %v1462_v56 = vpop.xlane.xlu0 %1461 }
 0x750   : > { %3210 = vrcp.f32 %v1447_v0 }
 0x753   : > { %v1456_v62 = vpop.xlane.xlu0 %1455  ;;  %v1586_v29 = vpop.permute.xlu1 %1585 }
 0x756   : > { %v3205_v2 = vpop.eup %3204 }
 0x757   : > { %v3207_v23 = vpop.eup %3206  ;;  %v1473_v13 = vmul.f32 %v3205_v2, %v3193_v1  ;;  %v1588_v17 = vpop.permute.xlu1 %1587 }
 0x758   : > { %v3209_v49 = vpop.eup %3208  ;;  %v1467_v8 = vmul.f32 %v3207_v23, %v3851_v38  ;;  %v1607_v38 = vsel %vm712_vm1, %v1586_v29, 0  ;;  %v1610_v26 = vsel %vm712_vm1, %v1588_v17, 0 }
 0x759   : > { %v1471_v14 = vmul.f32 %v3209_v49, %v3847_v57 }
 0x75a   : > { %v3211_v53 = vpop.eup %3210 }
 0x75b   : > { %v1469_v60 = vmul.f32 %v3211_v53, %v3195_v7  ;;  %v1483_v22 = vpack.c.bf16 %v1473_v13, %v1471_v14 }
 0x75d   : > { %v1482_v58 = vpack.c.bf16 %v1469_v60, %v1467_v8 }
 0x75f   : > { %2892 = vmatprep.mubr.msk.bf16.mxu1 %vm425_vm0, %v1482_v58 }
 0x760   : > { %2893 = vmatmul.mubr.msk.bf16.vlgmr.msra.gmra.mrb[32].mxu1 %vm425_vm0, %v1483_v22 }
 0x77f   : > { %v1465_v61 = vpop.xlane.xlu0 %1464 }
 0x780   : > { %3212 = vrcp.f32 %v1465_v61 }
 0x781   : > { %3214 = vrcp.f32 %v1456_v62 }
 0x782   : > { %3216 = vrcp.f32 %v1462_v56 }
 0x783   : > { %v1584_v63 = vpop.permute.xlu0 %1583 }
 0x784   : > { %v1604_v21 = vsel %vm712_vm1, %v1584_v63, 0  ;;  %3000 = vmatprep.subr.msk.bf16.mxu1 %vm712_vm1, %v1584_v63 }
 0x785   : > { %2901 = vmatpush3.bf16.xpose.msra.mxu1 %v1604_v21 }
 0x786   : > { %3001 = vmatprep.subr.msk.bf16.mxu1 %vm712_vm1, %v1586_v29 }
 0x787   : > { %v1576_v3 = vpop.permute.xlu0 %1575 }
 0x788   : > { %v1459_v57 = vpop.xlane.xlu1 %1458 }
 0x789   : > { %3218 = vrcp.f32 %v1459_v57 }
 0x78a   : > { %v3213_v1 = vpop.eup %3212 }
 0x78b   : > { %v3215_v7 = vpop.eup %3214  ;;  %v1481_v19 = vmul.f32 %v3213_v1, %v3201_v20 }
 0x78c   : > { %v3217_v46 = vpop.eup %3216  ;;  %v1475_v27 = vmul.f32 %v3215_v7, %v3861_v35  ;;  %v1590_v32 = vpop.permute.xlu1 %1589 }
 0x78d   : > { %2903 = vmatpush3.bf16.xpose.msra.mxu1 %v1607_v38  ;;  %v1479_v33 = vmul.f32 %v3217_v46, %v3856_v52  ;;  %v1613_v20 = vsel %vm712_vm1, %v1590_v32, 0 }
 0x78e   : > { %3002 = vmatprep.subr.msk.bf16.mxu1 %vm712_vm1, %v1588_v17 }
 0x78f   : > { %v1485_v37 = vpack.c.bf16 %v1481_v19, %v1479_v33 }
 0x790   : > { %v1578_v35 = vpop.permute.xlu1 %1577 }
 0x793   : > { %v3219_v18 = vpop.eup %3218 }
 0x794   : > { %v1477_v30 = vmul.f32 %v3219_v18, %v3203_v50  ;;  %v1580_v50 = vpop.permute.xlu0 %1579  ;;  %v1582_v52 = vpop.permute.xlu1 %1581 }
 0x795   : > { %2905 = vmatpush3.bf16.xpose.msra.mxu1 %v1610_v26 }
 0x796   : > { %3003 = vmatprep.subr.msk.bf16.mxu1 %vm712_vm1, %v1590_v32  ;;  %v1484_v34 = vpack.c.bf16 %v1477_v30, %v1475_v27 }
 0x798   : > { %2896 = vmatprep.mubr.msk.bf16.mxu1 %vm425_vm0, %v1484_v34 }
 0x799   : > { %2897 = vmatmul.mubr.msk.bf16.gmra.mrb[36].mxu1 %vm425_vm0, %v1485_v37 }
 0x79a   : > { %2908 = vmatprep.mubr.msk.bf16.mxu1 %vm712_vm1, %v1576_v3 }
 0x79d   : > { %2907 = vmatpush3.bf16.xpose.msra.mxu1 %v1613_v20 }
 0x7a4   : > { %2909 = vmatmul.mubr.msk.bf16.vlgmr.msra.gmra.mrb[40].mxu1 %vm712_vm1, %v1578_v35 }
 0x7a5   : > { %2912 = vmatprep.mubr.msk.bf16.mxu1 %vm712_vm1, %v1580_v50 }
 0x7ac   : > { %2913 = vmatmul.mubr.msk.bf16.gmra.mrb[44].mxu1 %vm712_vm1, %v1582_v52 }
 0x833   : > { %v3905_v36 = vpop.f32.mrb[32].mxu1 }
 0x834   : > { %v3907_v15 = vpop.f32.mrb[33].mxu1 }
 0x835   : > { %v3909_v55 = vpop.f32.mrb[34].mxu1 }
 0x836   : > { %v3035_v0 = vpack.i.bf16 %v3909_v55, %v3905_v36  ;;  %v3913_v2 = vpop.f32.mrb[35].mxu1 }
 0x837   : > { %v3030_v23 = vpack.i.bf16 %v3913_v2, %v3907_v15 }
 0x86c   : > { %v3917_v49 = vpop.f32.mrb[36].mxu1 }
 0x86d   : > { %v3919_v53 = vpop.f32.mrb[37].mxu1 }
 0x86e   : > { %v3921_v13 = vpop.f32.mrb[38].mxu1 }
 0x86f   : > { %v3065_v8 = vpack.i.bf16 %v3921_v13, %v3917_v49  ;;  %v3925_v60 = vpop.f32.mrb[39].mxu1 }
 0x870   : > { %v3060_v14 = vpack.i.bf16 %v3925_v60, %v3919_v53 }
 0x877   : > { %v2910_v58 = vpop.f32.mrb[40].mxu1 }
 0x878   : > { %v1649_v22 = vpop.f32.mrb[41].mxu1  ;;  %v1682_v61 = vmul.f32 0.25, %v2910_v58 }
 0x879   : > { %v1680_v56 = vmul.f32 0.25, %v1649_v22  ;;  %v2911_v62 = vpop.f32.mrb[42].mxu1 }
 0x87a   : > { %v1652_v29 = vpop.f32.mrb[43].mxu1  ;;  %v1683_v57 = vmul.f32 0.25, %v2911_v62  ;;  %v1694_v1 = vsel %vm425_vm0, %v1682_v61, -inf }
 0x87b   : > { %v1681_v63 = vmul.f32 0.25, %v1652_v29  ;;  %v1688_v17 = vsel %vm425_vm0, %v1680_v56, -inf }
 0x87c   : > { %1689 = vmax.xlane.f32.xlu0 %v1688_v17  ;;  %v1697_v27 = vsel %vm425_vm0, %v1683_v57, -inf }
 0x87d   : > { %v1691_v21 = vsel %vm425_vm0, %v1681_v63, -inf }
 0x87e   : > { %1692 = vmax.xlane.f32.xlu1 %v1691_v21 }
 0x87f   : > { %v2914_v38 = vpop.f32.mrb[44].mxu1 }
 0x880   : > { %1695 = vmax.xlane.f32.xlu0 %v1694_v1  ;;  %v1665_v7 = vpop.f32.mrb[45].mxu1  ;;  %v1686_v33 = vmul.f32 0.25, %v2914_v38 }
 0x881   : > { %v2915_v46 = vpop.f32.mrb[46].mxu1  ;;  %v1684_v19 = vmul.f32 0.25, %v1665_v7 }
 0x882   : > { %v1668_v18 = vpop.f32.mrb[47].mxu1  ;;  %v1687_v30 = vmul.f32 0.25, %v2915_v46  ;;  %v1706_v3 = vsel %vm425_vm0, %v1686_v33, -inf }
 0x883   : > { %v3932_v26 = vmul.f32 0.25, %v1668_v18  ;;  %v1700_v34 = vsel %vm425_vm0, %v1684_v19, -inf }
 0x884   : > { %1698 = vmax.xlane.f32.xlu0 %v1697_v27  ;;  %v1709_v37 = vsel %vm425_vm0, %v1687_v30, -inf }
 0x885   : > { %v1703_v32 = vsel %vm425_vm0, %v3932_v26, -inf }
 0x886   : > { %1704 = vmax.xlane.f32.xlu1 %v1703_v32 }
 0x888   : > { %1701 = vmax.xlane.f32.xlu0 %v1700_v34 }
 0x88a   : > { %1710 = vmax.xlane.f32.xlu1 %v1709_v37 }
 0x88c   : > { %1707 = vmax.xlane.f32.xlu0 %v1706_v3 }
 0x909   : > { %v1690_v20 = vpop.xlane.xlu0 %1689 }
 0x90a   : > { %v1712_v35 = vsub.f32 %v1680_v56, %v1690_v20 }
 0x90b   : > { %v1693_v50 = vpop.xlane.xlu1 %1692 }
 0x90c   : > { %v1720_v22 = vmul.f32 1.442695, %v1712_v35  ;;  %v1713_v62 = vsub.f32 %v1681_v63, %v1693_v50 }
 0x90d   : > { %v1696_v52 = vpop.xlane.xlu0 %1695 }
 0x90e   : > { %v1714_v58 = vsub.f32 %v1682_v61, %v1696_v52  ;;  %v1722_v38 = vmul.f32 1.442695, %v1713_v62 }
 0x910   : > { %v1724_v29 = vmul.f32 1.442695, %v1714_v58 }
 0x911   : > { %v1699_v17 = vpop.xlane.xlu0 %1698 }
 0x912   : > { %3220 = vpow2.f32 %v1724_v29  ;;  %v1715_v21 = vsub.f32 %v1683_v57, %v1699_v17 }
 0x913   : > { %3222 = vpow2.f32 %v1720_v22  ;;  %v1705_v58 = vpop.xlane.xlu1 %1704 }
 0x914   : > { %v1726_v1 = vmul.f32 1.442695, %v1715_v21 }
 0x915   : > { %v1702_v7 = vpop.xlane.xlu0 %1701 }
 0x916   : > { %3224 = vpow2.f32 %v1726_v1  ;;  %v1716_v46 = vsub.f32 %v1684_v19, %v1702_v7 }
 0x917   : > { %3226 = vpow2.f32 %v1722_v38  ;;  %v1711_v22 = vpop.xlane.xlu1 %1710 }
 0x918   : > { %v1728_v56 = vmul.f32 1.442695, %v1716_v46  ;;  %v1719_v62 = vsub.f32 %v1687_v30, %v1711_v22 }
 0x919   : > { %v1708_v18 = vpop.xlane.xlu0 %1707 }
 0x91a   : > { %v1718_v27 = vsub.f32 %v1686_v33, %v1708_v18  ;;  %v1734_v29 = vmul.f32 1.442695, %v1719_v62 }
 0x91c   : > { %v3940_v32 = vpop.eup %3220  ;;  %v1732_v34 = vmul.f32 1.442695, %v1718_v27 }
 0x91d   : > { %v1742_v61 = vsel %vm425_vm0, %v3940_v32, 0.0  ;;  %v3223_v63 = vpop.eup %3222 }
 0x91e   : > { %3228 = vpow2.f32 %v1732_v34  ;;  %1743 = vadd.xlane.f32.xlu0 %v1742_v61  ;;  %v1736_v37 = vsel %vm425_vm0, %v3223_v63, 0.0 }
 0x91f   : > { %3230 = vpow2.f32 %v1728_v56 }
 0x920   : > { %v3944_v57 = vpop.eup %3224  ;;  %3232 = vpow2.f32 %v1734_v29 }
 0x921   : > { %v1745_v19 = vsel %vm425_vm0, %v3944_v57, 0.0  ;;  %v3227_v3 = vpop.eup %3226 }
 0x922   : > { %1737 = vadd.xlane.f32.xlu0 %v1736_v37  ;;  %1746 = vadd.xlane.f32.xlu1 %v1745_v19  ;;  %v1739_v33 = vsel %vm425_vm0, %v3227_v3, 0.0  ;;  %v3093_v19 = vld [vmem:[%s4240_s4 + $0x8] sm:$0xff]  }
 0x926   : > { %1740 = vadd.xlane.f32.xlu1 %v1739_v33  ;;  %v3095_v33 = vld [vmem:[%s4240_s4 + $0x18] sm:$0xff]  }
 0x928   : > { %v3950_v20 = vpop.eup %3228 }
 0x929   : > { %v1754_v35 = vsel %vm425_vm0, %v3950_v20, 0.0  ;;  %v3954_v50 = vpop.eup %3230 }
 0x92a   : > { %1755 = vadd.xlane.f32.xlu0 %v1754_v35  ;;  %v1748_v52 = vsel %vm425_vm0, %v3954_v50, 0.0 }
 0x92e   : > { %1749 = vadd.xlane.f32.xlu0 %v1748_v52 }
 0x937   : > { %1782 = vrot.lane.b32.xlu1 %v3507_v10, %s3307_s24  ;;  %v1717_v10 = vsub.f32 %v3932_v26, %v1705_v58 }
 0x93b   : > { %1784 = vrot.lane.b32.xlu1 %v3515_v16, %s3307_s24  ;;  %v3233_v16 = vpop.eup %3232 }
 0x93c   : > { %v1757_v11 = vsel %vm425_vm0, %v3233_v16, 0.0 }
 0x944   : > { %1780 = vrot.lane.b32.xlu0 %v3495_v48, %s3307_s24  ;;  %v1730_v48 = vmul.f32 1.442695, %v1717_v10 }
 0x946   : > { %3234 = vpow2.f32 %v1730_v48 }
 0x948   : > { %3021 = vrot.lane.b32.xlu0 %v3020_v59, %s3306_s20 }
 0x94c   : > { %3031 = vrot.lane.b32.xlu0 %v3030_v23, %s3304_s18 }
 0x950   : > { %3041 = vrot.lane.b32.xlu0 %v3040_v9, %s3306_s20  ;;  %v3235_v5 = vpop.eup %3234 }
 0x951   : > { %v1751_v59 = vsel %vm425_vm0, %v3235_v5, 0.0 }
 0x95f   : > { %1758 = vadd.xlane.f32.xlu1 %v1757_v11 }
 0x963   : > { %1752 = vadd.xlane.f32.xlu1 %v1751_v59 }
 0x974   : > { %1786 = vrot.lane.b32.xlu1 %v3527_v24, %s3307_s24  ;;  %s413_s24 = scalar_lea.vmem %s4248_s12, %s2710_s23 }
 0x978   : > { %3026 = vrot.lane.b32.xlu1 %v3025_v4, %s3306_s20 }
 0x97c   : > { %3036 = vrot.lane.b32.xlu1 %v3035_v0, %s3304_s18 }
 0x980   : > { %3046 = vrot.lane.b32.xlu1 %v3045_v54, %s3306_s20 }
 0x9ab   : > { %v1744_v25 = vpop.xlane.xlu0 %1743 }
 0x9af   : > { %v1747_v47 = vpop.xlane.xlu1 %1746  ;;  %v1738_v9 = vpop.xlane.xlu0 %1737 }
 0x9b0   : > { %3236 = vrcp.f32 %v1738_v9 }
 0x9b3   : > { %v1741_v24 = vpop.xlane.xlu1 %1740 }
 0x9b4   : > { %3238 = vrcp.f32 %v1741_v24 }
 0x9b5   : > { %3240 = vrcp.f32 %v1747_v47 }
 0x9b6   : > { %3242 = vrcp.f32 %v1744_v25 }
 0x9b7   : > { %v1756_v15 = vpop.xlane.xlu0 %1755  ;;  %v1783_v4 = vpop.permute.xlu1 %1782 }
 0x9ba   : > { %v3237_v28 = vpop.eup %3236 }
 0x9bb   : > { %v1750_v2 = vpop.xlane.xlu0 %1749  ;;  %v1761_v26 = vmul.f32 %v3237_v28, %v3223_v63  ;;  %v1785_v51 = vpop.permute.xlu1 %1784 }
 0x9be   : > { %v3239_v39 = vpop.eup %3238 }
 0x9bf   : > { %v1781_v23 = vpop.permute.xlu0 %1780  ;;  %v1763_v36 = vmul.f32 %v3239_v39, %v3227_v3  ;;  %v3241_v54 = vpop.eup %3240  ;;  %v3094_v3 = vld [vmem:[%s4240_s4 + $0x10] sm:$0xff]  }
 0x9c0   : > { %2916 = vmatprep.subr.bf16.mxu0 %v1781_v23  ;;  %v3243_v30 = vpop.eup %3242  ;;  %v1767_v17 = vmul.f32 %v3241_v54, %v3944_v57 }
 0x9c1   : > { %2917 = vmatpush3.bf16.msra.mxu0 %v1781_v23  ;;  %v1776_v55 = vpack.c.bf16 %v1763_v36, %v1761_v26  ;;  %v1765_v38 = vmul.f32 %v3243_v30, %v3940_v32  ;;  %v3092_v32 = vld [vmem:[%s4240_s4] sm:$0xff]  }
 0x9c2   : > { %2918 = vmatprep.subr.bf16.mxu0 %v1783_v4 }
 0x9c3   : > { %2924 = vmatprep.mubr.msk.bf16.mxu0 %vm425_vm0, %v1776_v55  ;;  %v1777_v1 = vpack.c.bf16 %v1767_v17, %v1765_v38  ;;  %v3022_v59 = vpop.permute.xlu0 %3021 }
 0x9c4   : > { %v3023_v49 = vunpack.i.l.bf16 %v3022_v59  ;;  %v3024_v13 = vunpack.i.h.bf16 %v3022_v59 }
 0x9c5   : > { %2919 = vmatpush3.bf16.msra.mxu0 %v1783_v4 }
 0x9c6   : > { %2920 = vmatprep.subr.bf16.mxu0 %v1785_v51  ;;  %v1966_v39 = vsel %vm712_vm1, %v3791_v42, %v3024_v13 }
 0x9c7   : > { %v3032_v47 = vpop.permute.xlu0 %3031 }
 0x9c8   : > { %v3034_v28 = vunpack.i.h.bf16 %v3032_v47 }
 0x9c9   : > { %2921 = vmatpush3.bf16.msra.mxu0 %v1785_v51 }
 0x9ca   : > { %v1975_v42 = vsel %vm1973_vm2, %v1966_v39, %v3034_v28 }
 0x9cb   : > { %v3042_v24 = vpop.permute.xlu0 %3041 }
 0x9cc   : > { %v3044_v17 = vunpack.i.h.bf16 %v3042_v24 }
 0x9ec   : > { %v1759_v31 = vpop.xlane.xlu1 %1758 }
 0x9ed   : > { %3244 = vrcp.f32 %v1759_v31 }
 0x9ee   : > { %3246 = vrcp.f32 %v1750_v2  ;;  %v1965_v2 = vsel %vm712_vm1, %v3787_v41, %v3023_v49 }
 0x9ef   : > { %3248 = vrcp.f32 %v1756_v15 }
 0x9f0   : > { %v1753_v0 = vpop.xlane.xlu1 %1752 }
 0x9f1   : > { %3250 = vrcp.f32 %v1753_v0 }
 0x9f4   : > { %v1787_v21 = vpop.permute.xlu1 %1786 }
 0x9f5   : > { %2922 = vmatprep.subr.bf16.mxu0 %v1787_v21 }
 0x9f6   : > { %2923 = vmatpush3.bf16.msra.mxu0 %v1787_v21 }
 0x9f7   : > { %v3245_v7 = vpop.eup %3244  ;;  %2932 = vmatprep.subr.bf16.mxu0 %v3092_v32 }
 0x9f8   : > { %v3247_v46 = vpop.eup %3246  ;;  %v1775_v56 = vmul.f32 %v3245_v7, %v3233_v16 }
 0x9f9   : > { %2925 = vmatmul.mubr.msk.bf16.vlgmr.msra.gmra.mrb[24].mxu0 %vm425_vm0, %v1777_v1  ;;  %v3249_v18 = vpop.eup %3248  ;;  %v1769_v34 = vmul.f32 %v3247_v46, %v3954_v50 }
 0x9fa   : > { %v1773_v63 = vmul.f32 %v3249_v18, %v3950_v20  ;;  %2933 = vmatpush3.bf16.msra.mxu0 %v3092_v32  ;;  %v1970_v32 = vsel %vm712_vm1, %v3799_v45, %v3044_v17  ;;  %v3288_v17 = vld [vmem:[%s3389_s26 + $0x20] sm:$0xff] }
 0x9fb   : > { %v3251_v27 = vpop.eup %3250  ;;  %2934 = vmatprep.subr.bf16.mxu0 %v3093_v19 }
 0x9fc   : > { %v1771_v61 = vmul.f32 %v3251_v27, %v3235_v5  ;;  %v1779_v57 = vpack.c.bf16 %v1775_v56, %v1773_v63  ;;  %v3027_v5 = vpop.permute.xlu1 %3026 }
 0x9fd   : > { %v3029_v53 = vunpack.i.h.bf16 %v3027_v5  ;;  %v3028_v60 = vunpack.i.l.bf16 %v3027_v5  ;;  %v2679_v5 = vld [vmem:[%s4241_s5] ss:$0 sm:$0xff] }
 0x9fe   : > { %v1778_v37 = vpack.c.bf16 %v1771_v61, %v1769_v34  ;;  %2935 = vmatpush3.bf16.msra.mxu0 %v3093_v19 }
 0x9ff   : > { %2936 = vmatprep.subr.bf16.mxu0 %v3094_v3  ;;  %v1968_v26 = vsel %vm712_vm1, %v3789_v6, %v3029_v53  ;;  %v1967_v36 = vsel %vm712_vm1, %v3785_v40, %v3028_v60  ;;  %v3043_v6 = vunpack.i.l.bf16 %v3042_v24  ;;  %v3285_v60 = vld [vmem:[%s3389_s26 + $0x10] sm:$0xff] }
 0xa00   : > { %2928 = vmatprep.mubr.msk.bf16.mxu0 %vm425_vm0, %v1778_v37  ;;  %v3037_v25 = vpop.permute.xlu1 %3036 }
 0xa01   : > { %2929 = vmatmul.mubr.msk.bf16.gmra.mrb[28].mxu0 %vm425_vm0, %v1779_v57  ;;  %v3038_v15 = vunpack.i.l.bf16 %v3037_v25  ;;  %v1969_v19 = vsel %vm712_vm1, %v3795_v44, %v3043_v6 }
 0xa02   : > { %2937 = vmatpush3.bf16.msra.mxu0 %v3094_v3 }
 0xa03   : > { %2938 = vmatprep.subr.bf16.mxu0 %v3095_v33  ;;  %v1976_v54 = vsel %vm1973_vm2, %v1967_v36, %v3038_v15  ;;  %v3287_v36 = vld [vmem:[%s3389_s26 + $0x18] sm:$0xff] }
 0xa04   : > { %v3047_v9 = vpop.permute.xlu1 %3046 }
 0xa05   : > { %v3049_v18 = vunpack.i.h.bf16 %v3047_v9  ;;  %v3048_v27 = vunpack.i.l.bf16 %v3047_v9  ;;  %v3284_v9 = vld [vmem:[%s3389_s26] sm:$0xff] }
 0xa06   : > { %2939 = vmatpush3.bf16.msra.mxu0 %v3095_v33 }
 0xa07   : > { %v1972_v33 = vsel %vm712_vm1, %v3797_v12, %v3049_v18  ;;  %v3291_v18 = vld [vmem:[%s3389_s26 + $0x30] sm:$0xff] }
 0xacc   : > { %v2926_v20 = vpop.f32.mrb[24].mxu0 }
 0xacd   : > { %v1838_v35 = vpop.f32.mrb[25].mxu0 }
 0xace   : > { %v2927_v50 = vpop.f32.mrb[26].mxu0 }
 0xacf   : > { %v3050_v52 = vpack.i.bf16 %v2927_v50, %v2926_v20  ;;  %v1841_v58 = vpop.f32.mrb[27].mxu0  ;;  %v1971_v20 = vsel %vm712_vm1, %v3793_v43, %v3048_v27 }
 0xad0   : > { %v3055_v22 = vpack.i.bf16 %v1841_v58, %v1838_v35 }
 0xad1   : > { %3051 = vrot.lane.b32.xlu1 %v3050_v52, %s3302_s16 }
 0xad2   : > { %3056 = vrot.lane.b32.xlu0 %v3055_v22, %s3302_s16 }
 0xad4   : > { %v2930_v62 = vpop.f32.mrb[28].mxu0 }
 0xad5   : > { %3066 = vrot.lane.b32.xlu1 %v3065_v8, %s3304_s18  ;;  %v1854_v10 = vpop.f32.mrb[29].mxu0  ;;  %v3033_v8 = vunpack.i.l.bf16 %v3032_v47 }
 0xad6   : > { %3061 = vrot.lane.b32.xlu0 %v3060_v14, %s3304_s18  ;;  %v2931_v29 = vpop.f32.mrb[30].mxu0  ;;  %v3039_v14 = vunpack.i.h.bf16 %v3037_v25 }
 0xad7   : > { %v3075_v48 = vpack.i.bf16 %v2931_v29, %v2930_v62  ;;  %v1857_v16 = vpop.f32.mrb[31].mxu0  ;;  %v1974_v4 = vsel %vm1973_vm2, %v1965_v2, %v3033_v8  ;;  %v3286_v2 = vld [vmem:[%s3389_s26 + $0x8] sm:$0xff] }
 0xad8   : > { %v3070_v11 = vpack.i.bf16 %v1857_v16, %v1854_v10  ;;  %v1977_v41 = vsel %vm1973_vm2, %v1968_v26, %v3039_v14 }
 0xad9   : > { %3076 = vrot.lane.b32.xlu1 %v3075_v48, %s3302_s16 }
 0xada   : > { %3071 = vrot.lane.b32.xlu0 %v3070_v11, %s3302_s16 }
 0xb43   : > { %v3052_v23 = vpop.permute.xlu1 %3051 }
 0xb44   : > { %v3054_v55 = vunpack.i.h.bf16 %v3052_v23  ;;  %v3053_v51 = vunpack.i.l.bf16 %v3052_v23  ;;  %v3057_v31 = vpop.permute.xlu0 %3056 }
 0xb45   : > { %v3059_v0 = vunpack.i.h.bf16 %v3057_v31  ;;  %v3058_v30 = vunpack.i.l.bf16 %v3057_v31 }
 0xb46   : > { %v1986_v21 = vsel %vm1982_vm3, %v1977_v41, %v3054_v55  ;;  %v1985_v38 = vsel %vm1982_vm3, %v1976_v54, %v3053_v51 }
 0xb47   : > { %v1992_v1 = vpack.c.bf16 %v1986_v21, %v1985_v38  ;;  %v1983_v40 = vsel %vm1982_vm3, %v1974_v4, %v3058_v30  ;;  %v1984_v7 = vsel %vm1982_vm3, %v1975_v42, %v3059_v0  ;;  %v3067_v46 = vpop.permute.xlu1 %3066  ;;  %v3289_v38 = vld [vmem:[%s3389_s26 + $0x28] sm:$0xff] }
 0xb48   : > { %v1991_v56 = vpack.c.bf16 %v1984_v7, %v1983_v40  ;;  %v3062_v34 = vpop.permute.xlu0 %3061  ;;  %v3069_v61 = vunpack.i.h.bf16 %v3067_v46  ;;  %v3068_v63 = vunpack.i.l.bf16 %v3067_v46  ;;  %v3290_v40 = vld [vmem:[%s3389_s26 + $0x38] sm:$0xff] }
 0xb49   : > { %v3064_v37 = vunpack.i.h.bf16 %v3062_v34  ;;  %v3063_v57 = vunpack.i.l.bf16 %v3062_v34 }
 0xb4a   : > { %2940 = vmatprep.mubr.msk.bf16.mxu0 %vm425_vm0, %v1991_v56  ;;  %v1981_v58 = vsel %vm1973_vm2, %v1972_v33, %v3069_v61  ;;  %v1980_v22 = vsel %vm1973_vm2, %v1971_v20, %v3068_v63 }
 0xb4b   : > { %v3077_v3 = vpop.permute.xlu1 %3076  ;;  %2941 = vmatmul.mubr.msk.bf16.vlgmr.msra.gmra.mrb[32].mxu0 %vm425_vm0, %v1992_v1  ;;  %v1978_v44 = vsel %vm1973_vm2, %v1969_v19, %v3063_v57  ;;  %v1979_v10 = vsel %vm1973_vm2, %v1970_v32, %v3064_v37 }
 0xb4c   : > { %v3079_v35 = vunpack.i.h.bf16 %v3077_v3  ;;  %v3078_v50 = vunpack.i.l.bf16 %v3077_v3  ;;  %v3072_v52 = vpop.permute.xlu0 %3071 }
 0xb4d   : > { %v3074_v45 = vunpack.i.h.bf16 %v3072_v52  ;;  %v3073_v62 = vunpack.i.l.bf16 %v3072_v52 }
 0xb4e   : > { %v1990_v29 = vsel %vm1982_vm3, %v1981_v58, %v3079_v35  ;;  %v1989_v12 = vsel %vm1982_vm3, %v1980_v22, %v3078_v50 }
 0xb4f   : > { %v1994_v48 = vpack.c.bf16 %v1990_v29, %v1989_v12  ;;  %v1987_v43 = vsel %vm1982_vm3, %v1978_v44, %v3073_v62  ;;  %v1988_v16 = vsel %vm1982_vm3, %v1979_v10, %v3074_v45 }
 0xb50   : > { %v1993_v11 = vpack.c.bf16 %v1988_v16, %v1987_v43 }
 0xb52   : > { %2944 = vmatprep.mubr.msk.bf16.mxu0 %vm425_vm0, %v1993_v11 }
 0xb53   : > { %2945 = vmatmul.mubr.msk.bf16.gmra.mrb[36].mxu0 %vm425_vm0, %v1994_v48 }
 0xc1e   : > { %v2942_v59 = vpop.f32.mrb[32].mxu0 }
 0xc1f   : > { %v2080_v25 = vpop.f32.mrb[33].mxu0  ;;  %v2089_v47 = vadd.f32 %v2942_v59, %v2679_v5 }
 0xc20   : > { %v2081_v49 = vadd.f32 %v2679_v5, %v2080_v25  ;;  %v2943_v13 = vpop.f32.mrb[34].mxu0 }
 0xc21   : > { %v2083_v8 = vpop.f32.mrb[35].mxu0  ;;  %v4068_v14 = vadd.f32 %v3285_v60, %v2089_v47  ;;  %v2092_v15 = vadd.f32 %v2943_v13, %v2679_v5 }
 0xc22   : > { %v4065_v24 = vadd.f32 %v3284_v9, %v2081_v49  ;;  %v2084_v53 = vadd.f32 %v2679_v5, %v2083_v8 }
 0xc23   : > { %v4078_v55 = vadd.f32 %v3287_v36, %v2092_v15  ;;  %v2127_v54 = vsel %vm425_vm0, %v4068_v14, 0.0 }
 0xc24   : > { %v4071_v28 = vadd.f32 %v3286_v2, %v2084_v53  ;;  %v2121_v39 = vsel %vm425_vm0, %v4065_v24, 0.0 }
 0xc25   : > { %2122 = vadd.xlane.f32.xlu0 %v2121_v39  ;;  %v2130_v1 = vsel %vm425_vm0, %v4078_v55, 0.0 }
 0xc26   : > { %v2946_v4 = vpop.f32.mrb[36].mxu0  ;;  %v2124_v23 = vsel %vm425_vm0, %v4071_v28, 0.0 }
 0xc27   : > { %v2096_v26 = vpop.f32.mrb[37].mxu0  ;;  %2125 = vadd.xlane.f32.xlu1 %v2124_v23  ;;  %v2105_v42 = vadd.f32 %v2946_v4, %v2679_v5 }
 0xc28   : > { %v2097_v51 = vadd.f32 %v2679_v5, %v2096_v26  ;;  %v2947_v31 = vpop.f32.mrb[38].mxu0 }
 0xc29   : > { %v2099_v41 = vpop.f32.mrb[39].mxu0  ;;  %2128 = vadd.xlane.f32.xlu0 %v2127_v54  ;;  %v2108_v0 = vadd.f32 %v2947_v31, %v2679_v5  ;;  %v4096_v27 = vadd.f32 %v3291_v18, %v2105_v42  ;;  %v3097_v31 = vld [vmem:[%s4244_s8 + $0x8] sm:$0xff]   ;;  %v3098_v54 = vld [vmem:[%s4244_s8 + $0x10] sm:$0xff]  }
 0xc2a   : > { %v2100_v30 = vadd.f32 %v2679_v5, %v2099_v41  ;;  %v4083_v21 = vadd.f32 %v3288_v17, %v2097_v51  ;;  %v3096_v51 = vld [vmem:[%s4244_s8] sm:$0xff]   ;;  %v3099_v41 = vld [vmem:[%s4244_s8 + $0x18] sm:$0xff]  }
 0xc2b   : > { %v4091_v7 = vadd.f32 %v3290_v40, %v2108_v0  ;;  %v2139_v61 = vsel %vm425_vm0, %v4096_v27, 0.0  ;;  %2948 = vmatprep.subr.bf16.mxu1 %v3096_v51  ;;  %v3100_v0 = vld [vmem:[%s4246_s10] sm:$0xff]  }
 0xc2c   : > { %v4086_v6 = vadd.f32 %v3289_v38, %v2100_v30  ;;  %v2133_v56 = vsel %vm425_vm0, %v4083_v21, 0.0  ;;  %2949 = vmatpush3.bf16.msra.mxu1 %v3096_v51  ;;  %v3101_v30 = vld [vmem:[%s4246_s10 + $0x8] sm:$0xff]   ;;  %2964 = vmatprep.subr.bf16.mxu0 %v3100_v0 }
 0xc2d   : > { %2131 = vadd.xlane.f32.xlu0 %v2130_v1  ;;  %v2142_v34 = vsel %vm425_vm0, %v4091_v7, 0.0  ;;  %2950 = vmatprep.subr.bf16.mxu1 %v3097_v31 }
 0xc2e   : > { %v2136_v46 = vsel %vm425_vm0, %v4086_v6, 0.0  ;;  %2965 = vmatpush3.bf16.msra.mxu0 %v3100_v0 }
 0xc2f   : > { %2137 = vadd.xlane.f32.xlu1 %v2136_v46  ;;  %2966 = vmatprep.subr.bf16.mxu0 %v3101_v30 }
 0xc30   : > { %2951 = vmatpush3.bf16.msra.mxu1 %v3097_v31 }
 0xc31   : > { %2134 = vadd.xlane.f32.xlu0 %v2133_v56  ;;  %2952 = vmatprep.subr.bf16.mxu1 %v3098_v54 }
 0xc32   : > { %2967 = vmatpush3.bf16.msra.mxu0 %v3101_v30 }
 0xc33   : > { %2143 = vadd.xlane.f32.xlu1 %v2142_v34 }
 0xc34   : > { %2953 = vmatpush3.bf16.msra.mxu1 %v3098_v54 }
 0xc35   : > { %2140 = vadd.xlane.f32.xlu0 %v2139_v61  ;;  %2954 = vmatprep.subr.bf16.mxu1 %v3099_v41 }
 0xc38   : > { %2955 = vmatpush3.bf16.msra.mxu1 %v3099_v41 }
 0xcb2   : > { %v2123_v63 = vpop.xlane.xlu0 %2122 }
 0xcb3   : > { %v2145_v37 = vmul.f32 0.015625, %v2123_v63 }
 0xcb4   : > { %v2126_v57 = vpop.xlane.xlu1 %2125 }
 0xcb5   : > { %v4105_v32 = vsub.f32 %v4065_v24, %v2145_v37  ;;  %v2146_v19 = vmul.f32 0.015625, %v2126_v57 }
 0xcb6   : > { %v2129_v3 = vpop.xlane.xlu0 %2128 }
 0xcb7   : > { %v4108_v33 = vsub.f32 %v4071_v28, %v2146_v19  ;;  %v2147_v20 = vmul.f32 0.015625, %v2129_v3  ;;  %v2161_v35 = vmul.f32 %v4105_v32, %v4105_v32 }
 0xcb9   : > { %v4113_v50 = vsub.f32 %v4068_v14, %v2147_v20  ;;  %v2169_v52 = vsel %vm425_vm0, %v2161_v35, 0.0  ;;  %v2162_v58 = vmul.f32 %v4108_v33, %v4108_v33 }
 0xcba   : > { %2170 = vadd.xlane.f32.xlu0 %v2169_v52  ;;  %v2132_v22 = vpop.xlane.xlu0 %2131  ;;  %v2688_v52 = vld [vmem:[%s4242_s6] ss:$0 sm:$0xff] }
 0xcbb   : > { %v2148_v45 = vmul.f32 0.015625, %v2132_v22  ;;  %v2172_v62 = vsel %vm425_vm0, %v2162_v58, 0.0  ;;  %v2163_v44 = vmul.f32 %v4113_v50, %v4113_v50 }
 0xcbc   : > { %2173 = vadd.xlane.f32.xlu1 %v2172_v62  ;;  %v2138_v10 = vpop.xlane.xlu1 %2137 }
 0xcbd   : > { %v4122_v29 = vsub.f32 %v4078_v55, %v2148_v45  ;;  %v2150_v12 = vmul.f32 0.015625, %v2138_v10  ;;  %v2175_v48 = vsel %vm425_vm0, %v2163_v44, 0.0 }
 0xcbe   : > { %2176 = vadd.xlane.f32.xlu0 %v2175_v48  ;;  %v2135_v43 = vpop.xlane.xlu0 %2134 }
 0xcbf   : > { %v4126_v16 = vsub.f32 %v4086_v6, %v2150_v12  ;;  %v2149_v11 = vmul.f32 0.015625, %v2135_v43  ;;  %v2164_v5 = vmul.f32 %v4122_v29, %v4122_v29 }
 0xcc0   : > { %v2144_v59 = vpop.xlane.xlu1 %2143 }
 0xcc1   : > { %v4131_v25 = vsub.f32 %v4083_v21, %v2149_v11  ;;  %v2152_v47 = vmul.f32 0.015625, %v2144_v59  ;;  %v2178_v49 = vsel %vm425_vm0, %v2164_v5, 0.0  ;;  %v2166_v13 = vmul.f32 %v4126_v16, %v4126_v16  ;;  %v2689_v59 = vld [vmem:[%s4243_s7] ss:$0 sm:$0xff] }
 0xcc2   : > { %2179 = vadd.xlane.f32.xlu1 %v2178_v49  ;;  %v2141_v8 = vpop.xlane.xlu0 %2140 }
 0xcc3   : > { %v4137_v9 = vsub.f32 %v4091_v7, %v2152_v47  ;;  %v2151_v53 = vmul.f32 0.015625, %v2141_v8  ;;  %v2165_v60 = vmul.f32 %v4131_v25, %v4131_v25  ;;  %v2184_v2 = vsel %vm425_vm0, %v2166_v13, 0.0 }
 0xcc5   : > { %v4142_v15 = vsub.f32 %v4096_v27, %v2151_v53  ;;  %v2181_v39 = vsel %vm425_vm0, %v2165_v60, 0.0  ;;  %v2168_v4 = vmul.f32 %v4137_v9, %v4137_v9 }
 0xcc6   : > { %2185 = vadd.xlane.f32.xlu1 %v2184_v2  ;;  %2182 = vadd.xlane.f32.xlu0 %v2181_v39 }
 0xcc7   : > { %v2167_v23 = vmul.f32 %v4142_v15, %v4142_v15  ;;  %v2190_v26 = vsel %vm425_vm0, %v2168_v4, 0.0 }
 0xcc9   : > { %v2187_v36 = vsel %vm425_vm0, %v2167_v23, 0.0 }
 0xcca   : > { %2191 = vadd.xlane.f32.xlu1 %v2190_v26  ;;  %2188 = vadd.xlane.f32.xlu0 %v2187_v36 }
 0xd47   : > { %v2171_v42 = vpop.xlane.xlu0 %2170 }
 0xd48   : > { %v2193_v17 = vmul.f32 0.015625, %v2171_v42 }
 0xd49   : > { %v2174_v38 = vpop.xlane.xlu1 %2173 }
 0xd4a   : > { %v2201_v1 = vadd.f32 1e-05, %v2193_v17  ;;  %v2194_v40 = vmul.f32 0.015625, %v2174_v38 }
 0xd4b   : > { %v2177_v46 = vpop.xlane.xlu0 %2176 }
 0xd4c   : > { %3252 = vrsqrt.f32 %v2201_v1  ;;  %v2202_v18 = vadd.f32 1e-05, %v2194_v40  ;;  %v2195_v56 = vmul.f32 0.015625, %v2177_v46 }
 0xd4e   : > { %3254 = vrsqrt.f32 %v2202_v18  ;;  %v2203_v34 = vadd.f32 1e-05, %v2195_v56 }
 0xd4f   : > { %v2180_v61 = vpop.xlane.xlu1 %2179 }
 0xd50   : > { %3256 = vrsqrt.f32 %v2203_v34  ;;  %v2196_v63 = vmul.f32 0.015625, %v2180_v61  ;;  %v3104_v34 = vld [vmem:[%s4246_s10 + $0x20] sm:$0xff]   ;;  %v3105_v61 = vld [vmem:[%s4246_s10 + $0x28] sm:$0xff]  }
 0xd52   : > { %v2204_v37 = vadd.f32 1e-05, %v2196_v63  ;;  %v3106_v63 = vld [vmem:[%s4246_s10 + $0x30] sm:$0xff]  }
 0xd53   : > { %v2186_v57 = vpop.xlane.xlu1 %2185  ;;  %v2183_v19 = vpop.xlane.xlu0 %2182 }
 0xd54   : > { %3258 = vrsqrt.f32 %v2204_v37  ;;  %v2198_v3 = vmul.f32 0.015625, %v2186_v57  ;;  %v2197_v20 = vmul.f32 0.015625, %v2183_v19  ;;  %v3107_v37 = vld [vmem:[%s4246_s10 + $0x38] sm:$0xff]   ;;  %v2690_v57 = vld [vmem:[%s4245_s9] ss:$0 sm:$0xff] }
 0xd56   : > { %v3253_v35 = vpop.eup %3252  ;;  %v2206_v58 = vadd.f32 1e-05, %v2198_v3  ;;  %v2205_v22 = vadd.f32 1e-05, %v2197_v20 }
 0xd57   : > { %v2217_v45 = vmul.f32 %v3253_v35, %v4105_v32  ;;  %v2192_v62 = vpop.xlane.xlu1 %2191  ;;  %v2189_v44 = vpop.xlane.xlu0 %2188 }
 0xd58   : > { %v3255_v10 = vpop.eup %3254  ;;  %3260 = vrsqrt.f32 %v2206_v58  ;;  %v2200_v12 = vmul.f32 0.015625, %v2192_v62  ;;  %v2199_v48 = vmul.f32 0.015625, %v2189_v44 }
 0xd59   : > { %v2218_v43 = vmul.f32 %v3255_v10, %v4108_v33  ;;  %3262 = vrsqrt.f32 %v2205_v22  ;;  %v2231_v11 = vmul.f32 %v2688_v52, %v2217_v45 }
 0xd5a   : > { %v3257_v5 = vpop.eup %3256  ;;  %v2208_v47 = vadd.f32 1e-05, %v2200_v12  ;;  %v2207_v49 = vadd.f32 1e-05, %v2199_v48 }
 0xd5b   : > { %v2219_v13 = vmul.f32 %v3257_v5, %v4113_v50  ;;  %v2232_v32 = vmul.f32 %v2688_v52, %v2218_v43  ;;  %v2245_v8 = vadd.f32 %v2689_v59, %v2231_v11 }
 0xd5c   : > { %3264 = vrsqrt.f32 %v2208_v47 }
 0xd5d   : > { %3266 = vrsqrt.f32 %v2207_v49  ;;  %v2246_v53 = vadd.f32 %v2689_v59, %v2232_v32  ;;  %v2233_v2 = vmul.f32 %v2688_v52, %v2219_v13 }
 0xd5e   : > { %v3259_v60 = vpop.eup %3258 }
 0xd5f   : > { %v2220_v33 = vmul.f32 %v3259_v60, %v4122_v29  ;;  %v2253_v39 = vpack.c.bf16 %v2246_v53, %v2245_v8  ;;  %v2247_v36 = vadd.f32 %v2689_v59, %v2233_v2 }
 0xd61   : > { %v2234_v4 = vmul.f32 %v2688_v52, %v2220_v33  ;;  %2956 = vmatprep.mubr.msk.bf16.mxu1 %vm425_vm0, %v2253_v39 }
 0xd62   : > { %v3261_v23 = vpop.eup %3260 }
 0xd63   : > { %v3263_v26 = vpop.eup %3262  ;;  %v2248_v51 = vadd.f32 %v2689_v59, %v2234_v4  ;;  %v2222_v31 = vmul.f32 %v3261_v23, %v4126_v16 }
 0xd64   : > { %v2221_v50 = vmul.f32 %v3263_v26, %v4131_v25 }
 0xd65   : > { %v2254_v54 = vpack.c.bf16 %v2248_v51, %v2247_v36  ;;  %v2236_v41 = vmul.f32 %v2688_v52, %v2222_v31 }
 0xd66   : > { %v3265_v0 = vpop.eup %3264  ;;  %v2235_v30 = vmul.f32 %v2688_v52, %v2221_v50 }
 0xd67   : > { %v3267_v42 = vpop.eup %3266  ;;  %v2224_v17 = vmul.f32 %v3265_v0, %v4137_v9  ;;  %2957 = vmatmul.mubr.msk.bf16.vlgmr.msra.gmra.mrb[48].mxu1 %vm425_vm0, %v2254_v54  ;;  %v2250_v29 = vadd.f32 %v2689_v59, %v2236_v41  ;;  %v3102_v9 = vld [vmem:[%s4246_s10 + $0x10] sm:$0xff]  }
 0xd68   : > { %v2223_v38 = vmul.f32 %v3267_v42, %v4142_v15  ;;  %v2249_v1 = vadd.f32 %v2689_v59, %v2235_v30  ;;  %2968 = vmatprep.subr.bf16.mxu0 %v3102_v9  ;;  %v3103_v15 = vld [vmem:[%s4246_s10 + $0x18] sm:$0xff]  }
 0xd69   : > { %v2238_v40 = vmul.f32 %v2688_v52, %v2224_v17  ;;  %2969 = vmatpush3.bf16.msra.mxu0 %v3102_v9 }
 0xd6a   : > { %v2255_v46 = vpack.c.bf16 %v2250_v29, %v2249_v1  ;;  %v2237_v18 = vmul.f32 %v2688_v52, %v2223_v38  ;;  %2970 = vmatprep.subr.bf16.mxu0 %v3103_v15 }
 0xd6b   : > { %v2252_v56 = vadd.f32 %v2689_v59, %v2238_v40 }
 0xd6c   : > { %2960 = vmatprep.mubr.msk.bf16.mxu1 %vm425_vm0, %v2255_v46  ;;  %v2251_v16 = vadd.f32 %v2689_v59, %v2237_v18 }
 0xd6d   : > { %2971 = vmatpush3.bf16.msra.mxu0 %v3103_v15 }
 0xd6e   : > { %v2256_v25 = vpack.c.bf16 %v2252_v56, %v2251_v16  ;;  %2972 = vmatprep.subr.bf16.mxu0 %v3104_v34 }
 0xd70   : > { %2961 = vmatmul.mubr.msk.bf16.gmra.mrb[52].mxu1 %vm425_vm0, %v2256_v25 }
 0xd71   : > { %2973 = vmatpush3.bf16.msra.mxu0 %v3104_v34 }
 0xd72   : > { %2974 = vmatprep.subr.bf16.mxu0 %v3105_v61 }
 0xd75   : > { %2975 = vmatpush3.bf16.msra.mxu0 %v3105_v61 }
 0xd76   : > { %2976 = vmatprep.subr.bf16.mxu0 %v3106_v63 }
 0xd79   : > { %2977 = vmatpush3.bf16.msra.mxu0 %v3106_v63 }
 0xd7a   : > { %2978 = vmatprep.subr.bf16.mxu0 %v3107_v37 }
 0xd7d   : > { %2979 = vmatpush3.bf16.msra.mxu0 %v3107_v37 }
 0xe3a   : > { %v2958_v19 = vpop.f32.mrb[48].mxu1 }
 0xe3b   : > { %v2351_v3 = vadd.f32 %v2958_v19, %v2690_v57  ;;  %v2342_v20 = vpop.f32.mrb[49].mxu1 }
 0xe3c   : > { %v2343_v35 = vadd.f32 %v2690_v57, %v2342_v20  ;;  %v2959_v52 = vpop.f32.mrb[50].mxu1 }
 0xe3d   : > { %v2383_v58 = vmul.f32 0.70710677, %v2351_v3  ;;  %v2354_v22 = vadd.f32 %v2959_v52, %v2690_v57  ;;  %v2345_v45 = vpop.f32.mrb[51].mxu1  ;;  %v2375_v36 = vmul.f32 0.5, %v2351_v3  ;;  %v2699_v52 = vld [vmem:[%s4247_s11] ss:$0 sm:$0xff] }
 0xe3e   : > { %v2381_v62 = vmul.f32 0.70710677, %v2343_v35  ;;  %v2346_v44 = vadd.f32 %v2690_v57, %v2345_v45  ;;  %v2373_v50 = vmul.f32 0.5, %v2343_v35 }
 0xe3f   : > { %3268 = verf.f32 %v2383_v58  ;;  %v2384_v10 = vmul.f32 0.70710677, %v2354_v22  ;;  %v2376_v51 = vmul.f32 0.5, %v2354_v22 }
 0xe40   : > { %3270 = verf.f32 %v2381_v62  ;;  %v2382_v12 = vmul.f32 0.70710677, %v2346_v44  ;;  %v2374_v54 = vmul.f32 0.5, %v2346_v44 }
 0xe41   : > { %3272 = verf.f32 %v2384_v10 }
 0xe42   : > { %3274 = verf.f32 %v2382_v12 }
 0xe43   : > { %v2962_v48 = vpop.f32.mrb[52].mxu1 }
 0xe44   : > { %v2367_v43 = vadd.f32 %v2962_v48, %v2690_v57  ;;  %v2358_v11 = vpop.f32.mrb[53].mxu1 }
 0xe45   : > { %v2359_v5 = vadd.f32 %v2690_v57, %v2358_v11  ;;  %v2963_v59 = vpop.f32.mrb[54].mxu1 }
 0xe46   : > { %v2387_v47 = vmul.f32 0.70710677, %v2367_v43  ;;  %v2370_v49 = vadd.f32 %v2963_v59, %v2690_v57  ;;  %v2361_v13 = vpop.f32.mrb[55].mxu1  ;;  %v2379_v25 = vmul.f32 0.5, %v2367_v43 }
 0xe47   : > { %v2385_v32 = vmul.f32 0.70710677, %v2359_v5  ;;  %v2362_v8 = vadd.f32 %v2690_v57, %v2361_v13  ;;  %v2377_v34 = vmul.f32 0.5, %v2359_v5 }
 0xe48   : > { %3276 = verf.f32 %v2387_v47  ;;  %v2388_v53 = vmul.f32 0.70710677, %v2370_v49  ;;  %v2380_v9 = vmul.f32 0.5, %v2370_v49 }
 0xe49   : > { %v3269_v60 = vpop.eup %3268  ;;  %3278 = verf.f32 %v2385_v32  ;;  %v2386_v2 = vmul.f32 0.70710677, %v2362_v8  ;;  %v2378_v61 = vmul.f32 0.5, %v2362_v8 }
 0xe4a   : > { %v3271_v33 = vpop.eup %3270  ;;  %v2399_v39 = vadd.f32 1.0, %v3269_v60  ;;  %3280 = verf.f32 %v2388_v53 }
 0xe4b   : > { %v3273_v4 = vpop.eup %3272  ;;  %v2397_v23 = vadd.f32 1.0, %v3271_v33  ;;  %3282 = verf.f32 %v2386_v2 }
 0xe4c   : > { %v3275_v26 = vpop.eup %3274  ;;  %v2400_v31 = vadd.f32 1.0, %v3273_v4  ;;  %v2407_v0 = vmul.f32 %v2399_v39, %v2375_v36 }
 0xe4d   : > { %v2398_v41 = vadd.f32 1.0, %v3275_v26  ;;  %v2405_v42 = vmul.f32 %v2397_v23, %v2373_v50 }
 0xe4e   : > { %v2408_v30 = vmul.f32 %v2400_v31, %v2376_v51 }
 0xe4f   : > { %v2406_v17 = vmul.f32 %v2398_v41, %v2374_v54 }
 0xe50   : > { %v2414_v29 = vpack.c.bf16 %v2408_v30, %v2407_v0 }
 0xe51   : > { %v2413_v38 = vpack.c.bf16 %v2406_v17, %v2405_v42 }
 0xe52   : > { %v3277_v1 = vpop.eup %3276 }
 0xe53   : > { %v3279_v40 = vpop.eup %3278  ;;  %v2403_v46 = vadd.f32 1.0, %v3277_v1  ;;  %2980 = vmatprep.mubr.bf16.mxu0 %v2413_v38 }
 0xe54   : > { %v3281_v18 = vpop.eup %3280  ;;  %v2401_v56 = vadd.f32 1.0, %v3279_v40  ;;  %2981 = vmatmul.mubr.bf16.vlgmr.msra.gmra.mrb[40].mxu0 %v2414_v29 }
 0xe55   : > { %v3283_v16 = vpop.eup %3282  ;;  %v2404_v15 = vadd.f32 1.0, %v3281_v18  ;;  %v2411_v37 = vmul.f32 %v2403_v46, %v2379_v25 }
 0xe56   : > { %v2402_v63 = vadd.f32 1.0, %v3283_v16  ;;  %v2409_v19 = vmul.f32 %v2401_v56, %v2377_v34 }
 0xe57   : > { %v2412_v57 = vmul.f32 %v2404_v15, %v2380_v9 }
 0xe58   : > { %v2410_v3 = vmul.f32 %v2402_v63, %v2378_v61 }
 0xe59   : > { %v2416_v20 = vpack.c.bf16 %v2412_v57, %v2411_v37 }
 0xe5a   : > { %v2415_v35 = vpack.c.bf16 %v2410_v3, %v2409_v19 }
 0xe5c   : > { %2984 = vmatprep.mubr.bf16.mxu0 %v2415_v35 }
 0xe5d   : > { %2985 = vmatmul.mubr.bf16.gmra.mrb[44].mxu0 %v2416_v20 }
 0xf27   : > { %v2982_v58 = vpop.f32.mrb[40].mxu0 }
 0xf28   : > { %v2531_v22 = vadd.f32 %v2982_v58, %v2699_v52  ;;  %v2522_v45 = vpop.f32.mrb[41].mxu0 }
 0xf29   : > { %v2523_v62 = vadd.f32 %v2699_v52, %v2522_v45  ;;  %v2983_v44 = vpop.f32.mrb[42].mxu0 }
 0xf2a   : > { %v2555_v10 = vadd.f32 %v2531_v22, %v4068_v14  ;;  %v2534_v12 = vadd.f32 %v2983_v44, %v2699_v52  ;;  %v2525_v48 = vpop.f32.mrb[43].mxu0 }
 0xf2b   : > { %v2553_v43 = vadd.f32 %v2523_v62, %v4065_v24  ;;  %v2526_v11 = vadd.f32 %v2699_v52, %v2525_v48 }
 0xf2c   : > { %2563 = vst.msk [vmem:[%s413_s24 + $0x10] sm:$0xff] %vm425_vm0, %v2555_v10  ;;  %v2556_v5 = vadd.f32 %v2534_v12, %v4078_v55 }
 0xf2d   : > { %2561 = vst.msk [vmem:[%s413_s24] sm:$0xff] %vm425_vm0, %v2553_v43  ;;  %v2554_v59 = vadd.f32 %v2526_v11, %v4071_v28 }
 0xf2e   : > { %2564 = vst.msk [vmem:[%s413_s24 + $0x18] sm:$0xff] %vm425_vm0, %v2556_v5 }
 0xf2f   : > { %2562 = vst.msk [vmem:[%s413_s24 + $0x8] sm:$0xff] %vm425_vm0, %v2554_v59 }
 0xf30   : > { %v2986_v47 = vpop.f32.mrb[44].mxu0 }
 0xf31   : > { %v2547_v49 = vadd.f32 %v2986_v47, %v2699_v52  ;;  %v2538_v14 = vpop.f32.mrb[45].mxu0 }
 0xf32   : > { %v2539_v13 = vadd.f32 %v2699_v52, %v2538_v14  ;;  %v2987_v32 = vpop.f32.mrb[46].mxu0 }
 0xf33   : > { %v2559_v24 = vadd.f32 %v2547_v49, %v4096_v27  ;;  %v2550_v8 = vadd.f32 %v2987_v32, %v2699_v52  ;;  %v2541_v53 = vpop.f32.mrb[47].mxu0 }
 0xf34   : > { %v2557_v60 = vadd.f32 %v2539_v13, %v4083_v21  ;;  %v2542_v55 = vadd.f32 %v2699_v52, %v2541_v53 }
 0xf35   : > { %2567 = vst.msk [vmem:[%s413_s24 + $0x30] sm:$0xff] %vm425_vm0, %v2559_v24  ;;  %v2560_v28 = vadd.f32 %v2550_v8, %v4091_v7 }
 0xf36   : > { %2565 = vst.msk [vmem:[%s413_s24 + $0x20] sm:$0xff] %vm425_vm0, %v2557_v60  ;;  %v2558_v2 = vadd.f32 %v2542_v55, %v4086_v6 }
 0xf37   : > { %2568 = vst.msk [vmem:[%s413_s24 + $0x38] sm:$0xff] %vm425_vm0, %v2560_v28 }
 0xf38   : > { %2566 = vst.msk [vmem:[%s413_s24 + $0x28] sm:$0xff] %vm425_vm0, %v2558_v2 }
 0xf39 PF: > { %s22_s21 = sadd.s32 1, %s3298_s21  }
 0xf3a   : > { %p19_p4 = scmp.ge.s32.totalorder %s22_s21, 4  }
 0xf3c   :  { %21 = sbr.rel (!%p19_p4) target bundleno = 1 (0x1), region = 98 }

</bundles_post_ra>
